<compile_context>
chip_gen: v5e
topology: v5e:2x2
jax: 0.10.0
libtpu: 0.0.40
codegen_flags: <defaults>
</compile_context>

<pallas_src>
from functools import partial

import jax
import jax.numpy as jnp
from jax import lax
from jax.experimental import pallas as pl
from jax.experimental.pallas import tpu as pltpu

_EPS = 1e-5
_LANE = 128


def _rup(x, m):
    return ((x + m - 1) // m) * m


# -----------------------------------------------------------------------------
# Fused kernel
# -----------------------------------------------------------------------------
def _bn_scale_shift(y, gamma, beta, mask, count):
    # Single-pass (optionally masked) training-mode BatchNorm folded into one
    # per-channel scale + shift.  `count` is the number of valid rows.
    if mask is None:
        s1 = jnp.sum(y, axis=0, keepdims=True)
        s2 = jnp.sum(y * y, axis=0, keepdims=True)
    else:
        s1 = jnp.sum(y * mask, axis=0, keepdims=True)
        s2 = jnp.sum(y * y * mask, axis=0, keepdims=True)
    mean = s1 / count
    var = s2 / count - mean * mean
    scale = gamma * lax.rsqrt(var + _EPS)
    shift = beta - mean * scale
    return y * scale + shift


def _bottleneck_kernel(x_ref, w1_ref, w2_ref, w3_ref, ws_ref,
                       g1_ref, b1_ref, g2_ref, b2_ref, g3_ref, b3_ref,
                       gs_ref, bs_ref, mint_ref, mctr_ref,
                       o_ref, y1p_ref,
                       *, G, Mp, Wp, Cmid_p, count1, count2, proj):
    x = x_ref[...]                       # (Mp, Cin_p) padded input slab
    mint = mint_ref[...]                 # (Mp, 1) interior (non-halo) mask
    mctr = mctr_ref[...]                 # (Mp, 1) valid stride-s center mask

    # ---- conv1 (1x1) + BN + ReLU -------------------------------------------
    # Halo rows of x are exactly zero, so plain column sums are already the
    # sums over valid rows; divide by the true valid count.
    y1 = jnp.dot(x, w1_ref[...], preferred_element_type=jnp.float32)
    y1 = _bn_scale_shift(y1, g1_ref[...], b1_ref[...], None, count1)
    y1 = jnp.maximum(y1, 0.0) * mint     # re-zero the spatial halo rows

    # Stage y1 into a guarded VMEM scratch so each 3x3 tap is a plain
    # row-shifted slice (in-VMEM "im2col", never touches HBM).
    zeros_g = jnp.zeros((G, Cmid_p), jnp.float32)
    y1p_ref[pl.ds(0, G), :] = zeros_g
    y1p_ref[pl.ds(G + Mp, G), :] = zeros_g
    y1p_ref[pl.ds(G, Mp), :] = y1

    # ---- conv2 (3x3, stride s) as 9 shifted MXU matmuls + BN + ReLU --------
    acc = None
    for dy in range(3):
        for dx in range(3):
            off = (dy - 1) * Wp + (dx - 1)
            t = dy * 3 + dx
            a = y1p_ref[pl.ds(G + off, Mp), :]
            w_t = w2_ref[pl.ds(t * Cmid_p, Cmid_p), :]
            p = jnp.dot(a, w_t, preferred_element_type=jnp.float32)
            acc = p if acc is None else acc + p
    # Only stride-s center rows are real conv outputs -> masked statistics.
    y2 = _bn_scale_shift(acc, g2_ref[...], b2_ref[...], mctr, count2)
    y2 = jnp.maximum(y2, 0.0)

    # ---- conv3 (1x1) + BN ----------------------------------------------------
    y3 = jnp.dot(y2, w3_ref[...], preferred_element_type=jnp.float32)
    y3 = _bn_scale_shift(y3, g3_ref[...], b3_ref[...], mctr, count2)

    # ---- shortcut ------------------------------------------------------------
    if proj:
        sc = jnp.dot(x, ws_ref[...], preferred_element_type=jnp.float32)
        sc = _bn_scale_shift(sc, gs_ref[...], bs_ref[...], mctr, count2)
    else:
        sc = x                            # identity shortcut (Cin_p == Cexp_p)

    # ---- residual add + ReLU (lane-dense store, junk rows sliced off later) --
    o_ref[...] = jnp.maximum(y3 + sc, 0.0)


# -----------------------------------------------------------------------------
# Wrapper: layout plumbing in plain JAX, one pallas_call
# -----------------------------------------------------------------------------
def _w1x1_to_2d(w):                       # (Cout, Cin, 1, 1) -> (Cin, Cout)
    return jnp.transpose(w[:, :, 0, 0], (1, 0))


def _pad_to(a, shape):
    pads = [(0, s - d) for d, s in zip(a.shape, shape)]
    return jnp.pad(a.astype(jnp.float32), pads)


def bottleneck_forward(x_nchw, params, stride):
    N, Cin, H, W = x_nchw.shape
    Cmid = params["w1"].shape[0]
    Cexp = params["w3"].shape[0]
    Hp, Wp = H + 2, W + 2
    Ho = (H - 1) // stride + 1
    Wo = (W - 1) // stride + 1
    Mp = N * Hp * Wp
    G = Wp + 1                             # halo guard rows for the 3x3 shifts
    Cin_p, Cmid_p, Cexp_p = (_rup(c, _LANE) for c in (Cin, Cmid, Cexp))
    proj = (stride != 1) or (Cin != Cexp)

    # NHWC, zero spatial halo + zero channel padding, flattened to a 2-D slab.
    x = jnp.transpose(x_nchw, (0, 2, 3, 1)).astype(jnp.float32)
    xp = jnp.pad(x, ((0, 0), (1, 1), (1, 1), (0, Cin_p - Cin)))
    xp2d = xp.reshape(Mp, Cin_p)

    # Row-validity masks over the padded slab.
    hp = jnp.arange(Hp)
    wp = jnp.arange(Wp)
    interior = (((hp >= 1) & (hp <= H))[:, None]
                & ((wp >= 1) & (wp <= W))[None, :])
    ch = (hp >= 1) & ((hp - 1) % stride == 0) & ((hp - 1) // stride < Ho)
    cw = (wp >= 1) & ((wp - 1) % stride == 0) & ((wp - 1) // stride < Wo)
    center = ch[:, None] & cw[None, :]
    mint = jnp.broadcast_to(interior[None], (N, Hp, Wp)
                            ).reshape(Mp, 1).astype(jnp.float32)
    mctr = jnp.broadcast_to(center[None], (N, Hp, Wp)
                            ).reshape(Mp, 1).astype(jnp.float32)

    # Weights as lane-dense 2-D matmul operands (zero-padded channels).
    w1 = _pad_to(_w1x1_to_2d(params["w1"]), (Cin_p, Cmid_p))
    w3 = _pad_to(_w1x1_to_2d(params["w3"]), (Cmid_p, Cexp_p))
    w2 = jnp.transpose(params["w2"], (2, 3, 1, 0))        # (kh, kw, Cin, Cout)
    w2 = _pad_to(w2, (3, 3, Cmid_p, Cmid_p)).reshape(9 * Cmid_p, Cmid_p)
    if proj:
        ws = _pad_to(_w1x1_to_2d(params["ws"]), (Cin_p, Cexp_p))
        gs = _pad_to(params["gs"].reshape(1, -1), (1, Cexp_p))
        bs = _pad_to(params["bs"].reshape(1, -1), (1, Cexp_p))
    else:
        ws = jnp.zeros((Cin_p, Cexp_p), jnp.float32)
        gs = jnp.zeros((1, Cexp_p), jnp.float32)
        bs = jnp.zeros((1, Cexp_p), jnp.float32)
    g1 = _pad_to(params["g1"].reshape(1, -1), (1, Cmid_p))
    b1 = _pad_to(params["b1"].reshape(1, -1), (1, Cmid_p))
    g2 = _pad_to(params["g2"].reshape(1, -1), (1, Cmid_p))
    b2 = _pad_to(params["b2"].reshape(1, -1), (1, Cmid_p))
    g3 = _pad_to(params["g3"].reshape(1, -1), (1, Cexp_p))
    b3 = _pad_to(params["b3"].reshape(1, -1), (1, Cexp_p))

    args = (xp2d, w1, w2, w3, ws, g1, b1, g2, b2, g3, b3, gs, bs, mint, mctr)

    kernel = partial(_bottleneck_kernel, G=G, Mp=Mp, Wp=Wp, Cmid_p=Cmid_p,
                     count1=float(N * H * W), count2=float(N * Ho * Wo),
                     proj=proj)

    flops = 2 * Mp * (Cin_p * Cmid_p + 9 * Cmid_p * Cmid_p + Cmid_p * Cexp_p
                      + (Cin_p * Cexp_p if proj else 0))
    bytes_accessed = sum(int(a.size) * 4 for a in args) + Mp * Cexp_p * 4

    def _spec(shape):
        return pl.BlockSpec(shape, lambda i: tuple(0 for _ in shape))

    out2d = pl.pallas_call(
        kernel,
        out_shape=jax.ShapeDtypeStruct((Mp, Cexp_p), jnp.float32),
        grid=(1,),
        in_specs=[_spec(a.shape) for a in args],
        out_specs=_spec((Mp, Cexp_p)),
        scratch_shapes=[pltpu.VMEM((Mp + 2 * G, Cmid_p), jnp.float32)],
        compiler_params=pltpu.CompilerParams(
            dimension_semantics=("arbitrary",),
            vmem_limit_bytes=32 * 1024 * 1024),
        cost_estimate=pl.CostEstimate(flops=flops, transcendentals=0,
                                      bytes_accessed=bytes_accessed),
    )(*args)

    # Slice the valid stride-s centers out of the padded output slab.
    out = out2d.reshape(N, Hp, Wp, Cexp_p)
    out = out[:, 1:1 + stride * Ho:stride, 1:1 + stride * Wo:stride, :Cexp]
    return jnp.transpose(out, (0, 3, 1, 2))               # back to NCHW


# -----------------------------------------------------------------------------
# Pure-JAX reference (correctness check)
# -----------------------------------------------------------------------------
def _ref_conv(x, w, stride=1, pad=0):
    return lax.conv_general_dilated(x, w, (stride, stride),
                                    [(pad, pad), (pad, pad)],
                                    dimension_numbers=("NCHW", "OIHW", "NCHW"))


def _ref_bn(x, gamma, beta):
    mean = x.mean(axis=(0, 2, 3), keepdims=True)
    var = ((x - mean) ** 2).mean(axis=(0, 2, 3), keepdims=True)
    xhat = (x - mean) * lax.rsqrt(var + _EPS)
    return xhat * gamma[None, :, None, None] + beta[None, :, None, None]


def bottleneck_reference(x, p, stride):
    Cin, Cexp = x.shape[1], p["w3"].shape[0]
    y = jax.nn.relu(_ref_bn(_ref_conv(x, p["w1"]), p["g1"], p["b1"]))
    y = jax.nn.relu(_ref_bn(_ref_conv(y, p["w2"], stride, 1), p["g2"], p["b2"]))
    y = _ref_bn(_ref_conv(y, p["w3"]), p["g3"], p["b3"])
    if stride != 1 or Cin != Cexp:
        s = _ref_bn(_ref_conv(x, p["ws"], stride), p["gs"], p["bs"])
    else:
        s = x
    return jax.nn.relu(y + s)


# -----------------------------------------------------------------------------
if __name__ == "__main__":
    key = jax.random.PRNGKey(0)
    N, Cin, H, W = 2, 16, 8, 8
    Cmid, stride = 8, 2
    Cexp = Cmid * 4                      # expansion = 4

    ks = jax.random.split(key, 12)
    params = {
        "w1": 0.1 * jax.random.normal(ks[0], (Cmid, Cin, 1, 1), jnp.float32),
        "g1": 1.0 + 0.1 * jax.random.normal(ks[1], (Cmid,), jnp.float32),
        "b1": 0.1 * jax.random.normal(ks[2], (Cmid,), jnp.float32),
        "w2": 0.1 * jax.random.normal(ks[3], (Cmid, Cmid, 3, 3), jnp.float32),
        "g2": 1.0 + 0.1 * jax.random.normal(ks[4], (Cmid,), jnp.float32),
        "b2": 0.1 * jax.random.normal(ks[5], (Cmid,), jnp.float32),
        "w3": 0.1 * jax.random.normal(ks[6], (Cexp, Cmid, 1, 1), jnp.float32),
        "g3": 1.0 + 0.1 * jax.random.normal(ks[7], (Cexp,), jnp.float32),
        "b3": 0.1 * jax.random.normal(ks[8], (Cexp,), jnp.float32),
        "ws": 0.1 * jax.random.normal(ks[9], (Cexp, Cin, 1, 1), jnp.float32),
        "gs": 1.0 + 0.1 * jax.random.normal(ks[10], (Cexp,), jnp.float32),
        "bs": 0.1 * jax.random.normal(ks[11], (Cexp,), jnp.float32),
    }
    x = jax.random.normal(jax.random.PRNGKey(42), (N, Cin, H, W), jnp.float32)

    fwd = jax.jit(bottleneck_forward, static_argnums=2)
    out = jax.block_until_ready(fwd(x, params, stride))

    ref = bottleneck_reference(x, params, stride)
    Ho = (H - 1) // stride + 1
    Wo = (W - 1) // stride + 1
    assert out.shape == (N, Cexp, Ho, Wo), out.shape
    err = float(jnp.max(jnp.abs(out - ref)))
    assert err < 5e-4, err

    print("KERNEL_OK")
</pallas_src>

<mosaic_0001>
module attributes {stable_mosaic.version = 11 : i64} {
  func.func @_bottleneck_kernel(%arg0: i32, %arg1: memref<200x128xf32, #tpu.memory_space<vmem>>, %arg2: memref<128x128xf32, #tpu.memory_space<vmem>>, %arg3: memref<1152x128xf32, #tpu.memory_space<vmem>>, %arg4: memref<128x128xf32, #tpu.memory_space<vmem>>, %arg5: memref<128x128xf32, #tpu.memory_space<vmem>>, %arg6: memref<1x128xf32, #tpu.memory_space<vmem>>, %arg7: memref<1x128xf32, #tpu.memory_space<vmem>>, %arg8: memref<1x128xf32, #tpu.memory_space<vmem>>, %arg9: memref<1x128xf32, #tpu.memory_space<vmem>>, %arg10: memref<1x128xf32, #tpu.memory_space<vmem>>, %arg11: memref<1x128xf32, #tpu.memory_space<vmem>>, %arg12: memref<1x128xf32, #tpu.memory_space<vmem>>, %arg13: memref<1x128xf32, #tpu.memory_space<vmem>>, %arg14: memref<200x1xf32, #tpu.memory_space<vmem>>, %arg15: memref<200x1xf32, #tpu.memory_space<vmem>>, %arg16: memref<200x128xf32, #tpu.memory_space<vmem>>, %arg17: memref<222x128xf32, #tpu.memory_space<vmem>>) attributes {dimension_semantics = [#tpu.dimension_semantics<arbitrary>], iteration_bounds = array<i64: 1>, scalar_prefetch = 0 : i64, scratch_operands = 1 : i64, tpu.core_type = #tpu.core_type<tc>, window_params = [{pipeline_mode = #tpu.pipeline_mode<synchronous>, transform_indices = @transform_0, window_bounds = array<i64: 200, 128>}, {pipeline_mode = #tpu.pipeline_mode<synchronous>, transform_indices = @transform_1, window_bounds = array<i64: 128, 128>}, {pipeline_mode = #tpu.pipeline_mode<synchronous>, transform_indices = @transform_2, window_bounds = array<i64: 1152, 128>}, {pipeline_mode = #tpu.pipeline_mode<synchronous>, transform_indices = @transform_3, window_bounds = array<i64: 128, 128>}, {pipeline_mode = #tpu.pipeline_mode<synchronous>, transform_indices = @transform_4, window_bounds = array<i64: 128, 128>}, {pipeline_mode = #tpu.pipeline_mode<synchronous>, transform_indices = @transform_5, window_bounds = array<i64: 1, 128>}, {pipeline_mode = #tpu.pipeline_mode<synchronous>, transform_indices = @transform_6, window_bounds = array<i64: 1, 128>}, {pipeline_mode = #tpu.pipeline_mode<synchronous>, transform_indices = @transform_7, window_bounds = array<i64: 1, 128>}, {pipeline_mode = #tpu.pipeline_mode<synchronous>, transform_indices = @transform_8, window_bounds = array<i64: 1, 128>}, {pipeline_mode = #tpu.pipeline_mode<synchronous>, transform_indices = @transform_9, window_bounds = array<i64: 1, 128>}, {pipeline_mode = #tpu.pipeline_mode<synchronous>, transform_indices = @transform_10, window_bounds = array<i64: 1, 128>}, {pipeline_mode = #tpu.pipeline_mode<synchronous>, transform_indices = @transform_11, window_bounds = array<i64: 1, 128>}, {pipeline_mode = #tpu.pipeline_mode<synchronous>, transform_indices = @transform_12, window_bounds = array<i64: 1, 128>}, {pipeline_mode = #tpu.pipeline_mode<synchronous>, transform_indices = @transform_13, window_bounds = array<i64: 200, 1>}, {pipeline_mode = #tpu.pipeline_mode<synchronous>, transform_indices = @transform_14, window_bounds = array<i64: 200, 1>}, {pipeline_mode = #tpu.pipeline_mode<synchronous>, transform_indices = @transform_15, window_bounds = array<i64: 200, 128>}]} {
    %c0 = arith.constant 0 : index
    %c0_0 = arith.constant 0 : index
    %0 = vector.load %arg1[%c0, %c0_0] : memref<200x128xf32, #tpu.memory_space<vmem>>, vector<200x128xf32>
    %c0_1 = arith.constant 0 : index
    %c0_2 = arith.constant 0 : index
    %1 = vector.load %arg14[%c0_1, %c0_2] : memref<200x1xf32, #tpu.memory_space<vmem>>, vector<200x1xf32>
    %c0_3 = arith.constant 0 : index
    %c0_4 = arith.constant 0 : index
    %2 = vector.load %arg15[%c0_3, %c0_4] : memref<200x1xf32, #tpu.memory_space<vmem>>, vector<200x1xf32>
    %c0_5 = arith.constant 0 : index
    %c0_6 = arith.constant 0 : index
    %3 = vector.load %arg2[%c0_5, %c0_6] : memref<128x128xf32, #tpu.memory_space<vmem>>, vector<128x128xf32>
    %cst = arith.constant dense<0.000000e+00> : vector<200x128xf32>
    %4 = tpu.matmul %0, %3, %cst {dimension_numbers = #tpu.dot_dimension_numbers<[1], [0], [0], [1], [0, 0, 1, 1], [], []>} : vector<200x128xf32>, vector<128x128xf32>, vector<200x128xf32> -> vector<200x128xf32>
    %c0_7 = arith.constant 0 : index
    %c0_8 = arith.constant 0 : index
    %5 = vector.load %arg6[%c0_7, %c0_8] : memref<1x128xf32, #tpu.memory_space<vmem>>, vector<1x128xf32>
    %c0_9 = arith.constant 0 : index
    %c0_10 = arith.constant 0 : index
    %6 = vector.load %arg7[%c0_9, %c0_10] : memref<1x128xf32, #tpu.memory_space<vmem>>, vector<1x128xf32>
    %cst_11 = arith.constant dense<0.000000e+00> : vector<128xf32>
    %7 = vector.multi_reduction <add>, %4, %cst_11 [0] : vector<200x128xf32> to vector<128xf32>
    %8 = vector.shape_cast %7 : vector<128xf32> to vector<1x128xf32>
    %9 = arith.mulf %4, %4 : vector<200x128xf32>
    %cst_12 = arith.constant dense<0.000000e+00> : vector<128xf32>
    %10 = vector.multi_reduction <add>, %9, %cst_12 [0] : vector<200x128xf32> to vector<128xf32>
    %11 = vector.shape_cast %10 : vector<128xf32> to vector<1x128xf32>
    %cst_13 = arith.constant 1.280000e+02 : f32
    %12 = vector.broadcast %cst_13 : f32 to vector<1x128xf32>
    %13 = arith.divf %8, %12 : vector<1x128xf32>
    %cst_14 = arith.constant 1.280000e+02 : f32
    %14 = vector.broadcast %cst_14 : f32 to vector<1x128xf32>
    %15 = arith.divf %11, %14 : vector<1x128xf32>
    %16 = arith.mulf %13, %13 : vector<1x128xf32>
    %17 = arith.subf %15, %16 : vector<1x128xf32>
    %cst_15 = arith.constant 9.99999974E-6 : f32
    %18 = vector.broadcast %cst_15 : f32 to vector<1x128xf32>
    %19 = arith.addf %17, %18 : vector<1x128xf32>
    %20 = math.rsqrt %19 : vector<1x128xf32>
    %21 = arith.mulf %5, %20 : vector<1x128xf32>
    %22 = arith.mulf %13, %21 : vector<1x128xf32>
    %23 = arith.subf %6, %22 : vector<1x128xf32>
    %24 = vector.broadcast %21 : vector<1x128xf32> to vector<200x128xf32>
    %25 = arith.mulf %4, %24 : vector<200x128xf32>
    %26 = vector.broadcast %23 : vector<1x128xf32> to vector<200x128xf32>
    %27 = arith.addf %25, %26 : vector<200x128xf32>
    %cst_16 = arith.constant 0.000000e+00 : f32
    %28 = vector.broadcast %cst_16 : f32 to vector<200x128xf32>
    %29 = arith.maximumf %27, %28 : vector<200x128xf32>
    %30 = vector.broadcast %1 : vector<200x1xf32> to vector<200x128xf32>
    %31 = arith.mulf %29, %30 : vector<200x128xf32>
    %cst_17 = arith.constant 0.000000e+00 : f32
    %32 = vector.broadcast %cst_17 : f32 to vector<11x128xf32>
    %c0_18 = arith.constant 0 : index
    %c0_19 = arith.constant 0 : index
    %33 = vector.load %arg17[%c0_18, %c0_19] : memref<222x128xf32, #tpu.memory_space<vmem>>, vector<11x128xf32>
    tpu.vector_store %arg17[%c0_18, %c0_19], %32 {strides = array<i32>} : memref<222x128xf32, #tpu.memory_space<vmem>>, vector<11x128xf32>,
    %c211 = arith.constant 211 : index
    %c0_20 = arith.constant 0 : index
    %34 = vector.load %arg17[%c211, %c0_20] : memref<222x128xf32, #tpu.memory_space<vmem>>, vector<11x128xf32>
    tpu.vector_store %arg17[%c211, %c0_20], %32 {strides = array<i32>} : memref<222x128xf32, #tpu.memory_space<vmem>>, vector<11x128xf32>,
    %c11 = arith.constant 11 : index
    %c0_21 = arith.constant 0 : index
    %35 = vector.load %arg17[%c11, %c0_21] : memref<222x128xf32, #tpu.memory_space<vmem>>, vector<200x128xf32>
    tpu.vector_store %arg17[%c11, %c0_21], %31 {strides = array<i32>} : memref<222x128xf32, #tpu.memory_space<vmem>>, vector<200x128xf32>,
    %c0_22 = arith.constant 0 : index
    %c0_23 = arith.constant 0 : index
    %36 = vector.load %arg17[%c0_22, %c0_23] : memref<222x128xf32, #tpu.memory_space<vmem>>, vector<200x128xf32>
    %c0_24 = arith.constant 0 : index
    %c0_25 = arith.constant 0 : index
    %37 = vector.load %arg3[%c0_24, %c0_25] : memref<1152x128xf32, #tpu.memory_space<vmem>>, vector<128x128xf32>
    %cst_26 = arith.constant dense<0.000000e+00> : vector<200x128xf32>
    %38 = tpu.matmul %36, %37, %cst_26 {dimension_numbers = #tpu.dot_dimension_numbers<[1], [0], [0], [1], [0, 0, 1, 1], [], []>} : vector<200x128xf32>, vector<128x128xf32>, vector<200x128xf32> -> vector<200x128xf32>
    %c1 = arith.constant 1 : index
    %c0_27 = arith.constant 0 : index
    %39 = vector.load %arg17[%c1, %c0_27] : memref<222x128xf32, #tpu.memory_space<vmem>>, vector<200x128xf32>
    %c128 = arith.constant 128 : index
    %c0_28 = arith.constant 0 : index
    %40 = vector.load %arg3[%c128, %c0_28] : memref<1152x128xf32, #tpu.memory_space<vmem>>, vector<128x128xf32>
    %cst_29 = arith.constant dense<0.000000e+00> : vector<200x128xf32>
    %41 = tpu.matmul %39, %40, %cst_29 {dimension_numbers = #tpu.dot_dimension_numbers<[1], [0], [0], [1], [0, 0, 1, 1], [], []>} : vector<200x128xf32>, vector<128x128xf32>, vector<200x128xf32> -> vector<200x128xf32>
    %42 = arith.addf %38, %41 : vector<200x128xf32>
    %c2 = arith.constant 2 : index
    %c0_30 = arith.constant 0 : index
    %43 = vector.load %arg17[%c2, %c0_30] : memref<222x128xf32, #tpu.memory_space<vmem>>, vector<200x128xf32>
    %c256 = arith.constant 256 : index
    %c0_31 = arith.constant 0 : index
    %44 = vector.load %arg3[%c256, %c0_31] : memref<1152x128xf32, #tpu.memory_space<vmem>>, vector<128x128xf32>
    %cst_32 = arith.constant dense<0.000000e+00> : vector<200x128xf32>
    %45 = tpu.matmul %43, %44, %cst_32 {dimension_numbers = #tpu.dot_dimension_numbers<[1], [0], [0], [1], [0, 0, 1, 1], [], []>} : vector<200x128xf32>, vector<128x128xf32>, vector<200x128xf32> -> vector<200x128xf32>
    %46 = arith.addf %42, %45 : vector<200x128xf32>
    %c10 = arith.constant 10 : index
    %c0_33 = arith.constant 0 : index
    %47 = vector.load %arg17[%c10, %c0_33] : memref<222x128xf32, #tpu.memory_space<vmem>>, vector<200x128xf32>
    %c384 = arith.constant 384 : index
    %c0_34 = arith.constant 0 : index
    %48 = vector.load %arg3[%c384, %c0_34] : memref<1152x128xf32, #tpu.memory_space<vmem>>, vector<128x128xf32>
    %cst_35 = arith.constant dense<0.000000e+00> : vector<200x128xf32>
    %49 = tpu.matmul %47, %48, %cst_35 {dimension_numbers = #tpu.dot_dimension_numbers<[1], [0], [0], [1], [0, 0, 1, 1], [], []>} : vector<200x128xf32>, vector<128x128xf32>, vector<200x128xf32> -> vector<200x128xf32>
    %50 = arith.addf %46, %49 : vector<200x128xf32>
    %c11_36 = arith.constant 11 : index
    %c0_37 = arith.constant 0 : index
    %51 = vector.load %arg17[%c11_36, %c0_37] : memref<222x128xf32, #tpu.memory_space<vmem>>, vector<200x128xf32>
    %c512 = arith.constant 512 : index
    %c0_38 = arith.constant 0 : index
    %52 = vector.load %arg3[%c512, %c0_38] : memref<1152x128xf32, #tpu.memory_space<vmem>>, vector<128x128xf32>
    %cst_39 = arith.constant dense<0.000000e+00> : vector<200x128xf32>
    %53 = tpu.matmul %51, %52, %cst_39 {dimension_numbers = #tpu.dot_dimension_numbers<[1], [0], [0], [1], [0, 0, 1, 1], [], []>} : vector<200x128xf32>, vector<128x128xf32>, vector<200x128xf32> -> vector<200x128xf32>
    %54 = arith.addf %50, %53 : vector<200x128xf32>
    %c12 = arith.constant 12 : index
    %c0_40 = arith.constant 0 : index
    %55 = vector.load %arg17[%c12, %c0_40] : memref<222x128xf32, #tpu.memory_space<vmem>>, vector<200x128xf32>
    %c640 = arith.constant 640 : index
    %c0_41 = arith.constant 0 : index
    %56 = vector.load %arg3[%c640, %c0_41] : memref<1152x128xf32, #tpu.memory_space<vmem>>, vector<128x128xf32>
    %cst_42 = arith.constant dense<0.000000e+00> : vector<200x128xf32>
    %57 = tpu.matmul %55, %56, %cst_42 {dimension_numbers = #tpu.dot_dimension_numbers<[1], [0], [0], [1], [0, 0, 1, 1], [], []>} : vector<200x128xf32>, vector<128x128xf32>, vector<200x128xf32> -> vector<200x128xf32>
    %58 = arith.addf %54, %57 : vector<200x128xf32>
    %c20 = arith.constant 20 : index
    %c0_43 = arith.constant 0 : index
    %59 = vector.load %arg17[%c20, %c0_43] : memref<222x128xf32, #tpu.memory_space<vmem>>, vector<200x128xf32>
    %c768 = arith.constant 768 : index
    %c0_44 = arith.constant 0 : index
    %60 = vector.load %arg3[%c768, %c0_44] : memref<1152x128xf32, #tpu.memory_space<vmem>>, vector<128x128xf32>
    %cst_45 = arith.constant dense<0.000000e+00> : vector<200x128xf32>
    %61 = tpu.matmul %59, %60, %cst_45 {dimension_numbers = #tpu.dot_dimension_numbers<[1], [0], [0], [1], [0, 0, 1, 1], [], []>} : vector<200x128xf32>, vector<128x128xf32>, vector<200x128xf32> -> vector<200x128xf32>
    %62 = arith.addf %58, %61 : vector<200x128xf32>
    %c21 = arith.constant 21 : index
    %c0_46 = arith.constant 0 : index
    %63 = vector.load %arg17[%c21, %c0_46] : memref<222x128xf32, #tpu.memory_space<vmem>>, vector<200x128xf32>
    %c896 = arith.constant 896 : index
    %c0_47 = arith.constant 0 : index
    %64 = vector.load %arg3[%c896, %c0_47] : memref<1152x128xf32, #tpu.memory_space<vmem>>, vector<128x128xf32>
    %cst_48 = arith.constant dense<0.000000e+00> : vector<200x128xf32>
    %65 = tpu.matmul %63, %64, %cst_48 {dimension_numbers = #tpu.dot_dimension_numbers<[1], [0], [0], [1], [0, 0, 1, 1], [], []>} : vector<200x128xf32>, vector<128x128xf32>, vector<200x128xf32> -> vector<200x128xf32>
    %66 = arith.addf %62, %65 : vector<200x128xf32>
    %c22 = arith.constant 22 : index
    %c0_49 = arith.constant 0 : index
    %67 = vector.load %arg17[%c22, %c0_49] : memref<222x128xf32, #tpu.memory_space<vmem>>, vector<200x128xf32>
    %c1024 = arith.constant 1024 : index
    %c0_50 = arith.constant 0 : index
    %68 = vector.load %arg3[%c1024, %c0_50] : memref<1152x128xf32, #tpu.memory_space<vmem>>, vector<128x128xf32>
    %cst_51 = arith.constant dense<0.000000e+00> : vector<200x128xf32>
    %69 = tpu.matmul %67, %68, %cst_51 {dimension_numbers = #tpu.dot_dimension_numbers<[1], [0], [0], [1], [0, 0, 1, 1], [], []>} : vector<200x128xf32>, vector<128x128xf32>, vector<200x128xf32> -> vector<200x128xf32>
    %70 = arith.addf %66, %69 : vector<200x128xf32>
    %c0_52 = arith.constant 0 : index
    %c0_53 = arith.constant 0 : index
    %71 = vector.load %arg8[%c0_52, %c0_53] : memref<1x128xf32, #tpu.memory_space<vmem>>, vector<1x128xf32>
    %c0_54 = arith.constant 0 : index
    %c0_55 = arith.constant 0 : index
    %72 = vector.load %arg9[%c0_54, %c0_55] : memref<1x128xf32, #tpu.memory_space<vmem>>, vector<1x128xf32>
    %73 = vector.broadcast %2 : vector<200x1xf32> to vector<200x128xf32>
    %74 = arith.mulf %70, %73 : vector<200x128xf32>
    %cst_56 = arith.constant dense<0.000000e+00> : vector<128xf32>
    %75 = vector.multi_reduction <add>, %74, %cst_56 [0] : vector<200x128xf32> to vector<128xf32>
    %76 = vector.shape_cast %75 : vector<128xf32> to vector<1x128xf32>
    %77 = arith.mulf %70, %70 : vector<200x128xf32>
    %78 = vector.broadcast %2 : vector<200x1xf32> to vector<200x128xf32>
    %79 = arith.mulf %77, %78 : vector<200x128xf32>
    %cst_57 = arith.constant dense<0.000000e+00> : vector<128xf32>
    %80 = vector.multi_reduction <add>, %79, %cst_57 [0] : vector<200x128xf32> to vector<128xf32>
    %81 = vector.shape_cast %80 : vector<128xf32> to vector<1x128xf32>
    %cst_58 = arith.constant 3.200000e+01 : f32
    %82 = vector.broadcast %cst_58 : f32 to vector<1x128xf32>
    %83 = arith.divf %76, %82 : vector<1x128xf32>
    %cst_59 = arith.constant 3.200000e+01 : f32
    %84 = vector.broadcast %cst_59 : f32 to vector<1x128xf32>
    %85 = arith.divf %81, %84 : vector<1x128xf32>
    %86 = arith.mulf %83, %83 : vector<1x128xf32>
    %87 = arith.subf %85, %86 : vector<1x128xf32>
    %cst_60 = arith.constant 9.99999974E-6 : f32
    %88 = vector.broadcast %cst_60 : f32 to vector<1x128xf32>
    %89 = arith.addf %87, %88 : vector<1x128xf32>
    %90 = math.rsqrt %89 : vector<1x128xf32>
    %91 = arith.mulf %71, %90 : vector<1x128xf32>
    %92 = arith.mulf %83, %91 : vector<1x128xf32>
    %93 = arith.subf %72, %92 : vector<1x128xf32>
    %94 = vector.broadcast %91 : vector<1x128xf32> to vector<200x128xf32>
    %95 = arith.mulf %70, %94 : vector<200x128xf32>
    %96 = vector.broadcast %93 : vector<1x128xf32> to vector<200x128xf32>
    %97 = arith.addf %95, %96 : vector<200x128xf32>
    %cst_61 = arith.constant 0.000000e+00 : f32
    %98 = vector.broadcast %cst_61 : f32 to vector<200x128xf32>
    %99 = arith.maximumf %97, %98 : vector<200x128xf32>
    %c0_62 = arith.constant 0 : index
    %c0_63 = arith.constant 0 : index
    %100 = vector.load %arg4[%c0_62, %c0_63] : memref<128x128xf32, #tpu.memory_space<vmem>>, vector<128x128xf32>
    %cst_64 = arith.constant dense<0.000000e+00> : vector<200x128xf32>
    %101 = tpu.matmul %99, %100, %cst_64 {dimension_numbers = #tpu.dot_dimension_numbers<[1], [0], [0], [1], [0, 0, 1, 1], [], []>} : vector<200x128xf32>, vector<128x128xf32>, vector<200x128xf32> -> vector<200x128xf32>
    %c0_65 = arith.constant 0 : index
    %c0_66 = arith.constant 0 : index
    %102 = vector.load %arg10[%c0_65, %c0_66] : memref<1x128xf32, #tpu.memory_space<vmem>>, vector<1x128xf32>
    %c0_67 = arith.constant 0 : index
    %c0_68 = arith.constant 0 : index
    %103 = vector.load %arg11[%c0_67, %c0_68] : memref<1x128xf32, #tpu.memory_space<vmem>>, vector<1x128xf32>
    %104 = vector.broadcast %2 : vector<200x1xf32> to vector<200x128xf32>
    %105 = arith.mulf %101, %104 : vector<200x128xf32>
    %cst_69 = arith.constant dense<0.000000e+00> : vector<128xf32>
    %106 = vector.multi_reduction <add>, %105, %cst_69 [0] : vector<200x128xf32> to vector<128xf32>
    %107 = vector.shape_cast %106 : vector<128xf32> to vector<1x128xf32>
    %108 = arith.mulf %101, %101 : vector<200x128xf32>
    %109 = vector.broadcast %2 : vector<200x1xf32> to vector<200x128xf32>
    %110 = arith.mulf %108, %109 : vector<200x128xf32>
    %cst_70 = arith.constant dense<0.000000e+00> : vector<128xf32>
    %111 = vector.multi_reduction <add>, %110, %cst_70 [0] : vector<200x128xf32> to vector<128xf32>
    %112 = vector.shape_cast %111 : vector<128xf32> to vector<1x128xf32>
    %cst_71 = arith.constant 3.200000e+01 : f32
    %113 = vector.broadcast %cst_71 : f32 to vector<1x128xf32>
    %114 = arith.divf %107, %113 : vector<1x128xf32>
    %cst_72 = arith.constant 3.200000e+01 : f32
    %115 = vector.broadcast %cst_72 : f32 to vector<1x128xf32>
    %116 = arith.divf %112, %115 : vector<1x128xf32>
    %117 = arith.mulf %114, %114 : vector<1x128xf32>
    %118 = arith.subf %116, %117 : vector<1x128xf32>
    %cst_73 = arith.constant 9.99999974E-6 : f32
    %119 = vector.broadcast %cst_73 : f32 to vector<1x128xf32>
    %120 = arith.addf %118, %119 : vector<1x128xf32>
    %121 = math.rsqrt %120 : vector<1x128xf32>
    %122 = arith.mulf %102, %121 : vector<1x128xf32>
    %123 = arith.mulf %114, %122 : vector<1x128xf32>
    %124 = arith.subf %103, %123 : vector<1x128xf32>
    %125 = vector.broadcast %122 : vector<1x128xf32> to vector<200x128xf32>
    %126 = arith.mulf %101, %125 : vector<200x128xf32>
    %127 = vector.broadcast %124 : vector<1x128xf32> to vector<200x128xf32>
    %128 = arith.addf %126, %127 : vector<200x128xf32>
    %c0_74 = arith.constant 0 : index
    %c0_75 = arith.constant 0 : index
    %129 = vector.load %arg5[%c0_74, %c0_75] : memref<128x128xf32, #tpu.memory_space<vmem>>, vector<128x128xf32>
    %cst_76 = arith.constant dense<0.000000e+00> : vector<200x128xf32>
    %130 = tpu.matmul %0, %129, %cst_76 {dimension_numbers = #tpu.dot_dimension_numbers<[1], [0], [0], [1], [0, 0, 1, 1], [], []>} : vector<200x128xf32>, vector<128x128xf32>, vector<200x128xf32> -> vector<200x128xf32>
    %c0_77 = arith.constant 0 : index
    %c0_78 = arith.constant 0 : index
    %131 = vector.load %arg12[%c0_77, %c0_78] : memref<1x128xf32, #tpu.memory_space<vmem>>, vector<1x128xf32>
    %c0_79 = arith.constant 0 : index
    %c0_80 = arith.constant 0 : index
    %132 = vector.load %arg13[%c0_79, %c0_80] : memref<1x128xf32, #tpu.memory_space<vmem>>, vector<1x128xf32>
    %133 = vector.broadcast %2 : vector<200x1xf32> to vector<200x128xf32>
    %134 = arith.mulf %130, %133 : vector<200x128xf32>
    %cst_81 = arith.constant dense<0.000000e+00> : vector<128xf32>
    %135 = vector.multi_reduction <add>, %134, %cst_81 [0] : vector<200x128xf32> to vector<128xf32>
    %136 = vector.shape_cast %135 : vector<128xf32> to vector<1x128xf32>
    %137 = arith.mulf %130, %130 : vector<200x128xf32>
    %138 = vector.broadcast %2 : vector<200x1xf32> to vector<200x128xf32>
    %139 = arith.mulf %137, %138 : vector<200x128xf32>
    %cst_82 = arith.constant dense<0.000000e+00> : vector<128xf32>
    %140 = vector.multi_reduction <add>, %139, %cst_82 [0] : vector<200x128xf32> to vector<128xf32>
    %141 = vector.shape_cast %140 : vector<128xf32> to vector<1x128xf32>
    %cst_83 = arith.constant 3.200000e+01 : f32
    %142 = vector.broadcast %cst_83 : f32 to vector<1x128xf32>
    %143 = arith.divf %136, %142 : vector<1x128xf32>
    %cst_84 = arith.constant 3.200000e+01 : f32
    %144 = vector.broadcast %cst_84 : f32 to vector<1x128xf32>
    %145 = arith.divf %141, %144 : vector<1x128xf32>
    %146 = arith.mulf %143, %143 : vector<1x128xf32>
    %147 = arith.subf %145, %146 : vector<1x128xf32>
    %cst_85 = arith.constant 9.99999974E-6 : f32
    %148 = vector.broadcast %cst_85 : f32 to vector<1x128xf32>
    %149 = arith.addf %147, %148 : vector<1x128xf32>
    %150 = math.rsqrt %149 : vector<1x128xf32>
    %151 = arith.mulf %131, %150 : vector<1x128xf32>
    %152 = arith.mulf %143, %151 : vector<1x128xf32>
    %153 = arith.subf %132, %152 : vector<1x128xf32>
    %154 = vector.broadcast %151 : vector<1x128xf32> to vector<200x128xf32>
    %155 = arith.mulf %130, %154 : vector<200x128xf32>
    %156 = vector.broadcast %153 : vector<1x128xf32> to vector<200x128xf32>
    %157 = arith.addf %155, %156 : vector<200x128xf32>
    %158 = arith.addf %128, %157 : vector<200x128xf32>
    %cst_86 = arith.constant 0.000000e+00 : f32
    %159 = vector.broadcast %cst_86 : f32 to vector<200x128xf32>
    %160 = arith.maximumf %158, %159 : vector<200x128xf32>
    %c0_87 = arith.constant 0 : index
    %c0_88 = arith.constant 0 : index
    %161 = vector.load %arg16[%c0_87, %c0_88] : memref<200x128xf32, #tpu.memory_space<vmem>>, vector<200x128xf32>
    tpu.vector_store %arg16[%c0_87, %c0_88], %160 {strides = array<i32>} : memref<200x128xf32, #tpu.memory_space<vmem>>, vector<200x128xf32>,
    return
  }
  func.func @transform_0(%arg0: i32) -> (i32, i32) {
    %c0_i32 = arith.constant 0 : i32
    %c0_i32_0 = arith.constant 0 : i32
    %c0_i32_1 = arith.constant 0 : i32
    return %c0_i32, %c0_i32_0 : i32, i32
  }
  func.func @transform_1(%arg0: i32) -> (i32, i32) {
    %c0_i32 = arith.constant 0 : i32
    %c0_i32_0 = arith.constant 0 : i32
    %c0_i32_1 = arith.constant 0 : i32
    return %c0_i32, %c0_i32_0 : i32, i32
  }
  func.func @transform_2(%arg0: i32) -> (i32, i32) {
    %c0_i32 = arith.constant 0 : i32
    %c0_i32_0 = arith.constant 0 : i32
    %c0_i32_1 = arith.constant 0 : i32
    return %c0_i32, %c0_i32_0 : i32, i32
  }
  func.func @transform_3(%arg0: i32) -> (i32, i32) {
    %c0_i32 = arith.constant 0 : i32
    %c0_i32_0 = arith.constant 0 : i32
    %c0_i32_1 = arith.constant 0 : i32
    return %c0_i32, %c0_i32_0 : i32, i32
  }
  func.func @transform_4(%arg0: i32) -> (i32, i32) {
    %c0_i32 = arith.constant 0 : i32
    %c0_i32_0 = arith.constant 0 : i32
    %c0_i32_1 = arith.constant 0 : i32
    return %c0_i32, %c0_i32_0 : i32, i32
  }
  func.func @transform_5(%arg0: i32) -> (i32, i32) {
    %c0_i32 = arith.constant 0 : i32
    %c0_i32_0 = arith.constant 0 : i32
    %c0_i32_1 = arith.constant 0 : i32
    return %c0_i32, %c0_i32_0 : i32, i32
  }
  func.func @transform_6(%arg0: i32) -> (i32, i32) {
    %c0_i32 = arith.constant 0 : i32
    %c0_i32_0 = arith.constant 0 : i32
    %c0_i32_1 = arith.constant 0 : i32
    return %c0_i32, %c0_i32_0 : i32, i32
  }
  func.func @transform_7(%arg0: i32) -> (i32, i32) {
    %c0_i32 = arith.constant 0 : i32
    %c0_i32_0 = arith.constant 0 : i32
    %c0_i32_1 = arith.constant 0 : i32
    return %c0_i32, %c0_i32_0 : i32, i32
  }
  func.func @transform_8(%arg0: i32) -> (i32, i32) {
    %c0_i32 = arith.constant 0 : i32
    %c0_i32_0 = arith.constant 0 : i32
    %c0_i32_1 = arith.constant 0 : i32
    return %c0_i32, %c0_i32_0 : i32, i32
  }
  func.func @transform_9(%arg0: i32) -> (i32, i32) {
    %c0_i32 = arith.constant 0 : i32
    %c0_i32_0 = arith.constant 0 : i32
    %c0_i32_1 = arith.constant 0 : i32
    return %c0_i32, %c0_i32_0 : i32, i32
  }
  func.func @transform_10(%arg0: i32) -> (i32, i32) {
    %c0_i32 = arith.constant 0 : i32
    %c0_i32_0 = arith.constant 0 : i32
    %c0_i32_1 = arith.constant 0 : i32
    return %c0_i32, %c0_i32_0 : i32, i32
  }
  func.func @transform_11(%arg0: i32) -> (i32, i32) {
    %c0_i32 = arith.constant 0 : i32
    %c0_i32_0 = arith.constant 0 : i32
    %c0_i32_1 = arith.constant 0 : i32
    return %c0_i32, %c0_i32_0 : i32, i32
  }
  func.func @transform_12(%arg0: i32) -> (i32, i32) {
    %c0_i32 = arith.constant 0 : i32
    %c0_i32_0 = arith.constant 0 : i32
    %c0_i32_1 = arith.constant 0 : i32
    return %c0_i32, %c0_i32_0 : i32, i32
  }
  func.func @transform_13(%arg0: i32) -> (i32, i32) {
    %c0_i32 = arith.constant 0 : i32
    %c0_i32_0 = arith.constant 0 : i32
    %c0_i32_1 = arith.constant 0 : i32
    return %c0_i32, %c0_i32_0 : i32, i32
  }
  func.func @transform_14(%arg0: i32) -> (i32, i32) {
    %c0_i32 = arith.constant 0 : i32
    %c0_i32_0 = arith.constant 0 : i32
    %c0_i32_1 = arith.constant 0 : i32
    return %c0_i32, %c0_i32_0 : i32, i32
  }
  func.func @transform_15(%arg0: i32) -> (i32, i32) {
    %c0_i32 = arith.constant 0 : i32
    %c0_i32_0 = arith.constant 0 : i32
    %c0_i32_1 = arith.constant 0 : i32
    return %c0_i32, %c0_i32_0 : i32, i32
  }
}

</mosaic_0001>

<bundles_post_ra>
// kernel: bottleneck_forward.1
= control target key start
LH: loop header
LB: loop body
LE: loop exit
PB: predicated region body
PF: predicated region fallthrough
CT: control target
= control target key end

     0   :  { %v3115_v29 = vmov 0   ;;  %s5640_s1 = inlined_call_operand.vmem [shape: f32[128,128], index: 1, kind: input, shape index: {}]   ;;  %s5641_s0 = inlined_call_operand.vmem [shape: f32[200,128], index: 0, kind: input, shape index: {}]   ;;  %s5642_s13 = inlined_call_operand.vmem [shape: f32[200,1], index: 13, kind: input, shape index: {}]   ;;  %s5643_s14 = inlined_call_operand.vmem [shape: f32[200,1], index: 14, kind: input, shape index: {}]   ;;  %s5644_s2 = inlined_call_operand.vmem [shape: f32[1152,128], index: 2, kind: input, shape index: {}]   ;;  %s5645_s5 = inlined_call_operand.vmem [shape: f32[1,128], index: 5, kind: input, shape index: {}]   ;;  %s5646_s6 = inlined_call_operand.vmem [shape: f32[1,128], index: 6, kind: input, shape index: {}]   ;;  %s5647_s4 = inlined_call_operand.vmem [shape: f32[128,128], index: 4, kind: input, shape index: {}]   ;;  %s5648_s3 = inlined_call_operand.vmem [shape: f32[128,128], index: 3, kind: input, shape index: {}]   ;;  %s5649_s7 = inlined_call_operand.vmem [shape: f32[1,128], index: 7, kind: input, shape index: {}]   ;;  %s5650_s8 = inlined_call_operand.vmem [shape: f32[1,128], index: 8, kind: input, shape index: {}]   ;;  %s5651_s11 = inlined_call_operand.vmem [shape: f32[1,128], index: 11, kind: input, shape index: {}]   ;;  %s5652_s12 = inlined_call_operand.vmem [shape: f32[1,128], index: 12, kind: input, shape index: {}]   ;;  %s5653_s9 = inlined_call_operand.vmem [shape: f32[1,128], index: 9, kind: input, shape index: {}]   ;;  %s5654_s10 = inlined_call_operand.vmem [shape: f32[1,128], index: 10, kind: input, shape index: {}]   ;;  %s5655_s15 = inlined_call_operand.vmem [shape: f32[200,128], index: 15, kind: output, shape index: {}]  }
   0x1   :  { %v140_v0 = vld [vmem:[%s5640_s1 + $0x78] sm:$0xff]  ;;  %v139_v1 = vld [vmem:[%s5640_s1 + $0x70] sm:$0xff]  ;;  %v138_v2 = vld [vmem:[%s5640_s1 + $0x68] sm:$0xff]  ;;  %3066 = vset.pattern.permute.xlu0 %v3115_v29  ;;  %3067 = vset.pattern.permute.xlu1 %v3115_v29 }
   0x2   :  { %141 = vmatpush.msra.mxu0 %v140_v0  ;;  %v137_v3 = vld [vmem:[%s5640_s1 + $0x60] sm:$0xff]  ;;  %v136_v4 = vld [vmem:[%s5640_s1 + $0x58] sm:$0xff]  ;;  %v135_v5 = vld [vmem:[%s5640_s1 + $0x50] sm:$0xff]  ;;  %3068 = vset.pattern.permute.xlu2 %v3115_v29 }
   0x3   :  { %v134_v6 = vld [vmem:[%s5640_s1 + $0x48] sm:$0xff]  ;;  %v133_v7 = vld [vmem:[%s5640_s1 + $0x40] sm:$0xff]  ;;  %v132_v8 = vld [vmem:[%s5640_s1 + $0x38] sm:$0xff] }
   0x4   :  { %142 = vmatpush.msra.mxu0 %v139_v1  ;;  %v131_v9 = vld [vmem:[%s5640_s1 + $0x30] sm:$0xff]  ;;  %v130_v10 = vld [vmem:[%s5640_s1 + $0x28] sm:$0xff]  ;;  %v129_v11 = vld [vmem:[%s5640_s1 + $0x20] sm:$0xff] }
   0x5   :  { %v128_v12 = vld [vmem:[%s5640_s1 + $0x18] sm:$0xff]  ;;  %v127_v13 = vld [vmem:[%s5640_s1 + $0x10] sm:$0xff]  ;;  %v126_v14 = vld [vmem:[%s5640_s1 + $0x8] sm:$0xff] }
   0x6   :  { %143 = vmatpush.msra.mxu0 %v138_v2  ;;  %v125_v15 = vld [vmem:[%s5640_s1] sm:$0xff]  ;;  %v51_v17 = vld [vmem:[%s5641_s0 + $0x8] sm:$0xff]  ;;  %v52_v18 = vld [vmem:[%s5641_s0 + $0x10] sm:$0xff] }
   0x7   :  { %v50_v16 = vld [vmem:[%s5641_s0] sm:$0xff]  ;;  %v53_v19 = vld [vmem:[%s5641_s0 + $0x18] sm:$0xff]  ;;  %v55_v21 = vld [vmem:[%s5641_s0 + $0x28] sm:$0xff] }
   0x8   :  { %144 = vmatpush.msra.mxu0 %v137_v3  ;;  %v54_v20 = vld [vmem:[%s5641_s0 + $0x20] sm:$0xff]  ;;  %v56_v22 = vld [vmem:[%s5641_s0 + $0x30] sm:$0xff]  ;;  %v57_v23 = vld [vmem:[%s5641_s0 + $0x38] sm:$0xff] }
   0x9   :  { %v58_v24 = vld [vmem:[%s5641_s0 + $0x40] sm:$0xff]  ;;  %v59_v25 = vld [vmem:[%s5641_s0 + $0x48] sm:$0xff]  ;;  %v60_v26 = vld [vmem:[%s5641_s0 + $0x50] sm:$0xff] }
   0xa   :  { %145 = vmatpush.msra.mxu0 %v136_v4  ;;  %v61_v27 = vld [vmem:[%s5641_s0 + $0x58] sm:$0xff]  ;;  %v62_v28 = vld [vmem:[%s5641_s0 + $0x60] sm:$0xff]  ;;  %v63_v31 = vld [vmem:[%s5641_s0 + $0x68] sm:$0xff] }
   0xb   :  { %v75_v30 = vld [vmem:[%s5642_s13] sm:$0xff]  ;;  %v76_v32 = vld [vmem:[%s5642_s13 + $0x8] sm:$0xff]  ;;  %v64_v33 = vld [vmem:[%s5641_s0 + $0x70] sm:$0xff] }
   0xc   :  { %146 = vmatpush.msra.mxu0 %v135_v5  ;;  %428 = vperm.xlu0 %3066, %v75_v30   ;;  %v77_v34 = vld [vmem:[%s5642_s13 + $0x10] sm:$0xff]  ;;  %v65_v36 = vld [vmem:[%s5641_s0 + $0x78] sm:$0xff]  ;;  %v84_v38 = vld [vmem:[%s5642_s13 + $0x48] sm:$0xff] }
   0xd   :  { %v81_v35 = vld [vmem:[%s5642_s13 + $0x30] sm:$0xff]  ;;  %438 = vperm.xlu1 %3067, %v77_v34   ;;  %v78_v37 = vld [vmem:[%s5642_s13 + $0x18] sm:$0xff]  ;;  %v66_v40 = vld [vmem:[%s5641_s0 + $0x80] sm:$0xff] }
   0xe   :  { %147 = vmatpush.msra.mxu0 %v134_v6  ;;  %v82_v41 = vld [vmem:[%s5642_s13 + $0x38] sm:$0xff]  ;;  %v87_v42 = vld [vmem:[%s5642_s13 + $0x60] sm:$0xff]  ;;  %v67_v44 = vld [vmem:[%s5641_s0 + $0x88] sm:$0xff] }
   0xf   :  { %v85_v45 = vld [vmem:[%s5642_s13 + $0x50] sm:$0xff]  ;;  %v90_v46 = vld [vmem:[%s5642_s13 + $0x78] sm:$0xff]  ;;  %v88_v49 = vld [vmem:[%s5642_s13 + $0x68] sm:$0xff] }
  0x10   :  { %148 = vmatpush.msra.mxu0 %v133_v7  ;;  %v68_v48 = vld [vmem:[%s5641_s0 + $0x90] sm:$0xff]  ;;  %v69_v52 = vld [vmem:[%s5641_s0 + $0x98] sm:$0xff]  ;;  %v91_v53 = vld [vmem:[%s5642_s13 + $0x80] sm:$0xff] }
  0x11   :  { %v93_v50 = vld [vmem:[%s5642_s13 + $0x90] sm:$0xff]  ;;  %v96_v54 = vld [vmem:[%s5642_s13 + $0xa8] sm:$0xff]  ;;  %v70_v56 = vld [vmem:[%s5641_s0 + $0xa0] sm:$0xff] }
  0x12   :  { %149 = vmatpush.msra.mxu0 %v132_v8  ;;  %v79_v57 = vld [vmem:[%s5642_s13 + $0x20] sm:$0xff]  ;;  %v94_v58 = vld [vmem:[%s5642_s13 + $0x98] sm:$0xff]  ;;  %v71_v61 = vld [vmem:[%s5641_s0 + $0xa8] sm:$0xff] }
  0x13   :  { %v99_v59 = vld [vmem:[%s5642_s13 + $0xc0] sm:$0xff]  ;;  %448 = vperm.xlu2 %3068, %v79_v57   ;;  %v80_v62 = vld [vmem:[%s5642_s13 + $0x28] sm:$0xff]  ;;  %v97_v63 = vld [vmem:[%s5642_s13 + $0xb0] sm:$0xff] }
  0x14   :  { %150 = vmatpush.msra.mxu0 %v131_v9  ;;  %433 = vperm.xlu0 %3066, %v76_v32   ;;  %v102_v0 = vld [vmem:[%s5643_s14 + $0x10] sm:$0xff]  ;;  %v83_v3 = vld [vmem:[%s5642_s13 + $0x40] sm:$0xff]  ;;  %v105_v5 = vld [vmem:[%s5643_s14 + $0x28] sm:$0xff] }
  0x15   :  { %443 = vperm.xlu1 %3067, %v78_v37   ;;  %v72_v2 = vld [vmem:[%s5641_s0 + $0xb0] sm:$0xff]  ;;  %v100_v4 = vld [vmem:[%s5643_s14] sm:$0xff]  ;;  %v73_v7 = vld [vmem:[%s5641_s0 + $0xb8] sm:$0xff] }
  0x16   :  { %151 = vmatpush.msra.mxu0 %v130_v10  ;;  %v86_v8 = vld [vmem:[%s5642_s13 + $0x58] sm:$0xff]  ;;  %v108_v10 = vld [vmem:[%s5643_s14 + $0x40] sm:$0xff]  ;;  %v101_v29 = vld [vmem:[%s5643_s14 + $0x8] sm:$0xff] }
  0x17   :  { %v103_v9 = vld [vmem:[%s5643_s14 + $0x18] sm:$0xff]  ;;  %v118_v30 = vld [vmem:[%s5643_s14 + $0x90] sm:$0xff]  ;;  %v121_v34 = vld [vmem:[%s5643_s14 + $0xa8] sm:$0xff] }
  0x18   :  { %152 = vmatpush.msra.mxu0 %v129_v11  ;;  %v124_v37 = vld [vmem:[%s5643_s14 + $0xc0] sm:$0xff] }
  0x1a   :  { %153 = vmatpush.msra.mxu0 %v128_v12  ;;  %v74_v12 = vld [vmem:[%s5641_s0 + $0xc0] sm:$0xff] }
  0x1b   :  { %453 = vperm.xlu2 %3068, %v80_v62  }
  0x1c   :  { %154 = vmatpush.msra.mxu0 %v127_v13  ;;  %458 = vperm.xlu0 %3066, %v81_v35   ;;  %v89_v13 = vld [vmem:[%s5642_s13 + $0x70] sm:$0xff] }
  0x1d   :  { %463 = vperm.xlu1 %3067, %v82_v41  }
  0x1e   :  { %155 = vmatpush.msra.mxu0 %v126_v14  ;;  %v106_v14 = vld [vmem:[%s5643_s14 + $0x30] sm:$0xff] }
  0x20   :  { %156 = vmatpush.msra.mxu0 %v125_v15  ;;  %v111_v15 = vld [vmem:[%s5643_s14 + $0x58] sm:$0xff] }
  0x21   :  { %157 = vmatmul.f32.vlgmr.msra.gmra.mxu0 %v50_v16 }
  0x23   :  { %468 = vperm.xlu2 %3068, %v83_v3   ;;  %v122_v3 = vld [vmem:[%s5643_s14 + $0xb0] sm:$0xff] }
  0x24   :  { %473 = vperm.xlu0 %3066, %v84_v38  }
  0x25   :  { %478 = vperm.xlu1 %3067, %v85_v45   ;;  %v116_v45 = vld [vmem:[%s5643_s14 + $0x80] sm:$0xff] }
  0x29   :  { %160 = vmatmul.f32.gmra.mxu0 %v51_v17  ;;  %v92_v17 = vld [vmem:[%s5642_s13 + $0x88] sm:$0xff] }
  0x2b   :  { %483 = vperm.xlu2 %3068, %v86_v8  }
  0x2c   :  { %488 = vperm.xlu0 %3066, %v87_v42   ;;  %v113_v42 = vld [vmem:[%s5643_s14 + $0x68] sm:$0xff] }
  0x2d   :  { %493 = vperm.xlu1 %3067, %v88_v49   ;;  %v119_v49 = vld [vmem:[%s5643_s14 + $0x98] sm:$0xff] }
  0x31   :  { %163 = vmatmul.f32.gmra.mxu0 %v52_v18  ;;  %v109_v18 = vld [vmem:[%s5643_s14 + $0x48] sm:$0xff] }
  0x33   :  { %498 = vperm.xlu2 %3068, %v89_v13  }
  0x34   :  { %503 = vperm.xlu0 %3066, %v90_v46  }
  0x35   :  { %508 = vperm.xlu1 %3067, %v91_v53  }
  0x39   :  { %166 = vmatmul.f32.gmra.mxu0 %v53_v19  ;;  %v114_v19 = vld [vmem:[%s5643_s14 + $0x70] sm:$0xff] }
  0x3b   :  { %513 = vperm.xlu2 %3068, %v92_v17  }
  0x3c   :  { %518 = vperm.xlu0 %3066, %v93_v50  }
  0x3d   :  { %523 = vperm.xlu1 %3067, %v94_v58  }
  0x41   :  { %169 = vmatmul.f32.gmra.mxu0 %v54_v20 }
  0x44   :  { %533 = vperm.xlu0 %3066, %v96_v54  }
  0x45   :  { %538 = vperm.xlu1 %3067, %v97_v63  }
  0x49   :  { %172 = vmatmul.f32.gmra.mxu0 %v55_v21  ;;  %v95_v21 = vld [vmem:[%s5642_s13 + $0xa0] sm:$0xff] }
  0x4a   :  { %528 = vperm.xlu2 %3068, %v95_v21  }
  0x4c   :  { %548 = vperm.xlu0 %3066, %v99_v59  }
  0x4d   :  { %1981 = vperm.xlu1 %3067, %v100_v4  }
  0x51   :  { %175 = vmatmul.f32.gmra.mxu0 %v56_v22  ;;  %v112_v22 = vld [vmem:[%s5643_s14 + $0x60] sm:$0xff] }
  0x54   :  { %1991 = vperm.xlu0 %3066, %v102_v0  }
  0x55   :  { %1996 = vperm.xlu1 %3067, %v103_v9  }
  0x59   :  { %178 = vmatmul.f32.gmra.mxu0 %v57_v23  ;;  %v117_v23 = vld [vmem:[%s5643_s14 + $0x88] sm:$0xff] }
  0x5c   :  { %2006 = vperm.xlu0 %3066, %v105_v5  }
  0x5d   :  { %2011 = vperm.xlu1 %3067, %v106_v14  }
  0x61   :  { %181 = vmatmul.f32.gmra.mxu0 %v58_v24 }
  0x64   :  { %2021 = vperm.xlu0 %3066, %v108_v10  }
  0x65   :  { %2026 = vperm.xlu1 %3067, %v109_v18  }
  0x69   :  { %184 = vmatmul.f32.gmra.mxu0 %v59_v25  ;;  %v98_v25 = vld [vmem:[%s5642_s13 + $0xb8] sm:$0xff] }
  0x6a   :  { %543 = vperm.xlu2 %3068, %v98_v25  }
  0x6c   :  { %2036 = vperm.xlu0 %3066, %v111_v15  }
  0x6d   :  { %2041 = vperm.xlu1 %3067, %v112_v22  }
  0x71   :  { %187 = vmatmul.f32.gmra.mxu0 %v60_v26  ;;  %v115_v26 = vld [vmem:[%s5643_s14 + $0x78] sm:$0xff] }
  0x72   :  { %1986 = vperm.xlu2 %3068, %v101_v29  }
  0x74   :  { %2051 = vperm.xlu0 %3066, %v114_v19  }
  0x75   :  { %2056 = vperm.xlu1 %3067, %v115_v26  }
  0x79   :  { %190 = vmatmul.f32.gmra.mxu0 %v61_v27  ;;  %v120_v27 = vld [vmem:[%s5643_s14 + $0xa0] sm:$0xff] }
  0x7c   :  { %2066 = vperm.xlu0 %3066, %v117_v23  }
  0x7d   :  { %2071 = vperm.xlu1 %3067, %v118_v30  }
  0x7e   :  { %v3546_v25 = vpop.permute.xlu0 %428 }
  0x81   :  { %193 = vmatmul.f32.gmra.mxu0 %v62_v28 }
  0x84   :  { %2081 = vperm.xlu0 %3066, %v120_v27  }
  0x85   :  { %2086 = vperm.xlu1 %3067, %v121_v34  }
  0x89   :  { %196 = vmatmul.f32.gmra.mxu0 %v63_v31  ;;  %v123_v31 = vld [vmem:[%s5643_s14 + $0xb8] sm:$0xff] }
  0x8c   :  { %2096 = vperm.xlu0 %3066, %v123_v31  }
  0x8d   :  { %2101 = vperm.xlu1 %3067, %v124_v37  }
  0x91   :  { %199 = vmatmul.f32.gmra.mxu0 %v64_v33  ;;  %v104_v33 = vld [vmem:[%s5643_s14 + $0x20] sm:$0xff] }
  0x92   :  { %2001 = vperm.xlu2 %3068, %v104_v33  }
  0x99   :  { %202 = vmatmul.f32.gmra.mxu0 %v65_v36  ;;  %v107_v36 = vld [vmem:[%s5643_s14 + $0x38] sm:$0xff] }
  0x9a   :  { %2016 = vperm.xlu2 %3068, %v107_v36  }
  0x9e   :  { %v3313_v39 = vpop.f32.mrf.mxu0 }
  0x9f   :  { %v265_v50 = vmul.f32 %v3313_v39, %v3313_v39 }
  0xa1   :  { %205 = vmatmul.f32.gmra.mxu0 %v66_v40  ;;  %v110_v40 = vld [vmem:[%s5643_s14 + $0x50] sm:$0xff] }
  0xa2   :  { %2031 = vperm.xlu2 %3068, %v110_v40  }
  0xa6   :  { %v3324_v43 = vpop.f32.mrf.mxu0 }
  0xa9   :  { %208 = vmatmul.f32.gmra.mxu0 %v67_v44 }
  0xaa   :  { %2046 = vperm.xlu2 %3068, %v113_v42  }
  0xae   :  { %v3335_v47 = vpop.f32.mrf.mxu0 }
  0xaf   :  { %v267_v53 = vmul.f32 %v3335_v47, %v3335_v47 }
  0xb1   :  { %211 = vmatmul.f32.gmra.mxu0 %v68_v48  ;;  %v266_v48 = vmul.f32 %v3324_v43, %v3324_v43 }
  0xb2   :  { %2061 = vperm.xlu2 %3068, %v116_v45  }
  0xb3   :  { %v290_v54 = vadd.f32 %v266_v48, %v265_v50 }
  0xb5   :  { %v291_v58 = vadd.f32 %v290_v54, %v267_v53  ;;  %v3565_v53 = vpop.permute.xlu0 %433  ;;  %v3567_v54 = vpop.permute.xlu2 %448 }
  0xb6   :  { %v3346_v51 = vpop.f32.mrf.mxu0 }
  0xb7   :  { %v268_v57 = vmul.f32 %v3346_v51, %v3346_v51 }
  0xb9   :  { %214 = vmatmul.f32.gmra.mxu0 %v69_v52  ;;  %v235_v52 = vadd.f32 %v3324_v43, %v3313_v39  ;;  %v292_v63 = vadd.f32 %v291_v58, %v268_v57 }
  0xba   :  { %2076 = vperm.xlu2 %3068, %v119_v49  }
  0xbe   :  { %v3357_v55 = vpop.f32.mrf.mxu0 }
  0xc1   :  { %217 = vmatmul.f32.gmra.mxu0 %v70_v56  ;;  %v236_v56 = vadd.f32 %v235_v52, %v3335_v47 }
  0xc2   :  { %2091 = vperm.xlu2 %3068, %v122_v3  }
  0xc3   :  { %v237_v59 = vadd.f32 %v236_v56, %v3346_v51 }
  0xc5   :  { %v238_v0 = vadd.f32 %v237_v59, %v3357_v55 }
  0xc6   :  { %v3371_v60 = vpop.f32.mrf.mxu0 }
  0xc7   :  { %v239_v5 = vadd.f32 %v238_v0, %v3371_v60 }
  0xc9   :  { %220 = vmatmul.f32.gmra.mxu0 %v71_v61  ;;  %v269_v61 = vmul.f32 %v3357_v55, %v3357_v55 }
  0xcb   :  { %v293_v4 = vadd.f32 %v292_v63, %v269_v61 }
  0xce   :  { %v3385_v1 = vpop.f32.mrf.mxu0 }
  0xcf   :  { %v240_v9 = vadd.f32 %v239_v5, %v3385_v1  ;;  %v3116_v5 = vmov 128.0  }
  0xd0   :  { %3069 = vrcp.f32 %v3116_v5 }
  0xd1   :  { %223 = vmatmul.f32.gmra.mxu0 %v72_v2  ;;  %v270_v2 = vmul.f32 %v3371_v60, %v3371_v60 }
  0xd3   :  { %v294_v8 = vadd.f32 %v293_v4, %v270_v2 }
  0xd6   :  { %v3399_v6 = vpop.f32.mrf.mxu0 }
  0xd7   :  { %v272_v10 = vmul.f32 %v3399_v6, %v3399_v6  ;;  %v241_v13 = vadd.f32 %v240_v9, %v3399_v6 }
  0xd9   :  { %226 = vmatmul.f32.gmra.mxu0 %v73_v7  ;;  %v271_v7 = vmul.f32 %v3385_v1, %v3385_v1 }
  0xde   :  { %v3413_v11 = vpop.f32.mrf.mxu0 }
  0xdf   :  { %v273_v14 = vmul.f32 %v3413_v11, %v3413_v11  ;;  %v242_v18 = vadd.f32 %v241_v13, %v3413_v11  ;;  %v911_v13 = vld [vmem:[%s5644_s2 + $0x178] sm:$0xff] }
  0xe0   :  { %912 = vmatpush.msra.mxu3 %v911_v13 }
  0xe1   :  { %229 = vmatmul.f32.gmra.mxu0 %v74_v12  ;;  %v295_v12 = vadd.f32 %v294_v8, %v271_v7  ;;  %v645_v7 = vld [vmem:[%s5644_s2 + $0x78] sm:$0xff] }
  0xe2   :  { %779 = vmatpush.msra.mxu2 %v645_v7  ;;  %v683_v7 = vld [vmem:[%s5644_s2 + $0xe0] sm:$0xff] }
  0xe3   :  { %v296_v17 = vadd.f32 %v295_v12, %v272_v10  ;;  %v644_v12 = vld [vmem:[%s5644_s2 + $0x70] sm:$0xff] }
  0xe4   :  { %780 = vmatpush.msra.mxu2 %v644_v12 }
  0xe5   :  { %v297_v21 = vadd.f32 %v296_v17, %v273_v14  ;;  %v3592_v14 = vpop.permute.xlu0 %458 }
  0xe6   :  { %v3427_v16 = vpop.f32.mrf.mxu0 }
  0xe7   :  { %v274_v19 = vmul.f32 %v3427_v16, %v3427_v16  ;;  %v243_v22 = vadd.f32 %v242_v18, %v3427_v16 }
  0xe9   :  { %v298_v26 = vadd.f32 %v297_v21, %v274_v19  ;;  %v3597_v21 = vpop.permute.xlu2 %453 }
  0xee   :  { %v3438_v20 = vpop.f32.mrf.mxu0 }
  0xef   :  { %v275_v23 = vmul.f32 %v3438_v20, %v3438_v20  ;;  %v244_v27 = vadd.f32 %v243_v22, %v3438_v20 }
  0xf1   :  { %v299_v30 = vadd.f32 %v298_v26, %v275_v23  ;;  %v643_v23 = vld [vmem:[%s5644_s2 + $0x68] sm:$0xff]  ;;  %v910_v26 = vld [vmem:[%s5644_s2 + $0x170] sm:$0xff] }
  0xf2   :  { %781 = vmatpush.msra.mxu2 %v643_v23  ;;  %913 = vmatpush.msra.mxu3 %v910_v26  ;;  %v638_v23 = vld [vmem:[%s5644_s2 + $0x40] sm:$0xff]  ;;  %v905_v26 = vld [vmem:[%s5644_s2 + $0x148] sm:$0xff] }
  0xf6   :  { %v3449_v24 = vpop.f32.mrf.mxu0 }
  0xf7   :  { %v276_v29 = vmul.f32 %v3449_v24, %v3449_v24  ;;  %v245_v31 = vadd.f32 %v244_v27, %v3449_v24  ;;  %v3607_v27 = vpop.eup %3069 }
  0xf8   :  { %vm325_vm0 = vweird.f32 %v3607_v27 }
  0xf9   :  { %v300_v36 = vadd.f32 %v299_v30, %v276_v29 }
  0xfe   :  { %v3460_v28 = vpop.f32.mrf.mxu0 }
  0xff   :  { %v277_v33 = vmul.f32 %v3460_v28, %v3460_v28  ;;  %v246_v37 = vadd.f32 %v245_v31, %v3460_v28 }
 0x101   :  { %v301_v42 = vadd.f32 %v300_v36, %v277_v33  ;;  %v686_v33 = vld [vmem:[%s5644_s2 + $0xf8] sm:$0xff]  ;;  %v642_v36 = vld [vmem:[%s5644_s2 + $0x60] sm:$0xff] }
 0x102   :  { %687 = vmatpush.msra.mxu1 %v686_v33  ;;  %782 = vmatpush.msra.mxu2 %v642_v36  ;;  %v3677_v33 = vpop.permute.xlu1 %438 }
 0x106   :  { %v3471_v32 = vpop.f32.mrf.mxu0 }
 0x107   :  { %v278_v40 = vmul.f32 %v3471_v32, %v3471_v32  ;;  %v247_v45 = vadd.f32 %v246_v37, %v3471_v32  ;;  %v909_v37 = vld [vmem:[%s5644_s2 + $0x168] sm:$0xff] }
 0x108   :  { %914 = vmatpush.msra.mxu3 %v909_v37  ;;  %v681_v37 = vld [vmem:[%s5644_s2 + $0xd0] sm:$0xff] }
 0x109   :  { %v302_v49 = vadd.f32 %v301_v42, %v278_v40 }
 0x10e   :  { %v3479_v35 = vpop.f32.mrf.mxu0 }
 0x10f   :  { %v279_v48 = vmul.f32 %v3479_v35, %v3479_v35  ;;  %v248_v50 = vadd.f32 %v247_v45, %v3479_v35 }
 0x111   :  { %v303_v56 = vadd.f32 %v302_v49, %v279_v48  ;;  %v321_v48 = vmul.f32 128.0, %v3607_v27  ;;  %v685_v49 = vld [vmem:[%s5644_s2 + $0xf0] sm:$0xff] }
 0x112   :  { %688 = vmatpush.msra.mxu1 %v685_v49  ;;  %v1068_v49 = vld [vmem:[%s5644_s2 + $0x1f0] sm:$0xff] }
 0x113   :  { %v322_v5 = vsub.f32 1.0, %v321_v48 }
 0x115   :  { %v323_v36 = vmul.f32 %v3607_v27, %v322_v5 }
 0x116   :  { %v3487_v38 = vpop.f32.mrf.mxu0 }
 0x117   :  { %v280_v52 = vmul.f32 %v3487_v38, %v3487_v38  ;;  %v249_v57 = vadd.f32 %v248_v50, %v3487_v38  ;;  %v641_v50 = vld [vmem:[%s5644_s2 + $0x58] sm:$0xff] }
 0x118   :  { %783 = vmatpush.msra.mxu2 %v641_v50  ;;  %v680_v50 = vld [vmem:[%s5644_s2 + $0xc8] sm:$0xff] }
 0x119   :  { %v304_v61 = vadd.f32 %v303_v56, %v280_v52  ;;  %v908_v52 = vld [vmem:[%s5644_s2 + $0x160] sm:$0xff] }
 0x11a   :  { %915 = vmatpush.msra.mxu3 %v908_v52  ;;  %v636_v52 = vld [vmem:[%s5644_s2 + $0x30] sm:$0xff] }
 0x11e   :  { %v3492_v41 = vpop.f32.mrf.mxu0 }
 0x11f   :  { %v281_v58 = vmul.f32 %v3492_v41, %v3492_v41  ;;  %v250_v63 = vadd.f32 %v249_v57, %v3492_v41 }
 0x121   :  { %v305_v2 = vadd.f32 %v304_v61, %v281_v58  ;;  %v684_v61 = vld [vmem:[%s5644_s2 + $0xe8] sm:$0xff] }
 0x122   :  { %689 = vmatpush.msra.mxu1 %v684_v61  ;;  %v1067_v61 = vld [vmem:[%s5644_s2 + $0x1e8] sm:$0xff] }
 0x124   :  { %690 = vmatpush.msra.mxu1 %v683_v7 }
 0x126   :  { %v3497_v44 = vpop.f32.mrf.mxu0 }
 0x127   :  { %v282_v0 = vmul.f32 %v3497_v44, %v3497_v44  ;;  %v251_v3 = vadd.f32 %v250_v63, %v3497_v44  ;;  %v640_v63 = vld [vmem:[%s5644_s2 + $0x50] sm:$0xff] }
 0x128   :  { %784 = vmatpush.msra.mxu2 %v640_v63  ;;  %v324_v63 = vadd.f32 %v3607_v27, %v323_v36  ;;  %v633_v36 = vld [vmem:[%s5644_s2 + $0x18] sm:$0xff] }
 0x129   :  { %v306_v8 = vadd.f32 %v305_v2, %v282_v0  ;;  %v907_v0 = vld [vmem:[%s5644_s2 + $0x158] sm:$0xff] }
 0x12a   :  { %916 = vmatpush.msra.mxu3 %v907_v0  ;;  %v679_v0 = vld [vmem:[%s5644_s2 + $0xc0] sm:$0xff] }
 0x12e   :  { %v3502_v46 = vpop.f32.mrf.mxu0 }
 0x12f   :  { %v283_v4 = vmul.f32 %v3502_v46, %v3502_v46  ;;  %v252_v9 = vadd.f32 %v251_v3, %v3502_v46 }
 0x131   :  { %v307_v17 = vadd.f32 %v306_v8, %v283_v4  ;;  %v639_v8 = vld [vmem:[%s5644_s2 + $0x48] sm:$0xff] }
 0x132   :  { %785 = vmatpush.msra.mxu2 %v639_v8  ;;  %v1066_v8 = vld [vmem:[%s5644_s2 + $0x1e0] sm:$0xff] }
 0x134   :  { %786 = vmatpush.msra.mxu2 %v638_v23  ;;  %v1065_v23 = vld [vmem:[%s5644_s2 + $0x1d8] sm:$0xff] }
 0x136   :  { %v3521_v62 = vpop.f32.mrf.mxu0 }
 0x137   :  { %v284_v10 = vmul.f32 %v3521_v62, %v3521_v62  ;;  %v253_v18 = vadd.f32 %v252_v9, %v3521_v62  ;;  %v906_v9 = vld [vmem:[%s5644_s2 + $0x150] sm:$0xff] }
 0x138   :  { %917 = vmatpush.msra.mxu3 %v906_v9  ;;  %v678_v9 = vld [vmem:[%s5644_s2 + $0xb8] sm:$0xff] }
 0x139   :  { %v308_v29 = vadd.f32 %v307_v17, %v284_v10  ;;  %v3661_v17 = vpop.permute.xlu0 %473 }
 0x13a   :  { %918 = vmatpush.msra.mxu3 %v905_v26 }
 0x13e   :  { %v3538_v15 = vpop.f32.mrf.mxu0 }
 0x13f   :  { %v285_v19 = vmul.f32 %v3538_v15, %v3538_v15  ;;  %v254_v30 = vadd.f32 %v253_v18, %v3538_v15  ;;  %v3663_v18 = vpop.permute.xlu2 %468 }
 0x141   :  { %v309_v40 = vadd.f32 %v308_v29, %v285_v19  ;;  %v682_v19 = vld [vmem:[%s5644_s2 + $0xd8] sm:$0xff]  ;;  %v3730_v26 = vpop.permute.xlu0 %488 }
 0x142   :  { %691 = vmatpush.msra.mxu1 %v682_v19 }
 0x144   :  { %692 = vmatpush.msra.mxu1 %v681_v37  ;;  %v900_v37 = vld [vmem:[%s5644_s2 + $0x120] sm:$0xff] }
 0x146   :  { %v3554_v34 = vpop.f32.mrf.mxu0  ;;  %693 = vmatpush.msra.mxu1 %v680_v50  ;;  %v899_v50 = vld [vmem:[%s5644_s2 + $0x118] sm:$0xff] }
 0x147   :  { %v286_v31 = vmul.f32 %v3554_v34, %v3554_v34  ;;  %v255_v42 = vadd.f32 %v254_v30, %v3554_v34 }
 0x148   :  { %694 = vmatpush.msra.mxu1 %v679_v0  ;;  %v898_v0 = vld [vmem:[%s5644_s2 + $0x110] sm:$0xff] }
 0x149   :  { %v310_v56 = vadd.f32 %v309_v40, %v286_v31  ;;  %v1069_v31 = vld [vmem:[%s5644_s2 + $0x1f8] sm:$0xff] }
 0x14a   :  { %1070 = vmatpush.msrb.mxu0 %v1069_v31  ;;  %v637_v40 = vld [vmem:[%s5644_s2 + $0x38] sm:$0xff]  ;;  %695 = vmatpush.msra.mxu1 %v678_v9  ;;  %v677_v31 = vld [vmem:[%s5644_s2 + $0xb0] sm:$0xff]  ;;  %v897_v9 = vld [vmem:[%s5644_s2 + $0x108] sm:$0xff] }
 0x14b   :  { %787 = vmatpush.msra.mxu2 %v637_v40 }
 0x14c   :  { %1071 = vmatpush.msrb.mxu0 %v1068_v49  ;;  %696 = vmatpush.msra.mxu1 %v677_v31  ;;  %v632_v49 = vld [vmem:[%s5644_s2 + $0x10] sm:$0xff]  ;;  %v3800_v31 = vpop.permute.xlu0 %503 }
 0x14d   :  { %788 = vmatpush.msra.mxu2 %v636_v52  ;;  %v3117_v52 = vmov 0.0  }
 0x14e   :  { %v3572_v59 = vpop.f32.mrf.mxu0  ;;  %1072 = vmatpush.msrb.mxu0 %v1067_v61  ;;  %576 = vst [vmem:[#allocation2] sm:$0xff] %v3117_v52  ;;  %v675_v61 = vld [vmem:[%s5644_s2 + $0xa0] sm:$0xff] }
 0x14f   :  { %v287_v45 = vmul.f32 %v3572_v59, %v3572_v59  ;;  %v256_v57 = vadd.f32 %v255_v42, %v3572_v59  ;;  %v904_v42 = vld [vmem:[%s5644_s2 + $0x140] sm:$0xff]  ;;  %577 = vst [vmem:[#allocation2 + $0x8] sm:$0x7] %v3117_v52 }
 0x150   :  { %919 = vmatpush.msra.mxu3 %v904_v42  ;;  %1073 = vmatpush.msrb.mxu0 %v1066_v8  ;;  %578 = vst [vmem:[#allocation2 + $0xd3] sm:$0xff] %v3117_v52  ;;  %v630_v8 = vld [vmem:[%s5644_s2] sm:$0xff] }
 0x151   :  { %v311_v2 = vadd.f32 %v310_v56, %v287_v45  ;;  %v903_v56 = vld [vmem:[%s5644_s2 + $0x138] sm:$0xff]  ;;  %579 = vst [vmem:[#allocation2 + $0xdb] sm:$0x7] %v3117_v52 }
 0x152   :  { %920 = vmatpush.msra.mxu3 %v903_v56  ;;  %1074 = vmatpush.msrb.mxu0 %v1065_v23  ;;  %v1060_v23 = vld [vmem:[%s5644_s2 + $0x1b0] sm:$0xff] }
 0x156   :  { %v3599_v22 = vpop.f32.mrf.mxu0 }
 0x157   :  { %v288_v58 = vmul.f32 %v3599_v22, %v3599_v22  ;;  %v257_v3 = vadd.f32 %v256_v57, %v3599_v22 }
 0x159   :  { %v312_v10 = vadd.f32 %v311_v2, %v288_v58  ;;  %v635_v2 = vld [vmem:[%s5644_s2 + $0x28] sm:$0xff] }
 0x15a   :  { %789 = vmatpush.msra.mxu2 %v635_v2 }
 0x15e   :  { %v3647_v4 = vpop.f32.mrf.mxu0 }
 0x15f   :  { %v258_v12 = vadd.f32 %v257_v3, %v3647_v4  ;;  %v289_v13 = vmul.f32 %v3647_v4, %v3647_v4  ;;  %v902_v3 = vld [vmem:[%s5644_s2 + $0x130] sm:$0xff] }
 0x160   :  { %921 = vmatpush.msra.mxu3 %v902_v3 }
 0x161   :  { %v259_v29 = vrot.slane %v258_v12, 4  ;;  %v313_v30 = vadd.f32 %v312_v10, %v289_v13  ;;  %v634_v10 = vld [vmem:[%s5644_s2 + $0x20] sm:$0xff] }
 0x162   :  { %790 = vmatpush.msra.mxu2 %v634_v10 }
 0x163   :  { %v260_v45 = vadd.f32 %v259_v29, %v258_v12  ;;  %v314_v48 = vrot.slane %v313_v30, 4  ;;  %v901_v12 = vld [vmem:[%s5644_s2 + $0x128] sm:$0xff]  ;;  %v3732_v29 = vpop.permute.xlu2 %483 }
 0x164   :  { %922 = vmatpush.msra.mxu3 %v901_v12  ;;  %791 = vmatpush.msra.mxu2 %v633_v36  ;;  %v1061_v12 = vld [vmem:[%s5644_s2 + $0x1b8] sm:$0xff] }
 0x165   :  { %v261_v57 = vrot.slane %v260_v45, 2  ;;  %v315_v58 = vadd.f32 %v314_v48, %v313_v30  ;;  %v326_v30 = vsel %vm325_vm0, %v3607_v27, %v324_v63  ;;  %v1064_v27 = vld [vmem:[%s5644_s2 + $0x1d0] sm:$0xff]  ;;  %v676_v48 = vld [vmem:[%s5644_s2 + $0xa8] sm:$0xff] }
 0x166   :  { %923 = vmatpush.msra.mxu3 %v900_v37  ;;  %1075 = vmatpush.msrb.mxu0 %v1064_v27  ;;  %v631_v63 = vld [vmem:[%s5644_s2 + $0x8] sm:$0xff] }
 0x167   :  { %v262_v5 = vadd.f32 %v261_v57, %v260_v45  ;;  %v316_v7 = vrot.slane %v315_v58, 2  ;;  %v3749_v45 = vpop.permute.xlu1 %443  ;;  %697 = vmatpush.msra.mxu1 %v676_v48  ;;  %792 = vmatpush.msra.mxu2 %v632_v49  ;;  %v871_v37 = vld [vmem:[#allocation2 + $0x2] sm:$0xff] }
 0x168   :  { %924 = vmatpush.msra.mxu3 %v899_v50  ;;  %v671_v48 = vld [vmem:[%s5644_s2 + $0x80] sm:$0xff] }
 0x169   :  { %v263_v13 = vrot.slane %v262_v5, 1  ;;  %v317_v19 = vadd.f32 %v316_v7, %v315_v58  ;;  %v1063_v58 = vld [vmem:[%s5644_s2 + $0x1c8] sm:$0xff]  ;;  %698 = vmatpush.msra.mxu1 %v675_v61  ;;  %793 = vmatpush.msra.mxu2 %v631_v63  ;;  %v674_v7 = vld [vmem:[%s5644_s2 + $0x98] sm:$0xff]  ;;  %v1058_v49 = vld [vmem:[%s5644_s2 + $0x1a0] sm:$0xff] }
 0x16a   :  { %1076 = vmatpush.msrb.mxu0 %v1063_v58  ;;  %925 = vmatpush.msra.mxu3 %v898_v0  ;;  %v646_v50 = vld [vmem:[#allocation2 + $0x1] sm:$0xff]  ;;  %v1056_v58 = vld [vmem:[%s5644_s2 + $0x190] sm:$0xff] }
 0x16b   :  { %v264_v40 = vadd.f32 %v263_v13, %v262_v5  ;;  %v318_v42 = vrot.slane %v317_v19, 1  ;;  %v1062_v5 = vld [vmem:[%s5644_s2 + $0x1c0] sm:$0xff]  ;;  %699 = vmatpush.msra.mxu1 %v674_v7  ;;  %794 = vmatpush.msra.mxu2 %v630_v8  ;;  %v673_v13 = vld [vmem:[%s5644_s2 + $0x90] sm:$0xff]  ;;  %v3802_v36 = vpop.permute.xlu2 %498  ;;  %v1055_v63 = vld [vmem:[%s5644_s2 + $0x188] sm:$0xff] }
 0x16c   :  { %1077 = vmatpush.msrb.mxu0 %v1062_v5  ;;  %926 = vmatpush.msra.mxu3 %v897_v9 }
 0x16d   :  { %v319_v56 = vadd.f32 %v318_v42, %v317_v19  ;;  %v3760_v57 = vmul.f32 %v326_v30, %v264_v40  ;;  %v896_v19 = vld [vmem:[%s5644_s2 + $0x100] sm:$0xff]  ;;  %795 = vmatmul.f32.vlgmr.msra.gmra.mxu2 %v3117_v52  ;;  %700 = vmatpush.msra.mxu1 %v673_v13  ;;  %v672_v40 = vld [vmem:[%s5644_s2 + $0x88] sm:$0xff]  ;;  %v1227_v52 = vld [vmem:[%s5644_s2 + $0x278] sm:$0xff] }
 0x16e   :  { %1078 = vmatpush.msrb.mxu0 %v1061_v12  ;;  %927 = vmatpush.msra.mxu3 %v896_v19  ;;  %v1059_v42 = vld [vmem:[%s5644_s2 + $0x1a8] sm:$0xff]  ;;  %v1226_v12 = vld [vmem:[%s5644_s2 + $0x270] sm:$0xff]  ;;  %v233_v13 = vld [vmem:[%s5645_s5] sm:$0x1] }
 0x16f   :  { %v328_v2 = vmul.f32 %v326_v30, %v319_v56  ;;  %v329_v3 = vmul.f32 %v3760_v57, %v3760_v57  ;;  %928 = vmatmul.f32.vlgmr.msra.gmra.mxu3 %v871_v37  ;;  %701 = vmatpush.msra.mxu1 %v672_v40  ;;  %v3810_v27 = vpop.permute.xlu1 %463  ;;  %v1057_v56 = vld [vmem:[%s5644_s2 + $0x198] sm:$0xff] }
 0x170   :  { %1079 = vmatpush.msrb.mxu0 %v1060_v23 }
 0x171   :  { %v330_v10 = vsub.f32 %v328_v2, %v329_v3  ;;  %702 = vmatpush.msra.mxu1 %v671_v48  ;;  %v1054_v2 = vld [vmem:[%s5644_s2 + $0x180] sm:$0xff]  ;;  %v3833_v3 = vpop.permute.xlu0 %518 }
 0x172   :  { %1080 = vmatpush.msrb.mxu0 %v1059_v42  ;;  %703 = vmatmul.f32.vlgmr.msra.gmra.mxu1 %v646_v50  ;;  %v234_v42 = vld [vmem:[%s5646_s6] sm:$0x1] }
 0x173   :  { %v331_v30 = vadd.f32 1e-05, %v330_v10  ;;  %1228 = vmatpush.msrb.mxu1 %v1227_v52  ;;  %v514_v7 = vpop.permute.xlu2 %513 }
 0x174   :  { %1081 = vmatpush.msrb.mxu0 %v1058_v49 }
 0x175   :  { %3071 = vrsqrt.f32 %v331_v30  ;;  %1229 = vmatpush.msrb.mxu1 %v1226_v12  ;;  %vm338_vm2 = vweird.f32 %v331_v30 }
 0x176   :  { %1082 = vmatpush.msrb.mxu0 %v1057_v56 }
 0x177   :  { %v3835_v8 = vpop.permute.xlu1 %478 }
 0x178   :  { %1083 = vmatpush.msrb.mxu0 %v1056_v58 }
 0x179   :  { %v3843_v40 = vpop.permute.xlu0 %533 }
 0x17a   :  { %1084 = vmatpush.msrb.mxu0 %v1055_v63 }
 0x17b   :  { %v3072_v61 = vpop.eup %3071  ;;  %v529_v48 = vpop.permute.xlu2 %528 }
 0x17c   :  { %v333_v0 = vmul.f32 %v3072_v61, %v331_v30  ;;  %1085 = vmatpush.msrb.mxu0 %v1054_v2  ;;  %vm339_vm1 = vweird.f32 %v3072_v61 }
 0x17d   :  { %vm340_vm3 = vmor %vm338_vm2, %vm339_vm1 }
 0x17e   :  { %v334_v5 = vmul.f32 %v3072_v61, %v333_v0 }
 0x17f   :  { %v3851_v52 = vpop.permute.xlu1 %493 }
 0x180   :  { %v335_v9 = vmul.f32 0.5, %v334_v5 }
 0x182   :  { %v336_v10 = vsub.f32 1.5, %v335_v9 }
 0x184   :  { %v337_v19 = vmul.f32 %v3072_v61, %v336_v10 }
 0x186   :  { %v341_v23 = vsel %vm340_vm3, %v3072_v61, %v337_v19 }
 0x187   :  { %v342_v37 = vmul.f32 %v341_v23, %v233_v13  ;;  %v549_v23 = vpop.permute.xlu0 %548 }
 0x189   :  { %v343_v49 = vmul.f32 %v342_v37, %v3760_v57  ;;  %v3849_v50 = vperm.slane %v342_v37, 0  ;;  %v544_v37 = vpop.permute.xlu2 %543 }
 0x18b   :  { %v344_v56 = vsub.f32 %v234_v42, %v343_v49  ;;  %v372_v30 = vmul.f32 %v3849_v50, %v3647_v4  ;;  %v365_v58 = vmul.f32 %v3849_v50, %v3497_v44  ;;  %v368_v61 = vmul.f32 %v3849_v50, %v3538_v15 }
 0x18c   :  { %v371_v63 = vmul.f32 %v3849_v50, %v3599_v22  ;;  %v348_v57 = vmul.f32 %v3849_v50, %v3313_v39  ;;  %v349_v0 = vmul.f32 %v3849_v50, %v3324_v43  ;;  %v350_v2 = vmul.f32 %v3849_v50, %v3335_v47 }
 0x18d   :  { %v3867_v5 = vperm.slane %v344_v56, 0  ;;  %v351_v44 = vmul.f32 %v3849_v50, %v3346_v51  ;;  %v352_v15 = vmul.f32 %v3849_v50, %v3357_v55  ;;  %v353_v22 = vmul.f32 %v3849_v50, %v3371_v60 }
 0x18e   :  { %v354_v39 = vmul.f32 %v3849_v50, %v3385_v1  ;;  %v355_v43 = vmul.f32 %v3849_v50, %v3399_v6  ;;  %v356_v47 = vmul.f32 %v3849_v50, %v3413_v11  ;;  %v357_v4 = vmul.f32 %v3849_v50, %v3427_v16 }
 0x18f   :  { %v400_v51 = vadd.f32 %v3867_v5, %v372_v30  ;;  %v393_v9 = vadd.f32 %v3867_v5, %v365_v58  ;;  %v396_v55 = vadd.f32 %v3867_v5, %v368_v61  ;;  %v399_v60 = vadd.f32 %v3867_v5, %v371_v63  ;;  %v1225_v30 = vld [vmem:[%s5644_s2 + $0x268] sm:$0xff] }
 0x190   :  { %v376_v10 = vadd.f32 %v3867_v5, %v348_v57  ;;  %v377_v1 = vadd.f32 %v3867_v5, %v349_v0  ;;  %v378_v6 = vadd.f32 %v3867_v5, %v350_v2  ;;  %v379_v12 = vadd.f32 %v3867_v5, %v351_v44  ;;  %1230 = vmatpush.msrb.mxu1 %v1225_v30  ;;  %v3894_v2 = vpop.permute.xlu1 %508 }
 0x191   :  { %v425_v11 = vmax.f32 %v400_v51, 0.0  ;;  %v418_v13 = vmax.f32 %v393_v9, 0.0  ;;  %v421_v19 = vmax.f32 %v396_v55, 0.0  ;;  %v424_v16 = vmax.f32 %v399_v60, 0.0 }
 0x192   :  { %v401_v42 = vmax.f32 %v376_v10, 0.0  ;;  %v402_v49 = vmax.f32 %v377_v1, 0.0  ;;  %v403_v56 = vmax.f32 %v378_v6, 0.0  ;;  %v404_v58 = vmax.f32 %v379_v12, 0.0 }
 0x193   :  { %v575_v61 = vmul.f32 %v549_v23, %v425_v11  ;;  %v568_v63 = vmul.f32 %v514_v7, %v418_v13  ;;  %v571_v57 = vmul.f32 %v529_v48, %v421_v19  ;;  %v574_v0 = vmul.f32 %v544_v37, %v424_v16  ;;  %v1224_v11 = vld [vmem:[%s5644_s2 + $0x260] sm:$0xff] }
 0x194   :  { %v3897_v44 = vmul.f32 %v3546_v25, %v401_v42  ;;  %v3900_v51 = vmul.f32 %v3565_v53, %v402_v49  ;;  %v3903_v9 = vmul.f32 %v3677_v33, %v403_v56  ;;  %v3906_v55 = vmul.f32 %v3749_v45, %v404_v58  ;;  %1231 = vmatpush.msrb.mxu1 %v1224_v11 }
 0x195   :  { %604 = vst [vmem:[#allocation2 + $0xcb] sm:$0xff] %v575_v61  ;;  %v380_v7 = vadd.f32 %v3867_v5, %v352_v15  ;;  %v381_v48 = vadd.f32 %v3867_v5, %v353_v22  ;;  %v382_v60 = vadd.f32 %v3867_v5, %v354_v39  ;;  %v383_v10 = vadd.f32 %v3867_v5, %v355_v43 }
 0x196   :  { %597 = vst [vmem:[#allocation2 + $0x93] sm:$0xff] %v568_v63  ;;  %v384_v25 = vadd.f32 %v3867_v5, %v356_v47  ;;  %v385_v53 = vadd.f32 %v3867_v5, %v357_v4  ;;  %v358_v33 = vmul.f32 %v3849_v50, %v3438_v20  ;;  %v359_v45 = vmul.f32 %v3849_v50, %v3449_v24 }
 0x197   :  { %600 = vst [vmem:[#allocation2 + $0xab] sm:$0xff] %v571_v57  ;;  %v405_v1 = vmax.f32 %v380_v7, 0.0  ;;  %v406_v15 = vmax.f32 %v381_v48, 0.0  ;;  %v407_v6 = vmax.f32 %v382_v60, 0.0  ;;  %v408_v22 = vmax.f32 %v383_v10, 0.0 }
 0x198   :  { %603 = vst [vmem:[#allocation2 + $0xc3] sm:$0xff] %v574_v0  ;;  %v409_v39 = vmax.f32 %v384_v25, 0.0  ;;  %v410_v12 = vmax.f32 %v385_v53, 0.0  ;;  %v386_v43 = vadd.f32 %v3867_v5, %v358_v33  ;;  %v387_v47 = vadd.f32 %v3867_v5, %v359_v45 }
 0x199   :  { %580 = vst [vmem:[#allocation2 + $0xb] sm:$0xff] %v3897_v44  ;;  %v3922_v4 = vmul.f32 %v3567_v54, %v405_v1  ;;  %v3925_v20 = vmul.f32 %v3597_v21, %v406_v15  ;;  %v3928_v24 = vmul.f32 %v3592_v14, %v407_v6  ;;  %v3935_v13 = vmul.f32 %v3810_v27, %v408_v22 }
 0x19a   :  { %581 = vst [vmem:[#allocation2 + $0x13] sm:$0xff] %v3900_v51  ;;  %v3938_v19 = vmul.f32 %v3663_v18, %v409_v39  ;;  %v3941_v54 = vmul.f32 %v3661_v17, %v410_v12  ;;  %v411_v21 = vmax.f32 %v386_v43, 0.0  ;;  %v360_v14 = vmul.f32 %v3849_v50, %v3460_v28 }
 0x19b   :  { %582 = vst [vmem:[#allocation2 + $0x1b] sm:$0xff] %v3903_v9  ;;  %v361_v16 = vmul.f32 %v3849_v50, %v3471_v32  ;;  %v362_v27 = vmul.f32 %v3849_v50, %v3479_v35  ;;  %v412_v17 = vmax.f32 %v387_v47, 0.0  ;;  %v363_v23 = vmul.f32 %v3849_v50, %v3487_v38  ;;  %v1222_v47 = vld [vmem:[%s5644_s2 + $0x250] sm:$0xff] }
 0x19c   :  { %583 = vst [vmem:[#allocation2 + $0x23] sm:$0xff] %v3906_v55  ;;  %v3952_v18 = vmul.f32 %v3835_v8, %v411_v21  ;;  %v364_v37 = vmul.f32 %v3849_v50, %v3492_v41  ;;  %v388_v28 = vadd.f32 %v3867_v5, %v360_v14  ;;  %v366_v42 = vmul.f32 %v3849_v50, %v3502_v46  ;;  %v524_v8 = vpop.permute.xlu1 %523 }
 0x19d   :  { %584 = vst [vmem:[#allocation2 + $0x2b] sm:$0xff] %v3922_v4  ;;  %v389_v32 = vadd.f32 %v3867_v5, %v361_v16  ;;  %v390_v35 = vadd.f32 %v3867_v5, %v362_v27  ;;  %v391_v49 = vadd.f32 %v3867_v5, %v363_v23  ;;  %v367_v41 = vmul.f32 %v3849_v50, %v3521_v62  ;;  %v1221_v23 = vld [vmem:[%s5644_s2 + $0x248] sm:$0xff] }
 0x19e   :  { %585 = vst [vmem:[#allocation2 + $0x33] sm:$0xff] %v3925_v20  ;;  %v392_v38 = vadd.f32 %v3867_v5, %v364_v37  ;;  %v369_v56 = vmul.f32 %v3849_v50, %v3554_v34  ;;  %v413_v30 = vmax.f32 %v388_v28, 0.0  ;;  %v394_v46 = vadd.f32 %v3867_v5, %v366_v42 }
 0x19f   :  { %586 = vst [vmem:[#allocation2 + $0x3b] sm:$0xff] %v3928_v24  ;;  %v414_v58 = vmax.f32 %v389_v32, 0.0  ;;  %v415_v61 = vmax.f32 %v390_v35, 0.0  ;;  %v3975_v7 = vmul.f32 %v3732_v29, %v412_v17  ;;  %v416_v48 = vmax.f32 %v391_v49, 0.0  ;;  %v1220_v49 = vld [vmem:[%s5644_s2 + $0x240] sm:$0xff] }
 0x1a0   :  { %v647_v63 = vld [vmem:[#allocation2 + $0x9] sm:$0xff]  ;;  %587 = vst [vmem:[#allocation2 + $0x43] sm:$0xff] %v3935_v13  ;;  %v395_v62 = vadd.f32 %v3867_v5, %v367_v41  ;;  %v397_v34 = vadd.f32 %v3867_v5, %v369_v56  ;;  %v563_v60 = vmul.f32 %v3730_v26, %v413_v30  ;;  %v417_v10 = vmax.f32 %v392_v38, 0.0  ;;  %v1219_v30 = vld [vmem:[%s5644_s2 + $0x238] sm:$0xff] }
 0x1a1   :  { %v606_v57 = vld [vmem:[#allocation2 + $0x8] sm:$0xff]  ;;  %706 = vmatmul.f32.gmra.mxu1 %v647_v63  ;;  %588 = vst [vmem:[#allocation2 + $0x4b] sm:$0xff] %v3938_v19  ;;  %v564_v25 = vmul.f32 %v3851_v52, %v414_v58  ;;  %v419_v29 = vmax.f32 %v394_v46, 0.0  ;;  %v565_v53 = vmul.f32 %v3802_v36, %v415_v61  ;;  %v370_v45 = vmul.f32 %v3849_v50, %v3572_v59  ;;  %v648_v12 = vld [vmem:[#allocation2 + $0x11] sm:$0xff] }
 0x1a2   :  { %v872_v0 = vld [vmem:[#allocation2 + $0xa] sm:$0xff]  ;;  %798 = vmatmul.f32.gmra.mxu2 %v606_v57  ;;  %589 = vst [vmem:[#allocation2 + $0x53] sm:$0xff] %v3941_v54  ;;  %v420_v33 = vmax.f32 %v395_v62, 0.0  ;;  %v566_v26 = vmul.f32 %v3800_v31, %v416_v48  ;;  %v422_v1 = vmax.f32 %v397_v34, 0.0  ;;  %v567_v15 = vmul.f32 %v3894_v2, %v417_v10  ;;  %v873_v31 = vld [vmem:[#allocation2 + $0x12] sm:$0xff] }
 0x1a3   :  { %931 = vmatmul.f32.gmra.mxu3 %v872_v0  ;;  %1086 = vmatmul.f32.vlgmr.msrb.gmra.mxu0 %v872_v0  ;;  %590 = vst [vmem:[#allocation2 + $0x5b] sm:$0xff] %v3952_v18  ;;  %v398_v6 = vadd.f32 %v3867_v5, %v370_v45  ;;  %v569_v52 = vmul.f32 %v3833_v3, %v419_v29  ;;  %v607_v43 = vld [vmem:[#allocation2 + $0x10] sm:$0xff]  ;;  %v1223_v3 = vld [vmem:[%s5644_s2 + $0x258] sm:$0xff]  ;;  %v650_v11 = vld [vmem:[#allocation2 + $0x21] sm:$0xff] }
 0x1a4   :  { %591 = vst [vmem:[#allocation2 + $0x63] sm:$0xff] %v3975_v7  ;;  %v570_v22 = vmul.f32 %v524_v8, %v420_v33  ;;  %v539_v39 = vpop.permute.xlu1 %538  ;;  %v572_v59 = vmul.f32 %v3843_v40, %v422_v1  ;;  %1232 = vmatpush.msrb.mxu1 %v1223_v3  ;;  %v649_v5 = vld [vmem:[#allocation2 + $0x19] sm:$0xff]  ;;  %v875_v14 = vld [vmem:[#allocation2 + $0x22] sm:$0xff]  ;;  %v876_v17 = vld [vmem:[#allocation2 + $0x2a] sm:$0xff] }
 0x1a5   :  { %592 = vst [vmem:[#allocation2 + $0x6b] sm:$0xff] %v563_v60  ;;  %v423_v36 = vmax.f32 %v398_v6, 0.0  ;;  %v608_v2 = vld [vmem:[#allocation2 + $0x18] sm:$0xff]  ;;  %v609_v21 = vld [vmem:[#allocation2 + $0x20] sm:$0xff]  ;;  %v651_v16 = vld [vmem:[#allocation2 + $0x29] sm:$0xff] }
 0x1a6   :  { %593 = vst [vmem:[#allocation2 + $0x73] sm:$0xff] %v564_v25  ;;  %v874_v40 = vld [vmem:[#allocation2 + $0x1a] sm:$0xff]  ;;  %1233 = vmatpush.msrb.mxu1 %v1222_v47  ;;  %v610_v27 = vld [vmem:[#allocation2 + $0x28] sm:$0xff]  ;;  %v652_v37 = vld [vmem:[#allocation2 + $0x31] sm:$0xff] }
 0x1a7   :  { %594 = vst [vmem:[#allocation2 + $0x7b] sm:$0xff] %v565_v53  ;;  %v573_v50 = vmul.f32 %v539_v39, %v423_v36  ;;  %v611_v28 = vld [vmem:[#allocation2 + $0x30] sm:$0xff]  ;;  %v653_v35 = vld [vmem:[#allocation2 + $0x39] sm:$0xff]  ;;  %v654_v38 = vld [vmem:[#allocation2 + $0x41] sm:$0xff] }
 0x1a8   :  { %595 = vst [vmem:[#allocation2 + $0x83] sm:$0xff] %v566_v26  ;;  %1234 = vmatpush.msrb.mxu1 %v1221_v23  ;;  %v877_v32 = vld [vmem:[#allocation2 + $0x32] sm:$0xff]  ;;  %v878_v8 = vld [vmem:[#allocation2 + $0x3a] sm:$0xff]  ;;  %v879_v56 = vld [vmem:[#allocation2 + $0x42] sm:$0xff] }
 0x1a9   :  { %709 = vmatmul.f32.gmra.mxu1 %v648_v12  ;;  %596 = vst [vmem:[#allocation2 + $0x8b] sm:$0xff] %v567_v15  ;;  %v612_v42 = vld [vmem:[#allocation2 + $0x38] sm:$0xff]  ;;  %v613_v41 = vld [vmem:[#allocation2 + $0x40] sm:$0xff]  ;;  %v655_v58 = vld [vmem:[#allocation2 + $0x49] sm:$0xff] }
 0x1aa   :  { %801 = vmatmul.f32.gmra.mxu2 %v607_v43  ;;  %598 = vst [vmem:[#allocation2 + $0x9b] sm:$0xff] %v569_v52  ;;  %1235 = vmatpush.msrb.mxu1 %v1220_v49  ;;  %v614_v61 = vld [vmem:[#allocation2 + $0x48] sm:$0xff]  ;;  %v656_v63 = vld [vmem:[#allocation2 + $0x51] sm:$0xff]  ;;  %v657_v62 = vld [vmem:[#allocation2 + $0x59] sm:$0xff] }
 0x1ab   :  { %934 = vmatmul.f32.gmra.mxu3 %v873_v31  ;;  %1089 = vmatmul.f32.gmra.mxu0 %v873_v31  ;;  %599 = vst [vmem:[#allocation2 + $0xa3] sm:$0xff] %v570_v22  ;;  %v880_v46 = vld [vmem:[#allocation2 + $0x4a] sm:$0xff]  ;;  %v881_v0 = vld [vmem:[#allocation2 + $0x52] sm:$0xff]  ;;  %v882_v60 = vld [vmem:[#allocation2 + $0x5a] sm:$0xff] }
 0x1ac   :  { %601 = vst [vmem:[#allocation2 + $0xb3] sm:$0xff] %v572_v59  ;;  %1236 = vmatpush.msrb.mxu1 %v1219_v30  ;;  %v615_v57 = vld [vmem:[#allocation2 + $0x50] sm:$0xff]  ;;  %v616_v34 = vld [vmem:[#allocation2 + $0x58] sm:$0xff]  ;;  %v1217_v10 = vld [vmem:[%s5644_s2 + $0x228] sm:$0xff] }
 0x1ad   :  { %602 = vst [vmem:[#allocation2 + $0xbb] sm:$0xff] %v573_v50  ;;  %v1218_v48 = vld [vmem:[%s5644_s2 + $0x230] sm:$0xff]  ;;  %v658_v25 = vld [vmem:[#allocation2 + $0x61] sm:$0xff]  ;;  %v1215_v12 = vld [vmem:[%s5644_s2 + $0x218] sm:$0xff] }
 0x1ae   :  { %1237 = vmatpush.msrb.mxu1 %v1218_v48  ;;  %v617_v29 = vld [vmem:[#allocation2 + $0x60] sm:$0xff]  ;;  %v659_v33 = vld [vmem:[#allocation2 + $0x69] sm:$0xff]  ;;  %v660_v15 = vld [vmem:[#allocation2 + $0x71] sm:$0xff] }
 0x1af   :  { %v883_v53 = vld [vmem:[#allocation2 + $0x62] sm:$0xff]  ;;  %v884_v26 = vld [vmem:[#allocation2 + $0x6a] sm:$0xff]  ;;  %v885_v52 = vld [vmem:[#allocation2 + $0x72] sm:$0xff] }
 0x1b0   :  { %1238 = vmatpush.msrb.mxu1 %v1217_v10  ;;  %v618_v45 = vld [vmem:[#allocation2 + $0x68] sm:$0xff]  ;;  %v1216_v1 = vld [vmem:[%s5644_s2 + $0x220] sm:$0xff]  ;;  %v619_v6 = vld [vmem:[#allocation2 + $0x70] sm:$0xff] }
 0x1b1   :  { %712 = vmatmul.f32.gmra.mxu1 %v649_v5  ;;  %v661_v22 = vld [vmem:[#allocation2 + $0x79] sm:$0xff]  ;;  %v662_v59 = vld [vmem:[#allocation2 + $0x81] sm:$0xff]  ;;  %v1214_v47 = vld [vmem:[%s5644_s2 + $0x210] sm:$0xff] }
 0x1b2   :  { %804 = vmatmul.f32.gmra.mxu2 %v608_v2  ;;  %1239 = vmatpush.msrb.mxu1 %v1216_v1  ;;  %v620_v36 = vld [vmem:[#allocation2 + $0x78] sm:$0xff]  ;;  %v621_v31 = vld [vmem:[#allocation2 + $0x80] sm:$0xff]  ;;  %v1541_v30 = vld [vmem:[%s5644_s2 + $0x368] sm:$0xff] }
 0x1b3   :  { %937 = vmatmul.f32.gmra.mxu3 %v874_v40  ;;  %1092 = vmatmul.f32.gmra.mxu0 %v874_v40  ;;  %v886_v39 = vld [vmem:[#allocation2 + $0x7a] sm:$0xff]  ;;  %v887_v50 = vld [vmem:[#allocation2 + $0x82] sm:$0xff]  ;;  %v664_v49 = vld [vmem:[#allocation2 + $0x91] sm:$0xff] }
 0x1b4   :  { %1240 = vmatpush.msrb.mxu1 %v1215_v12  ;;  %v1539_v48 = vld [vmem:[%s5644_s2 + $0x358] sm:$0xff]  ;;  %v1536_v12 = vld [vmem:[%s5644_s2 + $0x340] sm:$0xff] }
 0x1b5   :  { %v890_v1 = vld [vmem:[#allocation2 + $0x9a] sm:$0xff] }
 0x1b6   :  { %1241 = vmatpush.msrb.mxu1 %v1214_v47 }
 0x1b9   :  { %715 = vmatmul.f32.gmra.mxu1 %v650_v11  ;;  %v663_v11 = vld [vmem:[#allocation2 + $0x89] sm:$0xff] }
 0x1ba   :  { %807 = vmatmul.f32.gmra.mxu2 %v609_v21  ;;  %v622_v21 = vld [vmem:[#allocation2 + $0x88] sm:$0xff] }
 0x1bb   :  { %940 = vmatmul.f32.gmra.mxu3 %v875_v14  ;;  %1095 = vmatmul.f32.gmra.mxu0 %v875_v14  ;;  %v888_v14 = vld [vmem:[#allocation2 + $0x8a] sm:$0xff] }
 0x1c1   :  { %718 = vmatmul.f32.gmra.mxu1 %v651_v16  ;;  %v1385_v16 = vld [vmem:[%s5644_s2 + $0x2f8] sm:$0xff] }
 0x1c2   :  { %810 = vmatmul.f32.gmra.mxu2 %v610_v27  ;;  %v1543_v27 = vld [vmem:[%s5644_s2 + $0x378] sm:$0xff] }
 0x1c3   :  { %943 = vmatmul.f32.gmra.mxu3 %v876_v17  ;;  %1098 = vmatmul.f32.gmra.mxu0 %v876_v17 }
 0x1c4   :  { %1386 = vmatpush.msrb.mxu2 %v1385_v16  ;;  %1544 = vmatpush.msrb.mxu3 %v1543_v27  ;;  %v1377_v16 = vld [vmem:[%s5644_s2 + $0x2b8] sm:$0xff] }
 0x1c5   :  { %v1535_v27 = vld [vmem:[%s5644_s2 + $0x338] sm:$0xff] }
 0x1c9   :  { %721 = vmatmul.f32.gmra.mxu1 %v652_v37 }
 0x1ca   :  { %813 = vmatmul.f32.gmra.mxu2 %v611_v28 }
 0x1cb   :  { %946 = vmatmul.f32.gmra.mxu3 %v877_v32  ;;  %1101 = vmatmul.f32.gmra.mxu0 %v877_v32 }
 0x1d1   :  { %724 = vmatmul.f32.gmra.mxu1 %v653_v35 }
 0x1d2   :  { %816 = vmatmul.f32.gmra.mxu2 %v612_v42  ;;  %v1384_v42 = vld [vmem:[%s5644_s2 + $0x2f0] sm:$0xff] }
 0x1d3   :  { %949 = vmatmul.f32.gmra.mxu3 %v878_v8  ;;  %1104 = vmatmul.f32.gmra.mxu0 %v878_v8  ;;  %v1542_v8 = vld [vmem:[%s5644_s2 + $0x370] sm:$0xff] }
 0x1d4   :  { %1387 = vmatpush.msrb.mxu2 %v1384_v42  ;;  %1545 = vmatpush.msrb.mxu3 %v1542_v8  ;;  %v1534_v42 = vld [vmem:[%s5644_s2 + $0x330] sm:$0xff]  ;;  %v1695_v8 = vld [vmem:[%s5644_s2 + $0x3c8] sm:$0xff] }
 0x1d6   :  { %1546 = vmatpush.msrb.mxu3 %v1541_v30 }
 0x1d9   :  { %727 = vmatmul.f32.gmra.mxu1 %v654_v38  ;;  %v623_v38 = vld [vmem:[#allocation2 + $0x90] sm:$0xff] }
 0x1da   :  { %819 = vmatmul.f32.gmra.mxu2 %v613_v41  ;;  %v889_v41 = vld [vmem:[#allocation2 + $0x92] sm:$0xff] }
 0x1db   :  { %952 = vmatmul.f32.gmra.mxu3 %v879_v56  ;;  %1107 = vmatmul.f32.gmra.mxu0 %v879_v56  ;;  %v1383_v56 = vld [vmem:[%s5644_s2 + $0x2e8] sm:$0xff] }
 0x1dc   :  { %1388 = vmatpush.msrb.mxu2 %v1383_v56 }
 0x1e1   :  { %730 = vmatmul.f32.gmra.mxu1 %v655_v58  ;;  %v1213_v58 = vld [vmem:[%s5644_s2 + $0x208] sm:$0xff] }
 0x1e2   :  { %822 = vmatmul.f32.gmra.mxu2 %v614_v61  ;;  %v1382_v61 = vld [vmem:[%s5644_s2 + $0x2e0] sm:$0xff]  ;;  %1242 = vmatpush.msrb.mxu1 %v1213_v58 }
 0x1e3   :  { %955 = vmatmul.f32.gmra.mxu3 %v880_v46  ;;  %1110 = vmatmul.f32.gmra.mxu0 %v880_v46  ;;  %v1540_v46 = vld [vmem:[%s5644_s2 + $0x360] sm:$0xff] }
 0x1e4   :  { %1389 = vmatpush.msrb.mxu2 %v1382_v61  ;;  %1547 = vmatpush.msrb.mxu3 %v1540_v46  ;;  %v1694_v58 = vld [vmem:[%s5644_s2 + $0x3c0] sm:$0xff] }
 0x1e6   :  { %1548 = vmatpush.msrb.mxu3 %v1539_v48  ;;  %v1374_v48 = vld [vmem:[%s5644_s2 + $0x2a0] sm:$0xff] }
 0x1e9   :  { %733 = vmatmul.f32.gmra.mxu1 %v656_v63  ;;  %v1701_v63 = vld [vmem:[%s5644_s2 + $0x3f8] sm:$0xff] }
 0x1ea   :  { %825 = vmatmul.f32.gmra.mxu2 %v615_v57  ;;  %1702 = vmatpush.msra.mxu0 %v1701_v63 }
 0x1eb   :  { %958 = vmatmul.f32.gmra.mxu3 %v881_v0  ;;  %1113 = vmatmul.f32.gmra.mxu0 %v881_v0  ;;  %v1381_v0 = vld [vmem:[%s5644_s2 + $0x2d8] sm:$0xff] }
 0x1ec   :  { %1390 = vmatpush.msrb.mxu2 %v1381_v0  ;;  %v626_v0 = vld [vmem:[#allocation2 + $0xa8] sm:$0xff] }
 0x1ef   :  { %v4020_v43 = vpop.f32.mrf.mxu1 }
 0x1f0   :  { %v4022_v3 = vpop.f32.mrf.mxu2 }
 0x1f1   :  { %736 = vmatmul.f32.gmra.mxu1 %v657_v62 }
 0x1f2   :  { %828 = vmatmul.f32.gmra.mxu2 %v616_v34  ;;  %v4024_v5 = vpop.f32.mrf.mxu3 }
 0x1f3   :  { %961 = vmatmul.f32.gmra.mxu3 %v882_v60  ;;  %1116 = vmatmul.f32.gmra.mxu0 %v882_v60 }
 0x1f9   :  { %739 = vmatmul.f32.gmra.mxu1 %v658_v25 }
 0x1fa   :  { %831 = vmatmul.f32.gmra.mxu2 %v617_v29  ;;  %v665_v29 = vld [vmem:[#allocation2 + $0x99] sm:$0xff] }
 0x1fb   :  { %964 = vmatmul.f32.gmra.mxu3 %v883_v53  ;;  %1119 = vmatmul.f32.gmra.mxu0 %v883_v53  ;;  %v1700_v53 = vld [vmem:[%s5644_s2 + $0x3f0] sm:$0xff] }
 0x1fc   :  { %1703 = vmatpush.msra.mxu0 %v1700_v53  ;;  %v1531_v53 = vld [vmem:[%s5644_s2 + $0x318] sm:$0xff] }
 0x201   :  { %742 = vmatmul.f32.gmra.mxu1 %v659_v33  ;;  %v624_v33 = vld [vmem:[#allocation2 + $0x98] sm:$0xff] }
 0x202   :  { %834 = vmatmul.f32.gmra.mxu2 %v618_v45  ;;  %v1380_v45 = vld [vmem:[%s5644_s2 + $0x2d0] sm:$0xff] }
 0x203   :  { %967 = vmatmul.f32.gmra.mxu3 %v884_v26  ;;  %1122 = vmatmul.f32.gmra.mxu0 %v884_v26  ;;  %v1538_v26 = vld [vmem:[%s5644_s2 + $0x350] sm:$0xff] }
 0x204   :  { %1391 = vmatpush.msrb.mxu2 %v1380_v45  ;;  %1549 = vmatpush.msrb.mxu3 %v1538_v26  ;;  %v1859_v45 = vld [vmem:[%s5644_s2 + $0x478] sm:$0xff] }
 0x209   :  { %745 = vmatmul.f32.gmra.mxu1 %v660_v15  ;;  %v1699_v15 = vld [vmem:[%s5644_s2 + $0x3e8] sm:$0xff] }
 0x20a   :  { %837 = vmatmul.f32.gmra.mxu2 %v619_v6  ;;  %v1379_v6 = vld [vmem:[%s5644_s2 + $0x2c8] sm:$0xff]  ;;  %1704 = vmatpush.msra.mxu0 %v1699_v15  ;;  %v1530_v15 = vld [vmem:[%s5644_s2 + $0x310] sm:$0xff] }
 0x20b   :  { %970 = vmatmul.f32.gmra.mxu3 %v885_v52  ;;  %1125 = vmatmul.f32.gmra.mxu0 %v885_v52  ;;  %v1537_v52 = vld [vmem:[%s5644_s2 + $0x348] sm:$0xff] }
 0x20c   :  { %1392 = vmatpush.msrb.mxu2 %v1379_v6  ;;  %1550 = vmatpush.msrb.mxu3 %v1537_v52 }
 0x20e   :  { %1551 = vmatpush.msrb.mxu3 %v1536_v12 }
 0x210   :  { %1552 = vmatpush.msrb.mxu3 %v1535_v27  ;;  %v1528_v27 = vld [vmem:[%s5644_s2 + $0x300] sm:$0xff] }
 0x211   :  { %748 = vmatmul.f32.gmra.mxu1 %v661_v22  ;;  %v1698_v22 = vld [vmem:[%s5644_s2 + $0x3e0] sm:$0xff] }
 0x212   :  { %840 = vmatmul.f32.gmra.mxu2 %v620_v36  ;;  %1705 = vmatpush.msra.mxu0 %v1698_v22  ;;  %v1691_v22 = vld [vmem:[%s5644_s2 + $0x3a8] sm:$0xff] }
 0x213   :  { %973 = vmatmul.f32.gmra.mxu3 %v886_v39  ;;  %1128 = vmatmul.f32.gmra.mxu0 %v886_v39  ;;  %v1378_v39 = vld [vmem:[%s5644_s2 + $0x2c0] sm:$0xff] }
 0x214   :  { %1393 = vmatpush.msrb.mxu2 %v1378_v39  ;;  %1553 = vmatpush.msrb.mxu3 %v1534_v42  ;;  %v1688_v42 = vld [vmem:[%s5644_s2 + $0x390] sm:$0xff] }
 0x216   :  { %1394 = vmatpush.msrb.mxu2 %v1377_v16  ;;  %v1370_v16 = vld [vmem:[%s5644_s2 + $0x280] sm:$0xff] }
 0x219   :  { %751 = vmatmul.f32.gmra.mxu1 %v662_v59 }
 0x21a   :  { %843 = vmatmul.f32.gmra.mxu2 %v621_v31 }
 0x21b   :  { %976 = vmatmul.f32.gmra.mxu3 %v887_v50  ;;  %1131 = vmatmul.f32.gmra.mxu0 %v887_v50  ;;  %v1697_v50 = vld [vmem:[%s5644_s2 + $0x3d8] sm:$0xff] }
 0x21c   :  { %1706 = vmatpush.msra.mxu0 %v1697_v50  ;;  %v1371_v50 = vld [vmem:[%s5644_s2 + $0x288] sm:$0xff] }
 0x21e   :  { %v707_v2 = vpop.f32.mrf.mxu1 }
 0x220   :  { %v4026_v40 = vpop.f32.mrf.mxu0 }
 0x221   :  { %754 = vmatmul.f32.gmra.mxu1 %v663_v11 }
 0x222   :  { %846 = vmatmul.f32.gmra.mxu2 %v622_v21  ;;  %v666_v21 = vld [vmem:[#allocation2 + $0xa1] sm:$0xff] }
 0x223   :  { %979 = vmatmul.f32.gmra.mxu3 %v888_v14  ;;  %1134 = vmatmul.f32.gmra.mxu0 %v888_v14  ;;  %v625_v14 = vld [vmem:[#allocation2 + $0xa0] sm:$0xff] }
 0x225   :  { %v799_v17 = vpop.f32.mrf.mxu2 }
 0x226   :  { %v800_v23 = vadd.f32 %v799_v17, %v707_v2  ;;  %v932_v37 = vpop.f32.mrf.mxu3  ;;  %v710_v28 = vpop.f32.mrf.mxu1  ;;  %v891_v17 = vld [vmem:[#allocation2 + $0xa2] sm:$0xff] }
 0x228   :  { %v4037_v32 = vadd.f32 %v932_v37, %v800_v23  ;;  %v4039_v35 = vpop.f32.mrf.mxu0  ;;  %v1696_v23 = vld [vmem:[%s5644_s2 + $0x3d0] sm:$0xff]  ;;  %v1212_v37 = vld [vmem:[%s5644_s2 + $0x200] sm:$0xff] }
 0x229   :  { %757 = vmatmul.f32.gmra.mxu1 %v664_v49  ;;  %1707 = vmatpush.msra.mxu0 %v1696_v23 }
 0x22a   :  { %849 = vmatmul.f32.gmra.mxu2 %v623_v38  ;;  %1243 = vmatpush.msrb.mxu1 %v1212_v37  ;;  %v1375_v38 = vld [vmem:[%s5644_s2 + $0x2a8] sm:$0xff] }
 0x22b   :  { %982 = vmatmul.f32.gmra.mxu3 %v889_v41  ;;  %1137 = vmatmul.f32.gmra.mxu0 %v889_v41  ;;  %v1533_v41 = vld [vmem:[%s5644_s2 + $0x328] sm:$0xff] }
 0x22c   :  { %1708 = vmatpush.msra.mxu0 %v1695_v8  ;;  %1554 = vmatpush.msrb.mxu3 %v1533_v41  ;;  %v669_v41 = vld [vmem:[#allocation2 + $0xb9] sm:$0xff] }
 0x22d   :  { %v802_v57 = vpop.f32.mrf.mxu2  ;;  %1860 = vmatpush.msra.mxu1 %v1859_v45  ;;  %v895_v45 = vld [vmem:[#allocation2 + $0xc2] sm:$0xff] }
 0x22e   :  { %v803_v62 = vadd.f32 %v802_v57, %v710_v28  ;;  %v935_v34 = vpop.f32.mrf.mxu3  ;;  %v713_v60 = vpop.f32.mrf.mxu1  ;;  %v1376_v28 = vld [vmem:[%s5644_s2 + $0x2b0] sm:$0xff]  ;;  %1709 = vmatpush.msra.mxu0 %v1694_v58  ;;  %v894_v58 = vld [vmem:[#allocation2 + $0xba] sm:$0xff] }
 0x22f   :  { %1395 = vmatpush.msrb.mxu2 %v1376_v28  ;;  %v667_v57 = vld [vmem:[#allocation2 + $0xa9] sm:$0xff] }
 0x230   :  { %v4071_v10 = vadd.f32 %v935_v34, %v803_v62  ;;  %v4073_v25 = vpop.f32.mrf.mxu0  ;;  %v1532_v62 = vld [vmem:[%s5644_s2 + $0x320] sm:$0xff]  ;;  %v892_v34 = vld [vmem:[#allocation2 + $0xaa] sm:$0xff] }
 0x231   :  { %760 = vmatmul.f32.gmra.mxu1 %v665_v29  ;;  %1396 = vmatpush.msrb.mxu2 %v1375_v38  ;;  %v1373_v29 = vld [vmem:[%s5644_s2 + $0x298] sm:$0xff] }
 0x232   :  { %852 = vmatmul.f32.gmra.mxu2 %v624_v33  ;;  %1555 = vmatpush.msrb.mxu3 %v1532_v62  ;;  %v1692_v33 = vld [vmem:[%s5644_s2 + $0x3b0] sm:$0xff] }
 0x233   :  { %985 = vmatmul.f32.gmra.mxu3 %v890_v1  ;;  %1140 = vmatmul.f32.gmra.mxu0 %v890_v1  ;;  %v1372_v1 = vld [vmem:[%s5644_s2 + $0x290] sm:$0xff] }
 0x234   :  { %1397 = vmatpush.msrb.mxu2 %v1374_v48  ;;  %1556 = vmatpush.msrb.mxu3 %v1531_v53  ;;  %v670_v53 = vld [vmem:[#allocation2 + $0xc1] sm:$0xff] }
 0x235   :  { %v805_v36 = vpop.f32.mrf.mxu2 }
 0x236   :  { %v806_v59 = vadd.f32 %v805_v36, %v713_v60  ;;  %v938_v31 = vpop.f32.mrf.mxu3  ;;  %v716_v2 = vpop.f32.mrf.mxu1  ;;  %v1693_v60 = vld [vmem:[%s5644_s2 + $0x3b8] sm:$0xff]  ;;  %1398 = vmatpush.msrb.mxu2 %v1373_v29  ;;  %1557 = vmatpush.msrb.mxu3 %v1530_v15 }
 0x237   :  { %1710 = vmatpush.msra.mxu0 %v1693_v60 }
 0x238   :  { %v4105_v47 = vadd.f32 %v938_v31, %v806_v59  ;;  %v4107_v11 = vpop.f32.mrf.mxu0  ;;  %v668_v59 = vld [vmem:[#allocation2 + $0xb1] sm:$0xff]  ;;  %1399 = vmatpush.msrb.mxu2 %v1372_v1 }
 0x239   :  { %763 = vmatmul.f32.gmra.mxu1 %v666_v21  ;;  %1711 = vmatpush.msra.mxu0 %v1692_v33  ;;  %v627_v31 = vld [vmem:[#allocation2 + $0xb0] sm:$0xff]  ;;  %v629_v33 = vld [vmem:[#allocation2 + $0xc0] sm:$0xff] }
 0x23a   :  { %855 = vmatmul.f32.gmra.mxu2 %v625_v14  ;;  %v893_v21 = vld [vmem:[#allocation2 + $0xb2] sm:$0xff]  ;;  %v1690_v14 = vld [vmem:[%s5644_s2 + $0x3a0] sm:$0xff] }
 0x23b   :  { %988 = vmatmul.f32.gmra.mxu3 %v891_v17  ;;  %1143 = vmatmul.f32.gmra.mxu0 %v891_v17  ;;  %v1689_v17 = vld [vmem:[%s5644_s2 + $0x398] sm:$0xff] }
 0x23c   :  { %1712 = vmatpush.msra.mxu0 %v1691_v22  ;;  %1400 = vmatpush.msrb.mxu2 %v1371_v50  ;;  %v1503_v50 = vld [vmem:[#allocation2 + $0x14] sm:$0xff] }
 0x23d   :  { %v808_v49 = vpop.f32.mrf.mxu2 }
 0x23e   :  { %v809_v56 = vadd.f32 %v808_v49, %v716_v2  ;;  %v941_v30 = vpop.f32.mrf.mxu3  ;;  %v719_v61 = vpop.f32.mrf.mxu1  ;;  %v1529_v2 = vld [vmem:[%s5644_s2 + $0x308] sm:$0xff]  ;;  %1713 = vmatpush.msra.mxu0 %v1690_v14  ;;  %1401 = vmatpush.msrb.mxu2 %v1370_v16 }
 0x23f   :  { %1558 = vmatpush.msrb.mxu3 %v1529_v2 }
 0x240   :  { %v4139_v46 = vadd.f32 %v941_v30, %v809_v56  ;;  %v4141_v63 = vpop.f32.mrf.mxu0  ;;  %1714 = vmatpush.msra.mxu0 %v1689_v17  ;;  %v628_v56 = vld [vmem:[#allocation2 + $0xb8] sm:$0xff]  ;;  %v1687_v30 = vld [vmem:[%s5644_s2 + $0x388] sm:$0xff] }
 0x241   :  { %766 = vmatmul.f32.gmra.mxu1 %v667_v57  ;;  %1559 = vmatpush.msrb.mxu3 %v1528_v27  ;;  %v1686_v57 = vld [vmem:[%s5644_s2 + $0x380] sm:$0xff] }
 0x242   :  { %858 = vmatmul.f32.gmra.mxu2 %v626_v0  ;;  %1715 = vmatpush.msra.mxu0 %v1688_v42 }
 0x243   :  { %991 = vmatmul.f32.gmra.mxu3 %v892_v34  ;;  %1146 = vmatmul.f32.gmra.mxu0 %v892_v34 }
 0x244   :  { %1716 = vmatpush.msra.mxu0 %v1687_v30 }
 0x245   :  { %v811_v26 = vpop.f32.mrf.mxu2 }
 0x246   :  { %v812_v6 = vadd.f32 %v811_v26, %v719_v61  ;;  %v944_v52 = vpop.f32.mrf.mxu3  ;;  %v722_v36 = vpop.f32.mrf.mxu1  ;;  %v1858_v61 = vld [vmem:[%s5644_s2 + $0x470] sm:$0xff]  ;;  %1717 = vmatpush.msra.mxu0 %v1686_v57  ;;  %v1857_v26 = vld [vmem:[%s5644_s2 + $0x468] sm:$0xff] }
 0x247   :  { %1861 = vmatpush.msra.mxu1 %v1858_v61  ;;  %v1855_v61 = vld [vmem:[%s5644_s2 + $0x458] sm:$0xff] }
 0x248   :  { %v4173_v39 = vadd.f32 %v944_v52, %v812_v6  ;;  %v4175_v12 = vpop.f32.mrf.mxu0 }
 0x249   :  { %769 = vmatmul.f32.gmra.mxu1 %v668_v59  ;;  %v1345_v59 = vld [vmem:[#allocation2 + $0xc] sm:$0xff] }
 0x24a   :  { %861 = vmatmul.f32.gmra.mxu2 %v627_v31  ;;  %1862 = vmatpush.msra.mxu1 %v1857_v26  ;;  %v1053_v31 = vld [vmem:[#allocation2 + $0xca] sm:$0xff] }
 0x24b   :  { %994 = vmatmul.f32.gmra.mxu3 %v893_v21  ;;  %1149 = vmatmul.f32.gmra.mxu0 %v893_v21 }
 0x24d   :  { %v814_v23 = vpop.f32.mrf.mxu2 }
 0x24e   :  { %v815_v37 = vadd.f32 %v814_v23, %v722_v36  ;;  %v947_v28 = vpop.f32.mrf.mxu3  ;;  %v725_v8 = vpop.f32.mrf.mxu1  ;;  %v1504_v23 = vld [vmem:[#allocation2 + $0x1c] sm:$0xff] }
 0x250   :  { %v4198_v49 = vadd.f32 %v947_v28, %v815_v37  ;;  %v4200_v38 = vpop.f32.mrf.mxu0  ;;  %v1661_v37 = vld [vmem:[#allocation2 + $0x15] sm:$0xff] }
 0x251   :  { %772 = vmatmul.f32.gmra.mxu1 %v669_v41 }
 0x252   :  { %864 = vmatmul.f32.gmra.mxu2 %v628_v56 }
 0x253   :  { %997 = vmatmul.f32.gmra.mxu3 %v894_v58  ;;  %1152 = vmatmul.f32.gmra.mxu0 %v894_v58  ;;  %v1662_v58 = vld [vmem:[#allocation2 + $0x1d] sm:$0xff] }
 0x255   :  { %v817_v0 = vpop.f32.mrf.mxu2 }
 0x256   :  { %v818_v48 = vadd.f32 %v817_v0, %v725_v8  ;;  %v950_v62 = vpop.f32.mrf.mxu3  ;;  %v728_v34 = vpop.f32.mrf.mxu1 }
 0x258   :  { %v4211_v60 = vadd.f32 %v950_v62, %v818_v48  ;;  %v4213_v29 = vpop.f32.mrf.mxu0 }
 0x259   :  { %775 = vmatmul.f32.gmra.mxu1 %v670_v53 }
 0x25a   :  { %867 = vmatmul.f32.gmra.mxu2 %v629_v33  ;;  %v1663_v33 = vld [vmem:[#allocation2 + $0x25] sm:$0xff] }
 0x25b   :  { %1000 = vmatmul.f32.gmra.mxu3 %v895_v45  ;;  %1155 = vmatmul.f32.gmra.mxu0 %v895_v45 }
 0x25d   :  { %v820_v1 = vpop.f32.mrf.mxu2 }
 0x25e   :  { %v821_v15 = vadd.f32 %v820_v1, %v728_v34  ;;  %v953_v6 = vpop.f32.mrf.mxu3  ;;  %v731_v52 = vpop.f32.mrf.mxu1 }
 0x260   :  { %v4218_v22 = vadd.f32 %v953_v6, %v821_v15  ;;  %v4220_v36 = vpop.f32.mrf.mxu0 }
 0x261   :  { %1244 = vmatmul.f32.vlgmr.msrb.gmra.mxu1 %v3897_v44  ;;  %v1856_v44 = vld [vmem:[%s5644_s2 + $0x460] sm:$0xff] }
 0x262   :  { %1402 = vmatmul.f32.vlgmr.msrb.gmra.mxu2 %v1345_v59  ;;  %1863 = vmatpush.msra.mxu1 %v1856_v44  ;;  %v1507_v59 = vld [vmem:[#allocation2 + $0x34] sm:$0xff] }
 0x263   :  { %1158 = vmatmul.f32.gmra.mxu0 %v1053_v31  ;;  %1560 = vmatmul.f32.vlgmr.msrb.gmra.mxu3 %v1503_v50  ;;  %v1664_v31 = vld [vmem:[#allocation2 + $0x2d] sm:$0xff] }
 0x264   :  { %1864 = vmatpush.msra.mxu1 %v1855_v61  ;;  %v1666_v61 = vld [vmem:[#allocation2 + $0x3d] sm:$0xff] }
 0x265   :  { %v823_v2 = vpop.f32.mrf.mxu2 }
 0x266   :  { %v824_v21 = vadd.f32 %v823_v2, %v731_v52  ;;  %v956_v14 = vpop.f32.mrf.mxu3  ;;  %v734_v16 = vpop.f32.mrf.mxu1 }
 0x268   :  { %v4223_v27 = vadd.f32 %v956_v14, %v824_v21  ;;  %v4225_v17 = vpop.f32.mrf.mxu0 }
 0x269   :  { %1247 = vmatmul.f32.gmra.mxu1 %v3900_v51  ;;  %v1505_v51 = vld [vmem:[#allocation2 + $0x24] sm:$0xff] }
 0x26a   :  { %1405 = vmatmul.f32.gmra.mxu2 %v1503_v50 }
 0x26b   :  { %1563 = vmatmul.f32.gmra.mxu3 %v1504_v23  ;;  %1718 = vmatmul.f32.vlgmr.msra.gmra.mxu0 %v1661_v37  ;;  %v1665_v37 = vld [vmem:[#allocation2 + $0x35] sm:$0xff] }
 0x26d   :  { %v826_v28 = vpop.f32.mrf.mxu2 }
 0x26e   :  { %v827_v42 = vadd.f32 %v826_v28, %v734_v16  ;;  %v959_v8 = vpop.f32.mrf.mxu3  ;;  %v737_v41 = vpop.f32.mrf.mxu1 }
 0x270   :  { %v4231_v56 = vadd.f32 %v959_v8, %v827_v42  ;;  %v4233_v30 = vpop.f32.mrf.mxu0 }
 0x271   :  { %1250 = vmatmul.f32.gmra.mxu1 %v3903_v9  ;;  %v1506_v9 = vld [vmem:[#allocation2 + $0x2c] sm:$0xff] }
 0x272   :  { %1408 = vmatmul.f32.gmra.mxu2 %v1504_v23 }
 0x273   :  { %1566 = vmatmul.f32.gmra.mxu3 %v1505_v51  ;;  %1721 = vmatmul.f32.gmra.mxu0 %v1662_v58  ;;  %v1853_v58 = vld [vmem:[%s5644_s2 + $0x448] sm:$0xff] }
 0x275   :  { %v829_v57 = vpop.f32.mrf.mxu2 }
 0x276   :  { %v830_v0 = vadd.f32 %v829_v57, %v737_v41  ;;  %v962_v48 = vpop.f32.mrf.mxu3  ;;  %v740_v62 = vpop.f32.mrf.mxu1 }
 0x278   :  { %v4239_v34 = vadd.f32 %v962_v48, %v830_v0  ;;  %v4241_v53 = vpop.f32.mrf.mxu0 }
 0x279   :  { %1253 = vmatmul.f32.gmra.mxu1 %v3906_v55  ;;  %v1854_v55 = vld [vmem:[%s5644_s2 + $0x450] sm:$0xff] }
 0x27a   :  { %1411 = vmatmul.f32.gmra.mxu2 %v1505_v51  ;;  %1865 = vmatpush.msra.mxu1 %v1854_v55 }
 0x27b   :  { %1569 = vmatmul.f32.gmra.mxu3 %v1506_v9  ;;  %1724 = vmatmul.f32.gmra.mxu0 %v1663_v33 }
 0x27c   :  { %1866 = vmatpush.msra.mxu1 %v1853_v58 }
 0x27d   :  { %v832_v45 = vpop.f32.mrf.mxu2 }
 0x27e   :  { %v833_v26 = vadd.f32 %v832_v45, %v740_v62  ;;  %v965_v1 = vpop.f32.mrf.mxu3  ;;  %v743_v15 = vpop.f32.mrf.mxu1  ;;  %v1510_v45 = vld [vmem:[#allocation2 + $0x4c] sm:$0xff] }
 0x280   :  { %v4244_v6 = vadd.f32 %v965_v1, %v833_v26  ;;  %v4246_v52 = vpop.f32.mrf.mxu0  ;;  %v1667_v26 = vld [vmem:[#allocation2 + $0x45] sm:$0xff] }
 0x281   :  { %1256 = vmatmul.f32.gmra.mxu1 %v3922_v4  ;;  %v1508_v4 = vld [vmem:[#allocation2 + $0x3c] sm:$0xff] }
 0x282   :  { %1414 = vmatmul.f32.gmra.mxu2 %v1506_v9 }
 0x283   :  { %1572 = vmatmul.f32.gmra.mxu3 %v1507_v59  ;;  %1727 = vmatmul.f32.gmra.mxu0 %v1664_v31 }
 0x285   :  { %v835_v50 = vpop.f32.mrf.mxu2 }
 0x286   :  { %v836_v2 = vadd.f32 %v835_v50, %v743_v15  ;;  %v968_v21 = vpop.f32.mrf.mxu3  ;;  %v746_v14 = vpop.f32.mrf.mxu1 }
 0x288   :  { %v4252_v16 = vadd.f32 %v968_v21, %v836_v2  ;;  %v4254_v23 = vpop.f32.mrf.mxu0  ;;  %v1668_v2 = vld [vmem:[#allocation2 + $0x4d] sm:$0xff] }
 0x289   :  { %1259 = vmatmul.f32.gmra.mxu1 %v3925_v20  ;;  %v1509_v20 = vld [vmem:[#allocation2 + $0x44] sm:$0xff] }
 0x28a   :  { %1417 = vmatmul.f32.gmra.mxu2 %v1507_v59 }
 0x28b   :  { %1575 = vmatmul.f32.gmra.mxu3 %v1508_v4  ;;  %1730 = vmatmul.f32.gmra.mxu0 %v1665_v37 }
 0x28d   :  { %v838_v44 = vpop.f32.mrf.mxu2 }
 0x28e   :  { %v839_v28 = vadd.f32 %v838_v44, %v746_v14  ;;  %v971_v42 = vpop.f32.mrf.mxu3  ;;  %v749_v8 = vpop.f32.mrf.mxu1 }
 0x290   :  { %v4257_v41 = vadd.f32 %v971_v42, %v839_v28  ;;  %v4259_v51 = vpop.f32.mrf.mxu0  ;;  %v1851_v42 = vld [vmem:[%s5644_s2 + $0x438] sm:$0xff] }
 0x291   :  { %1262 = vmatmul.f32.gmra.mxu1 %v3928_v24  ;;  %v1852_v24 = vld [vmem:[%s5644_s2 + $0x440] sm:$0xff] }
 0x292   :  { %1420 = vmatmul.f32.gmra.mxu2 %v1508_v4  ;;  %1867 = vmatpush.msra.mxu1 %v1852_v24 }
 0x293   :  { %1578 = vmatmul.f32.gmra.mxu3 %v1509_v20  ;;  %1733 = vmatmul.f32.gmra.mxu0 %v1666_v61 }
 0x294   :  { %1868 = vmatpush.msra.mxu1 %v1851_v42 }
 0x295   :  { %v841_v57 = vpop.f32.mrf.mxu2 }
 0x296   :  { %v842_v0 = vadd.f32 %v841_v57, %v749_v8  ;;  %v974_v48 = vpop.f32.mrf.mxu3  ;;  %v752_v62 = vpop.f32.mrf.mxu1  ;;  %v1669_v8 = vld [vmem:[#allocation2 + $0x55] sm:$0xff] }
 0x298   :  { %v4265_v9 = vadd.f32 %v974_v48, %v842_v0  ;;  %v4267_v33 = vpop.f32.mrf.mxu0 }
 0x299   :  { %1265 = vmatmul.f32.gmra.mxu1 %v3935_v13  ;;  %v1511_v13 = vld [vmem:[#allocation2 + $0x54] sm:$0xff] }
 0x29a   :  { %1423 = vmatmul.f32.gmra.mxu2 %v1509_v20 }
 0x29b   :  { %1581 = vmatmul.f32.gmra.mxu3 %v1510_v45  ;;  %1736 = vmatmul.f32.gmra.mxu0 %v1667_v26 }
 0x29d   :  { %v844_v1 = vpop.f32.mrf.mxu2 }
 0x29e   :  { %v845_v15 = vadd.f32 %v844_v1, %v752_v62  ;;  %v977_v59 = vpop.f32.mrf.mxu3  ;;  %v755_v31 = vpop.f32.mrf.mxu1  ;;  %v1513_v62 = vld [vmem:[#allocation2 + $0x64] sm:$0xff] }
 0x2a0   :  { %v4273_v55 = vadd.f32 %v977_v59, %v845_v15  ;;  %v4275_v50 = vpop.f32.mrf.mxu0 }
 0x2a1   :  { %1268 = vmatmul.f32.gmra.mxu1 %v3938_v19  ;;  %v1512_v19 = vld [vmem:[#allocation2 + $0x5c] sm:$0xff] }
 0x2a2   :  { %1426 = vmatmul.f32.gmra.mxu2 %v1510_v45  ;;  %v1670_v45 = vld [vmem:[#allocation2 + $0x5d] sm:$0xff] }
 0x2a3   :  { %1584 = vmatmul.f32.gmra.mxu3 %v1511_v13  ;;  %1739 = vmatmul.f32.gmra.mxu0 %v1668_v2 }
 0x2a5   :  { %v847_v21 = vpop.f32.mrf.mxu2 }
 0x2a6   :  { %v848_v14 = vadd.f32 %v847_v21, %v755_v31  ;;  %v980_v4 = vpop.f32.mrf.mxu3  ;;  %v758_v37 = vpop.f32.mrf.mxu1 }
 0x2a8   :  { %v4278_v44 = vadd.f32 %v980_v4, %v848_v14  ;;  %v4280_v28 = vpop.f32.mrf.mxu0 }
 0x2a9   :  { %1271 = vmatmul.f32.gmra.mxu1 %v3941_v54  ;;  %v1850_v54 = vld [vmem:[%s5644_s2 + $0x430] sm:$0xff] }
 0x2aa   :  { %1429 = vmatmul.f32.gmra.mxu2 %v1511_v13  ;;  %1869 = vmatpush.msra.mxu1 %v1850_v54  ;;  %v1671_v13 = vld [vmem:[#allocation2 + $0x65] sm:$0xff] }
 0x2ab   :  { %1587 = vmatmul.f32.gmra.mxu3 %v1512_v19  ;;  %1742 = vmatmul.f32.gmra.mxu0 %v1669_v8  ;;  %v1515_v8 = vld [vmem:[#allocation2 + $0x74] sm:$0xff] }
 0x2ad   :  { %v850_v58 = vpop.f32.mrf.mxu2 }
 0x2ae   :  { %v851_v20 = vadd.f32 %v850_v58, %v758_v37  ;;  %v983_v61 = vpop.f32.mrf.mxu3  ;;  %v761_v57 = vpop.f32.mrf.mxu1  ;;  %v1672_v58 = vld [vmem:[#allocation2 + $0x6d] sm:$0xff] }
 0x2b0   :  { %v4286_v0 = vadd.f32 %v983_v61, %v851_v20  ;;  %v4288_v48 = vpop.f32.mrf.mxu0 }
 0x2b1   :  { %1274 = vmatmul.f32.gmra.mxu1 %v3952_v18  ;;  %v1514_v18 = vld [vmem:[#allocation2 + $0x6c] sm:$0xff] }
 0x2b2   :  { %1432 = vmatmul.f32.gmra.mxu2 %v1512_v19  ;;  %v3081_v19 = vld [vmem:[#allocation2 + $0x6b] sm:$0xff] }
 0x2b3   :  { %1590 = vmatmul.f32.gmra.mxu3 %v1513_v62  ;;  %1745 = vmatmul.f32.gmra.mxu0 %v1670_v45 }
 0x2b5   :  { %v853_v26 = vpop.f32.mrf.mxu2 }
 0x2b6   :  { %v854_v24 = vadd.f32 %v853_v26, %v761_v57  ;;  %v986_v1 = vpop.f32.mrf.mxu3  ;;  %v764_v15 = vpop.f32.mrf.mxu1  ;;  %v3082_v26 = vld [vmem:[#allocation2 + $0x73] sm:$0xff] }
 0x2b8   :  { %v4294_v59 = vadd.f32 %v986_v1, %v854_v24  ;;  %v4296_v31 = vpop.f32.mrf.mxu0  ;;  %v1516_v24 = vld [vmem:[#allocation2 + $0x7c] sm:$0xff] }
 0x2b9   :  { %1277 = vmatmul.f32.gmra.mxu1 %v3975_v7  ;;  %v1849_v7 = vld [vmem:[%s5644_s2 + $0x428] sm:$0xff]  ;;  %v1673_v1 = vld [vmem:[#allocation2 + $0x75] sm:$0xff] }
 0x2ba   :  { %1435 = vmatmul.f32.gmra.mxu2 %v1513_v62  ;;  %1870 = vmatpush.msra.mxu1 %v1849_v7 }
 0x2bb   :  { %1593 = vmatmul.f32.gmra.mxu3 %v1514_v18  ;;  %1748 = vmatmul.f32.gmra.mxu0 %v1671_v13 }
 0x2bd   :  { %v856_v2 = vpop.f32.mrf.mxu2 }
 0x2be   :  { %v857_v21 = vadd.f32 %v856_v2, %v764_v15  ;;  %v989_v14 = vpop.f32.mrf.mxu3  ;;  %v767_v4 = vpop.f32.mrf.mxu1  ;;  %v1848_v15 = vld [vmem:[%s5644_s2 + $0x420] sm:$0xff] }
 0x2bf   :  { %1871 = vmatpush.msra.mxu1 %v1848_v15  ;;  %v1518_v15 = vld [vmem:[#allocation2 + $0x8c] sm:$0xff] }
 0x2c0   :  { %v4299_v37 = vadd.f32 %v989_v14, %v857_v21  ;;  %v4301_v42 = vpop.f32.mrf.mxu0 }
 0x2c1   :  { %1280 = vmatmul.f32.gmra.mxu1 %v3081_v19  ;;  %v3083_v19 = vld [vmem:[#allocation2 + $0x7b] sm:$0xff] }
 0x2c2   :  { %1438 = vmatmul.f32.gmra.mxu2 %v1514_v18 }
 0x2c3   :  { %1596 = vmatmul.f32.gmra.mxu3 %v1515_v8  ;;  %1751 = vmatmul.f32.gmra.mxu0 %v1672_v58  ;;  %v1674_v58 = vld [vmem:[#allocation2 + $0x7d] sm:$0xff] }
 0x2c5   :  { %v859_v20 = vpop.f32.mrf.mxu2 }
 0x2c6   :  { %v860_v61 = vadd.f32 %v859_v20, %v767_v4  ;;  %v992_v57 = vpop.f32.mrf.mxu3  ;;  %v770_v62 = vpop.f32.mrf.mxu1 }
 0x2c8   :  { %v4306_v45 = vadd.f32 %v992_v57, %v860_v61  ;;  %v4308_v54 = vpop.f32.mrf.mxu0 }
 0x2c9   :  { %1283 = vmatmul.f32.gmra.mxu1 %v3082_v26 }
 0x2ca   :  { %1441 = vmatmul.f32.gmra.mxu2 %v1515_v8  ;;  %v1517_v8 = vld [vmem:[#allocation2 + $0x84] sm:$0xff] }
 0x2cb   :  { %1599 = vmatmul.f32.gmra.mxu3 %v1516_v24  ;;  %1754 = vmatmul.f32.gmra.mxu0 %v1673_v1  ;;  %v3084_v1 = vld [vmem:[#allocation2 + $0x83] sm:$0xff] }
 0x2cd   :  { %v862_v18 = vpop.f32.mrf.mxu2 }
 0x2ce   :  { %v863_v13 = vadd.f32 %v862_v18, %v770_v62  ;;  %v995_v2 = vpop.f32.mrf.mxu3  ;;  %v773_v21 = vpop.f32.mrf.mxu1  ;;  %v1675_v18 = vld [vmem:[#allocation2 + $0x85] sm:$0xff] }
 0x2d0   :  { %v4313_v14 = vadd.f32 %v995_v2, %v863_v13  ;;  %v4315_v4 = vpop.f32.mrf.mxu0  ;;  %v797_v13 = vadd.f32 %v4022_v3, %v4020_v43 }
 0x2d1   :  { %1286 = vmatmul.f32.gmra.mxu1 %v3083_v19 }
 0x2d2   :  { %1444 = vmatmul.f32.gmra.mxu2 %v1516_v24  ;;  %v1847_v24 = vld [vmem:[%s5644_s2 + $0x418] sm:$0xff] }
 0x2d3   :  { %1602 = vmatmul.f32.gmra.mxu3 %v1517_v8  ;;  %1757 = vmatmul.f32.gmra.mxu0 %v1674_v58 }
 0x2d4   :  { %1872 = vmatpush.msra.mxu1 %v1847_v24 }
 0x2d5   :  { %v865_v7 = vpop.f32.mrf.mxu2 }
 0x2d6   :  { %v866_v20 = vadd.f32 %v865_v7, %v773_v21  ;;  %v998_v61 = vpop.f32.mrf.mxu3  ;;  %v776_v57 = vpop.f32.mrf.mxu1  ;;  %v1004_v7 = vadd.f32 %v4024_v5, %v797_v13  ;;  %v1204_v13 = vld [vmem:[#allocation2 + $0x93] sm:$0xff] }
 0x2d8   :  { %v4317_v26 = vadd.f32 %v998_v61, %v866_v20  ;;  %v4319_v62 = vpop.f32.mrf.mxu0  ;;  %v1162_v61 = vadd.f32 %v4026_v40, %v1004_v7  ;;  %v1846_v40 = vld [vmem:[%s5644_s2 + $0x410] sm:$0xff] }
 0x2d9   :  { %5707 = vst [vmem:[#allocation4_spill] sm:$0xff] %v4319_v62  ;;  %1289 = vmatmul.f32.gmra.mxu1 %v3084_v1  ;;  %v3085_v1 = vld [vmem:[#allocation2 + $0x8b] sm:$0xff] }
 0x2da   :  { %5706 = vst [vmem:[#allocation3_spill] sm:$0xff] %v4317_v26  ;;  %1447 = vmatmul.f32.gmra.mxu2 %v1517_v8  ;;  %v1676_v62 = vld [vmem:[#allocation2 + $0x8d] sm:$0xff]  ;;  %1873 = vmatpush.msra.mxu1 %v1846_v40  ;;  %v3086_v40 = vld [vmem:[#allocation2 + $0x9b] sm:$0xff] }
 0x2db   :  { %1605 = vmatmul.f32.gmra.mxu3 %v1518_v15  ;;  %1760 = vmatmul.f32.gmra.mxu0 %v1675_v18  ;;  %v1519_v18 = vld [vmem:[#allocation2 + $0x94] sm:$0xff] }
 0x2dd   :  { %v868_v2 = vpop.f32.mrf.mxu2 }
 0x2de   :  { %v869_v21 = vadd.f32 %v868_v2, %v776_v57  ;;  %v1001_v19 = vpop.f32.mrf.mxu3  ;;  %v1245_v58 = vpop.f32.mrf.mxu1 }
 0x2df   :  { %v1320_v43 = vadd.f32 %v1245_v58, %v1162_v61 }
 0x2e0   :  { %v4327_v20 = vadd.f32 %v1001_v19, %v869_v21  ;;  %v4329_v8 = vpop.f32.mrf.mxu0  ;;  %v1677_v21 = vld [vmem:[#allocation2 + $0x95] sm:$0xff] }
 0x2e1   :  { %1292 = vmatmul.f32.gmra.mxu1 %v3085_v1  ;;  %v2679_v19 = vld [vmem:[%s5647_s4 + $0x78] sm:$0xff] }
 0x2e2   :  { %1450 = vmatmul.f32.gmra.mxu2 %v1518_v15  ;;  %v1163_v15 = vadd.f32 %v4039_v35, %v4037_v32  ;;  %2680 = vmatpush.msra.mxu3 %v2679_v19  ;;  %v2678_v32 = vld [vmem:[%s5647_s4 + $0x70] sm:$0xff]  ;;  %v1521_v35 = vld [vmem:[#allocation2 + $0xa4] sm:$0xff] }
 0x2e3   :  { %1608 = vmatmul.f32.gmra.mxu3 %v1519_v18  ;;  %1763 = vmatmul.f32.gmra.mxu0 %v1676_v62  ;;  %v1520_v62 = vld [vmem:[#allocation2 + $0x9c] sm:$0xff] }
 0x2e4   :  { %2681 = vmatpush.msra.mxu3 %v2678_v32  ;;  %v3087_v32 = vld [vmem:[#allocation2 + $0xa3] sm:$0xff] }
 0x2e5   :  { %v1403_v3 = vpop.f32.mrf.mxu2 }
 0x2e6   :  { %v1478_v57 = vadd.f32 %v1403_v3, %v1320_v43  ;;  %v1561_v24 = vpop.f32.mrf.mxu3  ;;  %v1248_v2 = vpop.f32.mrf.mxu1 }
 0x2e7   :  { %v1321_v58 = vadd.f32 %v1248_v2, %v1163_v15  ;;  %v1678_v2 = vld [vmem:[#allocation2 + $0x9d] sm:$0xff]  ;;  %v1845_v15 = vld [vmem:[%s5644_s2 + $0x408] sm:$0xff] }
 0x2e8   :  { %v4332_v26 = vadd.f32 %v1561_v24, %v1478_v57  ;;  %v4334_v5 = vpop.f32.mrf.mxu0  ;;  %1874 = vmatpush.msra.mxu1 %v1845_v15 }
 0x2e9   :  { %1295 = vmatmul.f32.gmra.mxu1 %v1204_v13  ;;  %v2677_v13 = vld [vmem:[%s5647_s4 + $0x68] sm:$0xff] }
 0x2ea   :  { %1453 = vmatmul.f32.gmra.mxu2 %v1519_v18  ;;  %v1164_v18 = vadd.f32 %v4073_v25, %v4071_v10  ;;  %v2676_v10 = vld [vmem:[%s5647_s4 + $0x60] sm:$0xff]  ;;  %2682 = vmatpush.msra.mxu3 %v2677_v13 }
 0x2eb   :  { %1611 = vmatmul.f32.gmra.mxu3 %v1520_v62  ;;  %1766 = vmatmul.f32.gmra.mxu0 %v1677_v21 }
 0x2ec   :  { %2683 = vmatpush.msra.mxu3 %v2676_v10 }
 0x2ed   :  { %v1406_v7 = vpop.f32.mrf.mxu2 }
 0x2ee   :  { %v1479_v61 = vadd.f32 %v1406_v7, %v1321_v58  ;;  %v1564_v1 = vpop.f32.mrf.mxu3  ;;  %v1251_v43 = vpop.f32.mrf.mxu1 }
 0x2ef   :  { %v1322_v25 = vadd.f32 %v1251_v43, %v1164_v18  ;;  %v1165_v43 = vadd.f32 %v4107_v11, %v4105_v47  ;;  %v1522_v18 = vld [vmem:[#allocation2 + $0xac] sm:$0xff]  ;;  %v2672_v47 = vld [vmem:[%s5647_s4 + $0x40] sm:$0xff] }
 0x2f0   :  { %v1637_v3 = vadd.f32 %v1564_v1, %v1479_v61  ;;  %v1722_v57 = vpop.f32.mrf.mxu0 }
 0x2f1   :  { %1298 = vmatmul.f32.gmra.mxu1 %v3086_v40  ;;  %v1679_v40 = vld [vmem:[#allocation2 + $0xa5] sm:$0xff] }
 0x2f2   :  { %v4349_v24 = vadd.f32 %v1722_v57, %v1637_v3  ;;  %1456 = vmatmul.f32.gmra.mxu2 %v1520_v62  ;;  %v2675_v62 = vld [vmem:[%s5647_s4 + $0x58] sm:$0xff]  ;;  %v2674_v3 = vld [vmem:[%s5647_s4 + $0x50] sm:$0xff] }
 0x2f3   :  { %1614 = vmatmul.f32.gmra.mxu3 %v1521_v35  ;;  %1769 = vmatmul.f32.gmra.mxu0 %v1678_v2  ;;  %v2673_v2 = vld [vmem:[%s5647_s4 + $0x48] sm:$0xff] }
 0x2f4   :  { %2684 = vmatpush.msra.mxu3 %v2675_v62  ;;  %v1844_v62 = vld [vmem:[%s5644_s2 + $0x400] sm:$0xff] }
 0x2f5   :  { %v1409_v21 = vpop.f32.mrf.mxu2  ;;  %1875 = vmatpush.msra.mxu1 %v1844_v62  ;;  %v2667_v62 = vld [vmem:[%s5647_s4 + $0x18] sm:$0xff] }
 0x2f6   :  { %v1480_v19 = vadd.f32 %v1409_v21, %v1322_v25  ;;  %v1567_v58 = vpop.f32.mrf.mxu3  ;;  %v1254_v7 = vpop.f32.mrf.mxu1  ;;  %2685 = vmatpush.msra.mxu3 %v2674_v3  ;;  %v1680_v3 = vld [vmem:[#allocation2 + $0xad] sm:$0xff] }
 0x2f7   :  { %v1323_v13 = vadd.f32 %v1254_v7, %v1165_v43  ;;  %v1166_v7 = vadd.f32 %v4141_v63, %v4139_v46  ;;  %v2670_v43 = vld [vmem:[%s5647_s4 + $0x30] sm:$0xff] }
 0x2f8   :  { %v1638_v61 = vadd.f32 %v1567_v58, %v1480_v19  ;;  %v1725_v1 = vpop.f32.mrf.mxu0  ;;  %2686 = vmatpush.msra.mxu3 %v2673_v2  ;;  %v1207_v19 = vld [vmem:[#allocation2 + $0xab] sm:$0xff]  ;;  %v2671_v58 = vld [vmem:[%s5647_s4 + $0x38] sm:$0xff] }
 0x2f9   :  { %1301 = vmatmul.f32.gmra.mxu1 %v3087_v32  ;;  %v2669_v2 = vld [vmem:[%s5647_s4 + $0x28] sm:$0xff] }
 0x2fa   :  { %v4368_v57 = vadd.f32 %v1725_v1, %v1638_v61  ;;  %1459 = vmatmul.f32.gmra.mxu2 %v1521_v35  ;;  %2687 = vmatpush.msra.mxu3 %v2672_v47  ;;  %v1523_v1 = vld [vmem:[#allocation2 + $0xb4] sm:$0xff]  ;;  %v2668_v47 = vld [vmem:[%s5647_s4 + $0x20] sm:$0xff] }
 0x2fb   :  { %1617 = vmatmul.f32.gmra.mxu3 %v1522_v18  ;;  %1772 = vmatmul.f32.gmra.mxu0 %v1679_v40 }
 0x2fc   :  { %2688 = vmatpush.msra.mxu3 %v2671_v58 }
 0x2fd   :  { %v1412_v15 = vpop.f32.mrf.mxu2 }
 0x2fe   :  { %v1481_v11 = vadd.f32 %v1412_v15, %v1323_v13  ;;  %v1570_v10 = vpop.f32.mrf.mxu3  ;;  %v1257_v25 = vpop.f32.mrf.mxu1  ;;  %2689 = vmatpush.msra.mxu3 %v2670_v43 }
 0x2ff   :  { %v1324_v32 = vadd.f32 %v1257_v25, %v1166_v7  ;;  %v3088_v25 = vld [vmem:[#allocation2 + $0xb3] sm:$0xff] }
 0x300   :  { %v1639_v35 = vadd.f32 %v1570_v10, %v1481_v11  ;;  %v1728_v21 = vpop.f32.mrf.mxu0  ;;  %2690 = vmatpush.msra.mxu3 %v2669_v2  ;;  %v1167_v11 = vadd.f32 %v4175_v12, %v4173_v39  ;;  %v2666_v39 = vld [vmem:[%s5647_s4 + $0x10] sm:$0xff] }
 0x301   :  { %1304 = vmatmul.f32.gmra.mxu1 %v1207_v19 }
 0x302   :  { %v4384_v61 = vadd.f32 %v1728_v21, %v1639_v35  ;;  %1462 = vmatmul.f32.gmra.mxu2 %v1522_v18  ;;  %v1524_v35 = vld [vmem:[#allocation2 + $0xbc] sm:$0xff]  ;;  %2691 = vmatpush.msra.mxu3 %v2668_v47 }
 0x303   :  { %1620 = vmatmul.f32.gmra.mxu3 %v1523_v1  ;;  %1775 = vmatmul.f32.gmra.mxu0 %v1680_v3  ;;  %v1681_v21 = vld [vmem:[#allocation2 + $0xb5] sm:$0xff] }
 0x304   :  { %2692 = vmatpush.msra.mxu3 %v2667_v62  ;;  %v1210_v62 = vld [vmem:[#allocation2 + $0xc3] sm:$0xff] }
 0x305   :  { %v1415_v40 = vpop.f32.mrf.mxu2 }
 0x306   :  { %v1482_v46 = vadd.f32 %v1415_v40, %v1324_v32  ;;  %v1573_v63 = vpop.f32.mrf.mxu3  ;;  %v1260_v13 = vpop.f32.mrf.mxu1  ;;  %2693 = vmatpush.msra.mxu3 %v2666_v39  ;;  %v2665_v32 = vld [vmem:[%s5647_s4 + $0x8] sm:$0xff]  ;;  %v1168_v40 = vadd.f32 %v4200_v38, %v4198_v49 }
 0x307   :  { %v1325_v19 = vadd.f32 %v1260_v13, %v1167_v11  ;;  %v1682_v13 = vld [vmem:[#allocation2 + $0xbd] sm:$0xff]  ;;  %v1683_v39 = vld [vmem:[#allocation2 + $0xc5] sm:$0xff] }
 0x308   :  { %v1640_v18 = vadd.f32 %v1573_v63, %v1482_v46  ;;  %v1731_v15 = vpop.f32.mrf.mxu0  ;;  %v3089_v46 = vld [vmem:[#allocation2 + $0xbb] sm:$0xff]  ;;  %v1525_v63 = vld [vmem:[#allocation2 + $0xc4] sm:$0xff]  ;;  %2694 = vmatpush.msra.mxu3 %v2665_v32 }
 0x309   :  { %1307 = vmatmul.f32.gmra.mxu1 %v3088_v25 }
 0x30a   :  { %v4397_v10 = vadd.f32 %v1731_v15, %v1640_v18  ;;  %1465 = vmatmul.f32.gmra.mxu2 %v1523_v1  ;;  %v2664_v18 = vld [vmem:[%s5647_s4] sm:$0xff] }
 0x30b   :  { %1623 = vmatmul.f32.gmra.mxu3 %v1524_v35  ;;  %1778 = vmatmul.f32.gmra.mxu0 %v1681_v21 }
 0x30c   :  { %2695 = vmatpush.msra.mxu3 %v2664_v18 }
 0x30d   :  { %v1418_v58 = vpop.f32.mrf.mxu2 }
 0x30e   :  { %v1483_v12 = vadd.f32 %v1418_v58, %v1325_v19  ;;  %v1576_v7 = vpop.f32.mrf.mxu3  ;;  %v1263_v3 = vpop.f32.mrf.mxu1  ;;  %v1526_v58 = vld [vmem:[#allocation2 + $0xcc] sm:$0xff] }
 0x30f   :  { %v1326_v15 = vadd.f32 %v1263_v3, %v1168_v40 }
 0x310   :  { %v1641_v1 = vadd.f32 %v1576_v7, %v1483_v12  ;;  %v1734_v43 = vpop.f32.mrf.mxu0 }
 0x311   :  { %1310 = vmatmul.f32.gmra.mxu1 %v3089_v46  ;;  %v1527_v46 = vld [vmem:[#allocation2 + $0xd4] sm:$0xff] }
 0x312   :  { %v4410_v2 = vadd.f32 %v1734_v43, %v1641_v1  ;;  %1468 = vmatmul.f32.gmra.mxu2 %v1524_v35  ;;  %v1169_v35 = vadd.f32 %v4213_v29, %v4211_v60  ;;  %v1170_v60 = vadd.f32 %v4220_v36, %v4218_v22  ;;  %v3090_v36 = vld [vmem:[%s5641_s0] sm:$0xff] }
 0x313   :  { %1626 = vmatmul.f32.gmra.mxu3 %v1525_v63  ;;  %1781 = vmatmul.f32.gmra.mxu0 %v1682_v13  ;;  %v1211_v13 = vld [vmem:[#allocation2 + $0xcb] sm:$0xff] }
 0x315   :  { %v1421_v47 = vpop.f32.mrf.mxu2 }
 0x316   :  { %v1484_v11 = vadd.f32 %v1421_v47, %v1326_v15  ;;  %v1579_v25 = vpop.f32.mrf.mxu3  ;;  %v1266_v49 = vpop.f32.mrf.mxu1 }
 0x317   :  { %v1327_v12 = vadd.f32 %v1266_v49, %v1169_v35  ;;  %v1171_v35 = vadd.f32 %v4225_v17, %v4223_v27  ;;  %v1172_v27 = vadd.f32 %v4233_v30, %v4231_v56  ;;  %v3092_v30 = vld [vmem:[%s5641_s0 + $0x10] sm:$0xff] }
 0x318   :  { %v1642_v38 = vadd.f32 %v1579_v25, %v1484_v11  ;;  %v1737_v21 = vpop.f32.mrf.mxu0 }
 0x319   :  { %1313 = vmatmul.f32.gmra.mxu1 %v1210_v62  ;;  %v1819_v62 = vld [vmem:[#allocation2 + $0x16] sm:$0xff] }
 0x31a   :  { %v4417_v19 = vadd.f32 %v1737_v21, %v1642_v38  ;;  %1471 = vmatmul.f32.gmra.mxu2 %v1525_v63  ;;  %v1684_v63 = vld [vmem:[#allocation2 + $0xcd] sm:$0xff]  ;;  %v1685_v21 = vld [vmem:[#allocation2 + $0xd5] sm:$0xff] }
 0x31b   :  { %1629 = vmatmul.f32.gmra.mxu3 %v1526_v58  ;;  %1784 = vmatmul.f32.gmra.mxu0 %v1683_v39 }
 0x31d   :  { %v1424_v7 = vpop.f32.mrf.mxu2 }
 0x31e   :  { %v1485_v3 = vadd.f32 %v1424_v7, %v1327_v12  ;;  %v1582_v1 = vpop.f32.mrf.mxu3  ;;  %v1269_v43 = vpop.f32.mrf.mxu1 }
 0x31f   :  { %v1328_v18 = vadd.f32 %v1269_v43, %v1170_v60 }
 0x320   :  { %v1643_v32 = vadd.f32 %v1582_v1, %v1485_v3  ;;  %v1740_v40 = vpop.f32.mrf.mxu0 }
 0x321   :  { %1316 = vmatmul.f32.gmra.mxu1 %v1211_v13 }
 0x322   :  { %v4421_v29 = vadd.f32 %v1740_v40, %v1643_v32  ;;  %1474 = vmatmul.f32.gmra.mxu2 %v1526_v58  ;;  %v1820_v32 = vld [vmem:[#allocation2 + $0x1e] sm:$0xff]  ;;  %v3091_v40 = vld [vmem:[%s5641_s0 + $0x8] sm:$0xff] }
 0x323   :  { %1632 = vmatmul.f32.gmra.mxu3 %v1527_v46  ;;  %1787 = vmatmul.f32.gmra.mxu0 %v1684_v63 }
 0x325   :  { %v1427_v15 = vpop.f32.mrf.mxu2 }
 0x326   :  { %v1486_v47 = vadd.f32 %v1427_v15, %v1328_v18  ;;  %v1585_v11 = vpop.f32.mrf.mxu3  ;;  %v1272_v25 = vpop.f32.mrf.mxu1 }
 0x327   :  { %v1329_v58 = vadd.f32 %v1272_v25, %v1171_v35  ;;  %v1173_v25 = vadd.f32 %v4241_v53, %v4239_v34  ;;  %v3093_v53 = vld [vmem:[%s5641_s0 + $0x18] sm:$0xff] }
 0x328   :  { %v1644_v49 = vadd.f32 %v1585_v11, %v1486_v47  ;;  %v1743_v38 = vpop.f32.mrf.mxu0  ;;  %v1821_v11 = vld [vmem:[#allocation2 + $0x26] sm:$0xff] }
 0x329   :  { %1876 = vmatmul.f32.vlgmr.msra.gmra.mxu1 %v1819_v62 }
 0x32a   :  { %v4425_v22 = vadd.f32 %v1743_v38, %v1644_v49 }
 0x32b   :  { %2696 = vmatmul.f32.vlgmr.msra.gmra.mxu3 %v3090_v36  ;;  %1790 = vmatmul.f32.gmra.mxu0 %v1685_v21 }
 0x32d   :  { %v1430_v39 = vpop.f32.mrf.mxu2 }
 0x32e   :  { %v1487_v12 = vadd.f32 %v1430_v39, %v1329_v58  ;;  %v1588_v7 = vpop.f32.mrf.mxu3  ;;  %v1275_v3 = vpop.f32.mrf.mxu1  ;;  %v1822_v39 = vld [vmem:[#allocation2 + $0x2e] sm:$0xff] }
 0x32f   :  { %v1330_v46 = vadd.f32 %v1275_v3, %v1172_v27 }
 0x330   :  { %v1645_v1 = vadd.f32 %v1588_v7, %v1487_v12  ;;  %v1746_v43 = vpop.f32.mrf.mxu0  ;;  %v1174_v12 = vadd.f32 %v4246_v52, %v4244_v6  ;;  %v3094_v52 = vld [vmem:[%s5641_s0 + $0x20] sm:$0xff] }
 0x331   :  { %1879 = vmatmul.f32.gmra.mxu1 %v1820_v32 }
 0x332   :  { %v4432_v17 = vadd.f32 %v1746_v43, %v1645_v1 }
 0x333   :  { %2699 = vmatmul.f32.gmra.mxu3 %v3091_v40 }
 0x335   :  { %v1433_v13 = vpop.f32.mrf.mxu2 }
 0x336   :  { %v1488_v60 = vadd.f32 %v1433_v13, %v1330_v46  ;;  %v1591_v63 = vpop.f32.mrf.mxu3  ;;  %v1278_v18 = vpop.f32.mrf.mxu1  ;;  %v1823_v46 = vld [vmem:[#allocation2 + $0x36] sm:$0xff]  ;;  %v1175_v13 = vadd.f32 %v4254_v23, %v4252_v16  ;;  %v3095_v23 = vld [vmem:[%s5641_s0 + $0x28] sm:$0xff] }
 0x337   :  { %v1331_v49 = vadd.f32 %v1278_v18, %v1173_v25 }
 0x338   :  { %v1646_v15 = vadd.f32 %v1591_v63, %v1488_v60  ;;  %v1749_v47 = vpop.f32.mrf.mxu0 }
 0x339   :  { %1882 = vmatmul.f32.gmra.mxu1 %v1821_v11 }
 0x33a   :  { %v4439_v56 = vadd.f32 %v1749_v47, %v1646_v15 }
 0x33b   :  { %2702 = vmatmul.f32.gmra.mxu3 %v3092_v30  ;;  %v1824_v30 = vld [vmem:[#allocation2 + $0x3e] sm:$0xff] }
 0x33d   :  { %v1436_v38 = vpop.f32.mrf.mxu2 }
 0x33e   :  { %v1489_v21 = vadd.f32 %v1436_v38, %v1331_v49  ;;  %v1594_v62 = vpop.f32.mrf.mxu3  ;;  %v1281_v35 = vpop.f32.mrf.mxu1  ;;  %v1176_v49 = vadd.f32 %v4259_v51, %v4257_v41  ;;  %v3096_v41 = vld [vmem:[%s5641_s0 + $0x30] sm:$0xff] }
 0x33f   :  { %v1332_v7 = vadd.f32 %v1281_v35, %v1174_v12  ;;  %v1177_v12 = vadd.f32 %v4267_v33, %v4265_v9  ;;  %v3097_v9 = vld [vmem:[%s5641_s0 + $0x38] sm:$0xff] }
 0x340   :  { %v1647_v36 = vadd.f32 %v1594_v62, %v1489_v21  ;;  %v1752_v58 = vpop.f32.mrf.mxu0 }
 0x341   :  { %1885 = vmatmul.f32.gmra.mxu1 %v1822_v39  ;;  %v1825_v39 = vld [vmem:[#allocation2 + $0x46] sm:$0xff] }
 0x342   :  { %v4446_v34 = vadd.f32 %v1752_v58, %v1647_v36 }
 0x343   :  { %2705 = vmatmul.f32.gmra.mxu3 %v3093_v53 }
 0x345   :  { %v1439_v3 = vpop.f32.mrf.mxu2 }
 0x346   :  { %v1490_v1 = vadd.f32 %v1439_v3, %v1332_v7  ;;  %v1597_v43 = vpop.f32.mrf.mxu3  ;;  %v1284_v32 = vpop.f32.mrf.mxu1 }
 0x347   :  { %v1333_v60 = vadd.f32 %v1284_v32, %v1175_v13  ;;  %v1826_v32 = vld [vmem:[#allocation2 + $0x4e] sm:$0xff] }
 0x348   :  { %v1648_v27 = vadd.f32 %v1597_v43, %v1490_v1  ;;  %v1755_v40 = vpop.f32.mrf.mxu0 }
 0x349   :  { %1888 = vmatmul.f32.gmra.mxu1 %v1823_v46 }
 0x34a   :  { %v4453_v6 = vadd.f32 %v1755_v40, %v1648_v27  ;;  %v1178_v27 = vadd.f32 %v4275_v50, %v4273_v55  ;;  %v3098_v55 = vld [vmem:[%s5641_s0 + $0x40] sm:$0xff] }
 0x34b   :  { %2708 = vmatmul.f32.gmra.mxu3 %v3094_v52 }
 0x34d   :  { %v1442_v63 = vpop.f32.mrf.mxu2 }
 0x34e   :  { %v1491_v18 = vadd.f32 %v1442_v63, %v1333_v60  ;;  %v1600_v15 = vpop.f32.mrf.mxu3  ;;  %v1287_v47 = vpop.f32.mrf.mxu1  ;;  %v1827_v63 = vld [vmem:[#allocation2 + $0x56] sm:$0xff] }
 0x34f   :  { %v1334_v38 = vadd.f32 %v1287_v47, %v1176_v49  ;;  %v1828_v49 = vld [vmem:[#allocation2 + $0x5e] sm:$0xff] }
 0x350   :  { %v1649_v11 = vadd.f32 %v1600_v15, %v1491_v18  ;;  %v1758_v25 = vpop.f32.mrf.mxu0  ;;  %v1179_v18 = vadd.f32 %v4280_v28, %v4278_v44  ;;  %v3099_v44 = vld [vmem:[%s5641_s0 + $0x48] sm:$0xff] }
 0x351   :  { %1891 = vmatmul.f32.gmra.mxu1 %v1824_v30 }
 0x352   :  { %v4460_v16 = vadd.f32 %v1758_v25, %v1649_v11 }
 0x353   :  { %2711 = vmatmul.f32.gmra.mxu3 %v3095_v23  ;;  %v1180_v23 = vadd.f32 %v4288_v48, %v4286_v0  ;;  %v3100_v0 = vld [vmem:[%s5641_s0 + $0x50] sm:$0xff] }
 0x355   :  { %v1445_v21 = vpop.f32.mrf.mxu2 }
 0x356   :  { %v1492_v62 = vadd.f32 %v1445_v21, %v1334_v38  ;;  %v1603_v35 = vpop.f32.mrf.mxu3  ;;  %v1290_v36 = vpop.f32.mrf.mxu1 }
 0x357   :  { %v1335_v51 = vadd.f32 %v1290_v36, %v1177_v12  ;;  %v1181_v12 = vadd.f32 %v4296_v31, %v4294_v59  ;;  %v3101_v59 = vld [vmem:[%s5641_s0 + $0x58] sm:$0xff] }
 0x358   :  { %v4465_v58 = vadd.f32 %v1603_v35, %v1492_v62 }
 0x359   :  { %1894 = vmatmul.f32.gmra.mxu1 %v1825_v39  ;;  %v1829_v39 = vld [vmem:[#allocation2 + $0x66] sm:$0xff] }
 0x35b   :  { %2714 = vmatmul.f32.gmra.mxu3 %v3096_v41 }
 0x35d   :  { %v1448_v53 = vpop.f32.mrf.mxu2 }
 0x35e   :  { %v1493_v7 = vadd.f32 %v1448_v53, %v1335_v51  ;;  %v1606_v3 = vpop.f32.mrf.mxu3  ;;  %v1293_v1 = vpop.f32.mrf.mxu1 }
 0x35f   :  { %v1336_v33 = vadd.f32 %v1293_v1, %v1178_v27  ;;  %v1830_v1 = vld [vmem:[#allocation2 + $0x6e] sm:$0xff] }
 0x360   :  { %v4472_v43 = vadd.f32 %v1606_v3, %v1493_v7 }
 0x361   :  { %1897 = vmatmul.f32.gmra.mxu1 %v1826_v32  ;;  %v1182_v32 = vadd.f32 %v4301_v42, %v4299_v37  ;;  %v3102_v37 = vld [vmem:[%s5641_s0 + $0x60] sm:$0xff] }
 0x363   :  { %2717 = vmatmul.f32.gmra.mxu3 %v3097_v9 }
 0x365   :  { %v1451_v40 = vpop.f32.mrf.mxu2 }
 0x366   :  { %v1494_v46 = vadd.f32 %v1451_v40, %v1336_v33  ;;  %v1609_v13 = vpop.f32.mrf.mxu3  ;;  %v1296_v52 = vpop.f32.mrf.mxu1 }
 0x367   :  { %v1337_v50 = vadd.f32 %v1296_v52, %v1179_v18  ;;  %v1183_v52 = vadd.f32 %v4308_v54, %v4306_v45  ;;  %v3103_v45 = vld [vmem:[%s5641_s0 + $0x68] sm:$0xff] }
 0x368   :  { %v4479_v60 = vadd.f32 %v1609_v13, %v1494_v46  ;;  %v1831_v13 = vld [vmem:[#allocation2 + $0x76] sm:$0xff] }
 0x369   :  { %1900 = vmatmul.f32.gmra.mxu1 %v1827_v63 }
 0x36b   :  { %2720 = vmatmul.f32.gmra.mxu3 %v3098_v55 }
 0x36d   :  { %v1454_v15 = vpop.f32.mrf.mxu2 }
 0x36e   :  { %v1495_v47 = vadd.f32 %v1454_v15, %v1337_v50  ;;  %v1612_v11 = vpop.f32.mrf.mxu3  ;;  %v1299_v25 = vpop.f32.mrf.mxu1 }
 0x36f   :  { %v1338_v28 = vadd.f32 %v1299_v25, %v1180_v23 }
 0x370   :  { %v4486_v30 = vadd.f32 %v1612_v11, %v1495_v47  ;;  %v1832_v47 = vld [vmem:[#allocation2 + $0x7e] sm:$0xff]  ;;  %v1184_v11 = vadd.f32 %v4315_v4, %v4313_v14  ;;  %v3104_v14 = vld [vmem:[%s5641_s0 + $0x70] sm:$0xff] }
 0x371   :  { %1903 = vmatmul.f32.gmra.mxu1 %v1828_v49 }
 0x373   :  { %2723 = vmatmul.f32.gmra.mxu3 %v3099_v44 }
 0x375   :  { %v1457_v38 = vpop.f32.mrf.mxu2 }
 0x376   :  { %v1496_v21 = vadd.f32 %v1457_v38, %v1338_v28  ;;  %v1615_v62 = vpop.f32.mrf.mxu3  ;;  %v1302_v35 = vpop.f32.mrf.mxu1  ;;  %v1833_v38 = vld [vmem:[#allocation2 + $0x86] sm:$0xff] }
 0x377   :  { %v1339_v48 = vadd.f32 %v1302_v35, %v1181_v12 }
 0x378   :  { %v4493_v36 = vadd.f32 %v1615_v62, %v1496_v21  ;;  %v5708_v21 = vld [vmem:[#allocation3_spill] sm:$0xff]  ;;  %v5709_v62 = vld [vmem:[#allocation4_spill] sm:$0xff] }
 0x379   :  { %1906 = vmatmul.f32.gmra.mxu1 %v1829_v39  ;;  %v1185_v35 = vadd.f32 %v5709_v62, %v5708_v21 }
 0x37b   :  { %2726 = vmatmul.f32.gmra.mxu3 %v3100_v0 }
 0x37d   :  { %v1460_v41 = vpop.f32.mrf.mxu2 }
 0x37e   :  { %v1497_v51 = vadd.f32 %v1460_v41, %v1339_v48  ;;  %v1618_v53 = vpop.f32.mrf.mxu3  ;;  %v1305_v7 = vpop.f32.mrf.mxu1 }
 0x37f   :  { %v1340_v31 = vadd.f32 %v1305_v7, %v1182_v32  ;;  %v3105_v7 = vld [vmem:[%s5641_s0 + $0x78] sm:$0xff] }
 0x380   :  { %v4500_v3 = vadd.f32 %v1618_v53, %v1497_v51  ;;  %v1834_v51 = vld [vmem:[#allocation2 + $0x8e] sm:$0xff]  ;;  %v1186_v53 = vadd.f32 %v4329_v8, %v4327_v20  ;;  %v3106_v20 = vld [vmem:[%s5641_s0 + $0x80] sm:$0xff] }
 0x381   :  { %1909 = vmatmul.f32.gmra.mxu1 %v1830_v1 }
 0x383   :  { %2729 = vmatmul.f32.gmra.mxu3 %v3101_v59 }
 0x385   :  { %v1463_v27 = vpop.f32.mrf.mxu2 }
 0x386   :  { %v1498_v9 = vadd.f32 %v1463_v27, %v1340_v31  ;;  %v1621_v33 = vpop.f32.mrf.mxu3  ;;  %v1308_v40 = vpop.f32.mrf.mxu1 }
 0x387   :  { %v1341_v42 = vadd.f32 %v1308_v40, %v1183_v52  ;;  %v3107_v52 = vld [vmem:[%s5641_s0 + $0x88] sm:$0xff] }
 0x388   :  { %v4507_v46 = vadd.f32 %v1621_v33, %v1498_v9  ;;  %v1835_v33 = vld [vmem:[#allocation2 + $0x96] sm:$0xff] }
 0x389   :  { %1912 = vmatmul.f32.gmra.mxu1 %v1831_v13  ;;  %v1836_v13 = vld [vmem:[#allocation2 + $0x9e] sm:$0xff] }
 0x38b   :  { %2732 = vmatmul.f32.gmra.mxu3 %v3102_v37 }
 0x38d   :  { %v1466_v63 = vpop.f32.mrf.mxu2 }
 0x38e   :  { %v1499_v18 = vadd.f32 %v1466_v63, %v1341_v42  ;;  %v1624_v55 = vpop.f32.mrf.mxu3  ;;  %v1311_v50 = vpop.f32.mrf.mxu1  ;;  %v1837_v63 = vld [vmem:[#allocation2 + $0xa6] sm:$0xff] }
 0x38f   :  { %v1342_v54 = vadd.f32 %v1311_v50, %v1184_v11  ;;  %v2359_v11 = vld [vmem:[%s5648_s3 + $0x70] sm:$0xff] }
 0x390   :  { %v4514_v15 = vadd.f32 %v1624_v55, %v1499_v18  ;;  %v3108_v18 = vld [vmem:[%s5641_s0 + $0x90] sm:$0xff] }
 0x391   :  { %1915 = vmatmul.f32.gmra.mxu1 %v1832_v47  ;;  %v1838_v47 = vld [vmem:[#allocation2 + $0xae] sm:$0xff] }
 0x393   :  { %2735 = vmatmul.f32.gmra.mxu3 %v3103_v45 }
 0x395   :  { %v1469_v25 = vpop.f32.mrf.mxu2 }
 0x396   :  { %v1500_v49 = vadd.f32 %v1469_v25, %v1342_v54  ;;  %v1627_v23 = vpop.f32.mrf.mxu3  ;;  %v1314_v44 = vpop.f32.mrf.mxu1  ;;  %v1839_v25 = vld [vmem:[#allocation2 + $0xb6] sm:$0xff] }
 0x397   :  { %v1343_v4 = vadd.f32 %v1314_v44, %v1185_v35  ;;  %v1840_v44 = vld [vmem:[#allocation2 + $0xbe] sm:$0xff]  ;;  %v1841_v35 = vld [vmem:[#allocation2 + $0xc6] sm:$0xff] }
 0x398   :  { %v4521_v28 = vadd.f32 %v1627_v23, %v1500_v49 }
 0x399   :  { %1918 = vmatmul.f32.gmra.mxu1 %v1833_v38  ;;  %v3111_v38 = vld [vmem:[%s5641_s0 + $0xa8] sm:$0xff] }
 0x39b   :  { %2738 = vmatmul.f32.gmra.mxu3 %v3104_v14 }
 0x39d   :  { %v1472_v39 = vpop.f32.mrf.mxu2 }
 0x39e   :  { %v1501_v12 = vadd.f32 %v1472_v39, %v1343_v4  ;;  %v1630_v0 = vpop.f32.mrf.mxu3  ;;  %v1317_v48 = vpop.f32.mrf.mxu1  ;;  %v1842_v39 = vld [vmem:[#allocation2 + $0xce] sm:$0xff] }
 0x39f   :  { %v1344_v1 = vadd.f32 %v1317_v48, %v1186_v53  ;;  %v1843_v48 = vld [vmem:[#allocation2 + $0xd6] sm:$0xff]  ;;  %v3114_v53 = vld [vmem:[%s5641_s0 + $0xc0] sm:$0xff] }
 0x3a0   :  { %v4528_v41 = vadd.f32 %v1630_v0, %v1501_v12  ;;  %v3113_v12 = vld [vmem:[%s5641_s0 + $0xb8] sm:$0xff] }
 0x3a1   :  { %1921 = vmatmul.f32.gmra.mxu1 %v1834_v51 }
 0x3a3   :  { %2741 = vmatmul.f32.gmra.mxu3 %v3105_v7  ;;  %v2356_v7 = vld [vmem:[%s5648_s3 + $0x58] sm:$0xff] }
 0x3a5   :  { %v1475_v32 = vpop.f32.mrf.mxu2 }
 0x3a6   :  { %v1502_v59 = vadd.f32 %v1475_v32, %v1344_v1  ;;  %v1633_v31 = vpop.f32.mrf.mxu3  ;;  %v4535_v27 = vpop.f32.mrf.mxu1 }
 0x3a8   :  { %v4537_v9 = vadd.f32 %v1633_v31, %v1502_v59  ;;  %v2355_v31 = vld [vmem:[%s5648_s3 + $0x50] sm:$0xff] }
 0x3a9   :  { %1924 = vmatmul.f32.gmra.mxu1 %v1835_v33 }
 0x3ab   :  { %2744 = vmatmul.f32.gmra.mxu3 %v3106_v20  ;;  %v4616_v20 = vpop.f32.mrf.mxu0 }
 0x3ae   :  { %v1880_v8 = vpop.f32.mrf.mxu1 }
 0x3af   :  { %v4543_v40 = vadd.f32 %v1880_v8, %v4349_v24  ;;  %v2360_v24 = vld [vmem:[%s5648_s3 + $0x78] sm:$0xff] }
 0x3b0   :  { %2361 = vmatpush.msra.mxu2 %v2360_v24 }
 0x3b1   :  { %1927 = vmatmul.f32.gmra.mxu1 %v1836_v13 }
 0x3b2   :  { %2362 = vmatpush.msra.mxu2 %v2359_v11 }
 0x3b3   :  { %2747 = vmatmul.f32.gmra.mxu3 %v3107_v52  ;;  %v4627_v52 = vpop.f32.mrf.mxu0 }
 0x3b6   :  { %v1883_v37 = vpop.f32.mrf.mxu1 }
 0x3b7   :  { %v4549_v42 = vadd.f32 %v1883_v37, %v4368_v57  ;;  %v3109_v57 = vld [vmem:[%s5641_s0 + $0x98] sm:$0xff] }
 0x3b9   :  { %1930 = vmatmul.f32.gmra.mxu1 %v1837_v63 }
 0x3bb   :  { %2750 = vmatmul.f32.gmra.mxu3 %v3108_v18  ;;  %v4632_v18 = vpop.f32.mrf.mxu0 }
 0x3be   :  { %v1886_v55 = vpop.f32.mrf.mxu1 }
 0x3bf   :  { %v4558_v50 = vadd.f32 %v1886_v55, %v4384_v61  ;;  %v3110_v61 = vld [vmem:[%s5641_s0 + $0xa0] sm:$0xff]  ;;  %v4639_v55 = vpop.permute.xlu1 %1981 }
 0x3c0   :  { %5712 = vst [vmem:[#allocation5_spill] sm:$0xff] %v4639_v55 }
 0x3c1   :  { %1933 = vmatmul.f32.gmra.mxu1 %v1838_v47  ;;  %v4641_v47 = vpop.permute.xlu2 %1986 }
 0x3c2   :  { %5713 = vst [vmem:[#allocation6_spill] sm:$0xff] %v4641_v47 }
 0x3c3   :  { %2753 = vmatmul.f32.gmra.mxu3 %v3109_v57  ;;  %v4648_v57 = vpop.permute.xlu0 %1991 }
 0x3c4   :  { %5714 = vst [vmem:[#allocation7_spill] sm:$0xff] %v4648_v57 }
 0x3c6   :  { %v1889_v45 = vpop.f32.mrf.mxu1 }
 0x3c7   :  { %v4567_v54 = vadd.f32 %v1889_v45, %v4397_v10  ;;  %v2358_v10 = vld [vmem:[%s5648_s3 + $0x68] sm:$0xff]  ;;  %v4652_v45 = vpop.permute.xlu1 %1996 }
 0x3c8   :  { %2363 = vmatpush.msra.mxu2 %v2358_v10  ;;  %5715 = vst [vmem:[#allocation8_spill] sm:$0xff] %v4652_v45  ;;  %v2351_v10 = vld [vmem:[%s5648_s3 + $0x30] sm:$0xff] }
 0x3c9   :  { %1936 = vmatmul.f32.gmra.mxu1 %v1839_v25  ;;  %v4654_v25 = vpop.permute.xlu2 %2001 }
 0x3ca   :  { %5716 = vst [vmem:[#allocation9_spill] sm:$0xff] %v4654_v25 }
 0x3cb   :  { %2756 = vmatmul.f32.gmra.mxu3 %v3110_v61 }
 0x3ce   :  { %v1892_v49 = vpop.f32.mrf.mxu1 }
 0x3cf   :  { %v4573_v23 = vadd.f32 %v1892_v49, %v4410_v2  ;;  %v3112_v2 = vld [vmem:[%s5641_s0 + $0xb0] sm:$0xff] }
 0x3d1   :  { %1939 = vmatmul.f32.gmra.mxu1 %v1840_v44  ;;  %v4660_v44 = vpop.permute.xlu0 %2006 }
 0x3d2   :  { %5717 = vst [vmem:[#allocation10_spill] sm:$0xff] %v4660_v44 }
 0x3d3   :  { %2759 = vmatmul.f32.gmra.mxu3 %v3111_v38  ;;  %v4662_v38 = vpop.permute.xlu1 %2011 }
 0x3d4   :  { %5718 = vst [vmem:[#allocation11_spill] sm:$0xff] %v4662_v38 }
 0x3d6   :  { %v1895_v21 = vpop.f32.mrf.mxu1 }
 0x3d7   :  { %v4582_v62 = vadd.f32 %v1895_v21, %v4417_v19  ;;  %v2357_v19 = vld [vmem:[%s5648_s3 + $0x60] sm:$0xff] }
 0x3d8   :  { %2364 = vmatpush.msra.mxu2 %v2357_v19  ;;  %v2160_v19 = vmul.f32 %v4543_v40, %v4543_v40 }
 0x3d9   :  { %1942 = vmatmul.f32.gmra.mxu1 %v1841_v35  ;;  %v4669_v35 = vpop.permute.xlu2 %2016 }
 0x3da   :  { %2365 = vmatpush.msra.mxu2 %v2356_v7  ;;  %5719 = vst [vmem:[#allocation12_spill] sm:$0xff] %v4669_v35  ;;  %v2185_v7 = vmul.f32 %v2160_v19, %v4641_v47 }
 0x3db   :  { %2762 = vmatmul.f32.gmra.mxu3 %v3112_v2  ;;  %v1794_v2 = vadd.f32 %v4334_v5, %v4332_v26  ;;  %v2161_v5 = vmul.f32 %v4549_v42, %v4549_v42 }
 0x3dc   :  { %2366 = vmatpush.msra.mxu2 %v2355_v31 }
 0x3de   :  { %v1898_v14 = vpop.f32.mrf.mxu1 }
 0x3df   :  { %v4588_v4 = vadd.f32 %v1898_v14, %v4421_v29  ;;  %v4599_v29 = vpop.f32.mrf.mxu3 }
 0x3e0   :  { %5711 = vst [vmem:[#allocation4_spill] sm:$0xff] %v4599_v29  ;;  %v2164_v29 = vmul.f32 %v4573_v23, %v4573_v23 }
 0x3e1   :  { %5710 = vst [vmem:[#allocation3_spill] sm:$0xff] %v4588_v4  ;;  %1945 = vmatmul.f32.gmra.mxu1 %v1842_v39  ;;  %v4675_v39 = vpop.permute.xlu0 %2021 }
 0x3e3   :  { %2765 = vmatmul.f32.gmra.mxu3 %v3113_v12  ;;  %v4678_v12 = vadd.f32 %v4535_v27, %v1794_v2  ;;  %v2105_v27 = vmul.f32 %v4641_v47, %v4543_v40  ;;  %v2107_v2 = vmul.f32 %v4652_v45, %v4558_v50 }
 0x3e5   :  { %v2159_v26 = vmul.f32 %v4678_v12, %v4678_v12  ;;  %v2104_v31 = vmul.f32 %v4639_v55, %v4678_v12 }
 0x3e6   :  { %v1901_v0 = vpop.f32.mrf.mxu1 }
 0x3e7   :  { %v4597_v51 = vadd.f32 %v1901_v0, %v4425_v22  ;;  %v2350_v0 = vld [vmem:[%s5648_s3 + $0x28] sm:$0xff] }
 0x3e9   :  { %1948 = vmatmul.f32.gmra.mxu1 %v1843_v48  ;;  %v4685_v48 = vpop.permute.xlu1 %2026 }
 0x3eb   :  { %2768 = vmatmul.f32.gmra.mxu3 %v3114_v53 }
 0x3ee   :  { %v1904_v1 = vpop.f32.mrf.mxu1 }
 0x3ef   :  { %v4608_v32 = vadd.f32 %v1904_v1, %v4432_v17  ;;  %v2354_v17 = vld [vmem:[%s5648_s3 + $0x48] sm:$0xff]  ;;  %v2162_v1 = vmul.f32 %v4558_v50, %v4558_v50 }
 0x3f0   :  { %2367 = vmatpush.msra.mxu2 %v2354_v17 }
 0x3f6   :  { %v1907_v59 = vpop.f32.mrf.mxu1 }
 0x3f7   :  { %v4611_v22 = vadd.f32 %v1907_v59, %v4439_v56  ;;  %v4698_v59 = vpop.permute.xlu2 %2031 }
 0x3fe   :  { %v1910_v33 = vpop.f32.mrf.mxu1 }
 0x3ff   :  { %v4619_v8 = vadd.f32 %v1910_v33, %v4446_v34  ;;  %v2353_v34 = vld [vmem:[%s5648_s3 + $0x40] sm:$0xff]  ;;  %v2106_v33 = vmul.f32 %v4648_v57, %v4549_v42 }
 0x400   :  { %2368 = vmatpush.msra.mxu2 %v2353_v34  ;;  %v2163_v34 = vmul.f32 %v4567_v54, %v4567_v54 }
 0x406   :  { %v1913_v13 = vpop.f32.mrf.mxu1 }
 0x407   :  { %v4625_v56 = vadd.f32 %v1913_v13, %v4453_v6  ;;  %v4643_v6 = vpop.f32.mrf.mxu0  ;;  %v2184_v13 = vmul.f32 %v2159_v26, %v4639_v55  ;;  %v2108_v26 = vmul.f32 %v4654_v25, %v4567_v54  ;;  %v2188_v55 = vmul.f32 %v2163_v34, %v4654_v25 }
 0x408   :  { %v2167_v25 = vmul.f32 %v4597_v51, %v4597_v51 }
 0x409   :  { %v2209_v19 = vadd.f32 %v2185_v7, %v2184_v13 }
 0x40e   :  { %v1916_v37 = vpop.f32.mrf.mxu1 }
 0x40f   :  { %v4630_v63 = vadd.f32 %v1916_v37, %v4460_v16  ;;  %v2352_v16 = vld [vmem:[%s5648_s3 + $0x38] sm:$0xff]  ;;  %v4658_v49 = vpop.f32.mrf.mxu0  ;;  %v2186_v37 = vmul.f32 %v2161_v5, %v4648_v57 }
 0x410   :  { %2369 = vmatpush.msra.mxu2 %v2352_v16  ;;  %v4710_v16 = vpop.permute.xlu0 %2036 }
 0x411   :  { %v2210_v57 = vadd.f32 %v2209_v19, %v2186_v37  ;;  %v2110_v37 = vmul.f32 %v4662_v38, %v4582_v62 }
 0x412   :  { %2370 = vmatpush.msra.mxu2 %v2351_v10  ;;  %v2129_v10 = vadd.f32 %v2105_v27, %v2104_v31  ;;  %v2165_v27 = vmul.f32 %v4582_v62, %v4582_v62  ;;  %v4724_v31 = vpop.permute.xlu1 %2041 }
 0x414   :  { %2371 = vmatpush.msra.mxu2 %v2350_v0  ;;  %v2187_v0 = vmul.f32 %v2162_v1, %v4652_v45  ;;  %v2130_v47 = vadd.f32 %v2129_v10, %v2106_v33  ;;  %v2109_v1 = vmul.f32 %v4660_v44, %v4573_v23  ;;  %v2189_v33 = vmul.f32 %v2164_v29, %v4660_v44 }
 0x415   :  { %v2166_v10 = vmul.f32 %v4588_v4, %v4588_v4  ;;  %v2190_v19 = vmul.f32 %v2165_v27, %v4662_v38  ;;  %v1808_v44 = vadd.f32 %v4616_v20, %v4465_v58  ;;  %v2171_v58 = vmul.f32 %v4625_v56, %v4625_v56 }
 0x416   :  { %v4637_v24 = vpop.f32.mrf.mxu1  ;;  %v2131_v7 = vadd.f32 %v2130_v47, %v2107_v2  ;;  %v2211_v13 = vadd.f32 %v2210_v57, %v2187_v0  ;;  %v4736_v47 = vpop.permute.xlu2 %2046  ;;  %v2111_v57 = vmul.f32 %v4669_v35, %v4588_v4  ;;  %v2170_v4 = vmul.f32 %v4619_v8, %v4619_v8 }
 0x417   :  { %v4673_v14 = vpop.f32.mrf.mxu0  ;;  %v4774_v20 = vadd.f32 %v4637_v24, %v1808_v44  ;;  %v2116_v44 = vmul.f32 %v4724_v31, %v4625_v56 }
 0x418   :  { %v2132_v45 = vadd.f32 %v2131_v7, %v2108_v26  ;;  %v2212_v34 = vadd.f32 %v2211_v13, %v2188_v55  ;;  %v2191_v26 = vmul.f32 %v2166_v10, %v4669_v35  ;;  %v2168_v7 = vmul.f32 %v4608_v32, %v4608_v32  ;;  %v2349_v55 = vld [vmem:[%s5648_s3 + $0x20] sm:$0xff]  ;;  %v4748_v27 = vpop.permute.xlu0 %2051 }
 0x419   :  { %2372 = vmatpush.msra.mxu2 %v2349_v55  ;;  %v2169_v10 = vmul.f32 %v4611_v22, %v4611_v22  ;;  %v2113_v35 = vmul.f32 %v4685_v48, %v4608_v32 }
 0x41a   :  { %v2133_v2 = vadd.f32 %v2132_v45, %v2109_v1  ;;  %v2213_v0 = vadd.f32 %v2212_v34, %v2189_v33  ;;  %v2112_v45 = vmul.f32 %v4675_v39, %v4597_v51  ;;  %v2192_v33 = vmul.f32 %v2167_v25, %v4675_v39  ;;  %v4764_v55 = vpop.permute.xlu1 %2056 }
 0x41b   :  { %v1809_v25 = vadd.f32 %v4627_v52, %v4472_v43  ;;  %v2195_v43 = vmul.f32 %v2170_v4, %v4710_v16  ;;  %v2172_v52 = vmul.f32 %v4630_v63, %v4630_v63  ;;  %v2196_v4 = vmul.f32 %v2171_v58, %v4724_v31 }
 0x41c   :  { %v2134_v13 = vadd.f32 %v2133_v2, %v2110_v37  ;;  %v2214_v38 = vadd.f32 %v2213_v0, %v2190_v19  ;;  %v2193_v2 = vmul.f32 %v2168_v7, %v4685_v48  ;;  %v1812_v58 = vadd.f32 %v4658_v49, %v4493_v36 }
 0x41e   :  { %v4650_v11 = vpop.f32.mrf.mxu1  ;;  %v2135_v34 = vadd.f32 %v2134_v13, %v2111_v57  ;;  %v2215_v37 = vadd.f32 %v2214_v38, %v2191_v26  ;;  %v2114_v57 = vmul.f32 %v4698_v59, %v4611_v22  ;;  %v2194_v13 = vmul.f32 %v2169_v10, %v4698_v59 }
 0x41f   :  { %v4704_v17 = vpop.f32.mrf.mxu0  ;;  %v2115_v26 = vmul.f32 %v4710_v16, %v4619_v8  ;;  %v1810_v10 = vadd.f32 %v4632_v18, %v4479_v60  ;;  %v2117_v60 = vmul.f32 %v4736_v47, %v4630_v63 }
 0x420   :  { %v2136_v19 = vadd.f32 %v2135_v34, %v2112_v45  ;;  %v2216_v0 = vadd.f32 %v2215_v37, %v2192_v33  ;;  %v4782_v45 = vadd.f32 %v4650_v11, %v1809_v25  ;;  %v4784_v33 = vpop.permute.xlu2 %2061  ;;  %v1811_v11 = vadd.f32 %v4643_v6, %v4486_v30 }
 0x421   :  { %v2118_v30 = vmul.f32 %v4748_v27, %v4774_v20 }
 0x422   :  { %v2137_v38 = vadd.f32 %v2136_v19, %v2113_v35  ;;  %v2217_v7 = vadd.f32 %v2216_v0, %v2193_v2  ;;  %v2173_v2 = vmul.f32 %v4774_v20, %v4774_v20  ;;  %v4793_v19 = vpop.permute.xlu0 %2066  ;;  %v2197_v0 = vmul.f32 %v2172_v52, %v4736_v47 }
 0x424   :  { %v2138_v24 = vadd.f32 %v2137_v38, %v2114_v57  ;;  %v2218_v37 = vadd.f32 %v2217_v7, %v2194_v13  ;;  %v2174_v13 = vmul.f32 %v4782_v45, %v4782_v45  ;;  %v2198_v7 = vmul.f32 %v2173_v2, %v4748_v27 }
 0x425   :  { %v1814_v2 = vadd.f32 %v4704_v17, %v4507_v46 }
 0x426   :  { %v4656_v61 = vpop.f32.mrf.mxu1  ;;  %v2139_v25 = vadd.f32 %v2138_v24, %v2115_v26  ;;  %v2219_v57 = vadd.f32 %v2218_v37, %v2195_v43  ;;  %v4815_v43 = vpop.permute.xlu1 %2071  ;;  %v2199_v24 = vmul.f32 %v2174_v13, %v4764_v55 }
 0x427   :  { %v4740_v29 = vpop.f32.mrf.mxu0  ;;  %v4800_v18 = vadd.f32 %v4656_v61, %v1810_v10  ;;  %v1813_v61 = vadd.f32 %v4673_v14, %v4500_v3  ;;  %v2119_v10 = vmul.f32 %v4764_v55, %v4782_v45 }
 0x428   :  { %v2140_v38 = vadd.f32 %v2139_v25, %v2116_v44  ;;  %v2220_v26 = vadd.f32 %v2219_v57, %v2196_v4 }
 0x429   :  { %v2175_v36 = vmul.f32 %v4800_v18, %v4800_v18  ;;  %v2120_v3 = vmul.f32 %v4784_v33, %v4800_v18 }
 0x42a   :  { %v2141_v52 = vadd.f32 %v2140_v38, %v2117_v60  ;;  %v4846_v46 = vpop.permute.xlu0 %2081 }
 0x42b   :  { %v2200_v60 = vmul.f32 %v2175_v36, %v4784_v33 }
 0x42c   :  { %v2142_v44 = vadd.f32 %v2141_v52, %v2118_v30 }
 0x42e   :  { %v4667_v21 = vpop.f32.mrf.mxu1  ;;  %v2143_v25 = vadd.f32 %v2142_v44, %v2119_v10 }
 0x42f   :  { %v1785_v34 = vpop.f32.mrf.mxu0  ;;  %v4810_v6 = vadd.f32 %v4667_v21, %v1811_v11  ;;  %v2221_v21 = vadd.f32 %v2220_v26, %v2197_v0 }
 0x430   :  { %v2144_v17 = vadd.f32 %v2143_v25, %v2120_v3  ;;  %v1816_v26 = vadd.f32 %v1785_v34, %v4521_v28  ;;  %v3118_v28 = vmov 32.0   ;;  %v4864_v34 = vpop.permute.xlu1 %2086 }
 0x431   :  { %v2176_v14 = vmul.f32 %v4810_v6, %v4810_v6  ;;  %v2222_v11 = vadd.f32 %v2221_v21, %v2198_v7  ;;  %v2121_v57 = vmul.f32 %v4793_v19, %v4810_v6  ;;  %3073 = vrcp.f32 %v3118_v28  ;;  %5720 = vst [vmem:[#allocation13_spill] sm:$0xff] %v4864_v34 }
 0x433   :  { %v2201_v30 = vmul.f32 %v2176_v14, %v4793_v19 }
 0x436   :  { %v4687_v53 = vpop.f32.mrf.mxu1 }
 0x437   :  { %v4822_v49 = vadd.f32 %v4687_v53, %v1812_v58  ;;  %v4834_v53 = vpop.permute.xlu2 %2076  ;;  %v1788_v13 = vpop.f32.mrf.mxu0  ;;  %v2223_v58 = vadd.f32 %v2222_v11, %v2199_v24 }
 0x439   :  { %v2177_v0 = vmul.f32 %v4822_v49, %v4822_v49  ;;  %v2122_v7 = vmul.f32 %v4815_v43, %v4822_v49 }
 0x43b   :  { %v2202_v10 = vmul.f32 %v2177_v0, %v4815_v43 }
 0x43e   :  { %v4719_v5 = vpop.f32.mrf.mxu1 }
 0x43f   :  { %v4830_v37 = vadd.f32 %v4719_v5, %v1813_v61  ;;  %v1815_v5 = vadd.f32 %v4740_v29, %v4514_v15  ;;  %v1817_v15 = vadd.f32 %v1788_v13, %v4528_v41  ;;  %v2224_v29 = vadd.f32 %v2223_v58, %v2200_v60  ;;  %v4878_v13 = vpop.permute.xlu2 %2091 }
 0x440   :  { %5721 = vst [vmem:[#allocation14_spill] sm:$0xff] %v4878_v13 }
 0x441   :  { %v2178_v61 = vmul.f32 %v4830_v37, %v4830_v37  ;;  %v2123_v36 = vmul.f32 %v4834_v53, %v4830_v37 }
 0x443   :  { %v2203_v44 = vmul.f32 %v2178_v61, %v4834_v53 }
 0x446   :  { %v4752_v1 = vpop.f32.mrf.mxu1 }
 0x447   :  { %v4844_v38 = vadd.f32 %v4752_v1, %v1814_v2  ;;  %v2145_v1 = vadd.f32 %v2144_v17, %v2121_v57  ;;  %v3074_v17 = vpop.eup %3073 }
 0x448   :  { %vm2244_vm4 = vweird.f32 %v3074_v17 }
 0x449   :  { %v2179_v21 = vmul.f32 %v4844_v38, %v4844_v38  ;;  %v2146_v3 = vadd.f32 %v2145_v1, %v2122_v7  ;;  %v2124_v14 = vmul.f32 %v4846_v46, %v4844_v38 }
 0x44b   :  { %v2147_v60 = vadd.f32 %v2146_v3, %v2123_v36  ;;  %v2204_v57 = vmul.f32 %v2179_v21, %v4846_v46 }
 0x44e   :  { %v1940_v35 = vpop.f32.mrf.mxu1 }
 0x44f   :  { %v4854_v52 = vadd.f32 %v1940_v35, %v1815_v5  ;;  %v2225_v35 = vadd.f32 %v2224_v29, %v2201_v30  ;;  %v2148_v30 = vadd.f32 %v2147_v60, %v2124_v14 }
 0x451   :  { %v2180_v2 = vmul.f32 %v4854_v52, %v4854_v52  ;;  %v2226_v25 = vadd.f32 %v2225_v35, %v2202_v10  ;;  %v2125_v0 = vmul.f32 %v4864_v34, %v4854_v52  ;;  %v2240_v35 = vmul.f32 32.0, %v3074_v17 }
 0x453   :  { %v2227_v58 = vadd.f32 %v2226_v25, %v2203_v44  ;;  %v2205_v61 = vmul.f32 %v2180_v2, %v4864_v34  ;;  %v2149_v10 = vadd.f32 %v2148_v30, %v2125_v0  ;;  %v4892_v2 = vpop.permute.xlu1 %2101 }
 0x455   :  { %v2228_v1 = vadd.f32 %v2227_v58, %v2204_v57  ;;  %v2241_v57 = vsub.f32 1.0, %v2240_v35 }
 0x456   :  { %v1943_v4 = vpop.f32.mrf.mxu1 }
 0x457   :  { %v4862_v24 = vadd.f32 %v1943_v4, %v1816_v26  ;;  %v1791_v4 = vpop.f32.mrf.mxu0  ;;  %v2229_v44 = vadd.f32 %v2228_v1, %v2205_v61  ;;  %v2242_v34 = vmul.f32 %v3074_v17, %v2241_v57 }
 0x458   :  { %v1818_v29 = vadd.f32 %v1791_v4, %v4537_v9 }
 0x459   :  { %v2181_v5 = vmul.f32 %v4862_v24, %v4862_v24  ;;  %v2126_v26 = vmul.f32 %v4878_v13, %v4862_v24 }
 0x45b   :  { %v2206_v36 = vmul.f32 %v2181_v5, %v4878_v13 }
 0x45d   :  { %v2230_v25 = vadd.f32 %v2229_v44, %v2206_v36 }
 0x45e   :  { %v1946_v41 = vpop.f32.mrf.mxu1 }
 0x45f   :  { %v4871_v11 = vadd.f32 %v1946_v41, %v1817_v15  ;;  %v4885_v15 = vpop.permute.xlu0 %2096  ;;  %v2150_v41 = vadd.f32 %v2149_v10, %v2126_v26 }
 0x461   :  { %v2182_v7 = vmul.f32 %v4871_v11, %v4871_v11  ;;  %v2127_v21 = vmul.f32 %v4885_v15, %v4871_v11 }
 0x463   :  { %v2207_v3 = vmul.f32 %v2182_v7, %v4885_v15  ;;  %v2151_v60 = vadd.f32 %v2150_v41, %v2127_v21 }
 0x465   :  { %v2231_v0 = vadd.f32 %v2230_v25, %v2207_v3 }
 0x466   :  { %v1949_v28 = vpop.f32.mrf.mxu1 }
 0x467   :  { %v1976_v14 = vadd.f32 %v1949_v28, %v1818_v29  ;;  %v2243_v29 = vadd.f32 %v3074_v17, %v2242_v34 }
 0x469   :  { %v2128_v9 = vmul.f32 %v4892_v2, %v1976_v14  ;;  %v2183_v4 = vmul.f32 %v1976_v14, %v1976_v14  ;;  %v4896_v44 = vsel %vm2244_vm4, %v3074_v17, %v2243_v29  ;;  %v2348_v17 = vld [vmem:[%s5648_s3 + $0x18] sm:$0xff] }
 0x46a   :  { %5722 = vst [vmem:[#allocation15_spill] sm:$0xff] %v4896_v44  ;;  %2373 = vmatpush.msra.mxu2 %v2348_v17 }
 0x46b   :  { %v2152_v5 = vadd.f32 %v2151_v60, %v2128_v9  ;;  %v2208_v58 = vmul.f32 %v2183_v4, %v4892_v2 }
 0x46d   :  { %v2153_v30 = vrot.slane %v2152_v5, 4  ;;  %v2232_v13 = vadd.f32 %v2231_v0, %v2208_v58  ;;  %v2347_v58 = vld [vmem:[%s5648_s3 + $0x10] sm:$0xff] }
 0x46e   :  { %2374 = vmatpush.msra.mxu2 %v2347_v58 }
 0x46f   :  { %v2154_v61 = vadd.f32 %v2153_v30, %v2152_v5  ;;  %v2233_v26 = vrot.slane %v2232_v13, 4 }
 0x471   :  { %v2155_v1 = vrot.slane %v2154_v61, 2  ;;  %v2234_v7 = vadd.f32 %v2233_v26, %v2232_v13  ;;  %v1977_v26 = vld [vmem:[%s5649_s7] sm:$0x1] }
 0x473   :  { %v2156_v10 = vadd.f32 %v2155_v1, %v2154_v61  ;;  %v2235_v28 = vrot.slane %v2234_v7, 2  ;;  %v2346_v61 = vld [vmem:[%s5648_s3 + $0x8] sm:$0xff] }
 0x474   :  { %2375 = vmatpush.msra.mxu2 %v2346_v61 }
 0x475   :  { %v2157_v36 = vrot.slane %v2156_v10, 1  ;;  %v2236_v21 = vadd.f32 %v2235_v28, %v2234_v7  ;;  %v2345_v7 = vld [vmem:[%s5648_s3] sm:$0xff] }
 0x476   :  { %2376 = vmatpush.msra.mxu2 %v2345_v7  ;;  %v1978_v28 = vld [vmem:[%s5650_s8] sm:$0x1] }
 0x477   :  { %v2158_v35 = vadd.f32 %v2157_v36, %v2156_v10  ;;  %v2237_v41 = vrot.slane %v2236_v21, 1 }
 0x479   :  { %v2238_v3 = vadd.f32 %v2237_v41, %v2236_v21  ;;  %v2246_v25 = vmul.f32 %v4896_v44, %v2158_v35 }
 0x47b   :  { %v2247_v60 = vmul.f32 %v4896_v44, %v2238_v3  ;;  %v2248_v9 = vmul.f32 %v2246_v25, %v2246_v25 }
 0x47d   :  { %v2249_v4 = vsub.f32 %v2247_v60, %v2248_v9 }
 0x47f   :  { %v2250_v57 = vadd.f32 1e-05, %v2249_v4 }
 0x481   :  { %3075 = vrsqrt.f32 %v2250_v57  ;;  %vm2257_vm6 = vweird.f32 %v2250_v57 }
 0x487   :  { %v3076_v13 = vpop.eup %3075 }
 0x488   :  { %v2252_v34 = vmul.f32 %v3076_v13, %v2250_v57  ;;  %vm2258_vm5 = vweird.f32 %v3076_v13 }
 0x489   :  { %vm2259_vm7 = vmor %vm2257_vm6, %vm2258_vm5 }
 0x48a   :  { %v2253_v0 = vmul.f32 %v3076_v13, %v2252_v34 }
 0x48c   :  { %v2254_v5 = vmul.f32 0.5, %v2253_v0 }
 0x48e   :  { %v2255_v30 = vsub.f32 1.5, %v2254_v5 }
 0x490   :  { %v2256_v1 = vmul.f32 %v3076_v13, %v2255_v30 }
 0x492   :  { %v2260_v29 = vsel %vm2259_vm7, %v3076_v13, %v2256_v1 }
 0x493   :  { %v2261_v10 = vmul.f32 %v2260_v29, %v1977_v26 }
 0x495   :  { %v2262_v36 = vmul.f32 %v2261_v10, %v2246_v25  ;;  %v4918_v21 = vperm.slane %v2261_v10, 0 }
 0x497   :  { %v2263_v35 = vsub.f32 %v1978_v28, %v2262_v36  ;;  %v2291_v41 = vmul.f32 %v4918_v21, %v1976_v14  ;;  %v2267_v60 = vmul.f32 %v4918_v21, %v4678_v12  ;;  %v2268_v57 = vmul.f32 %v4918_v21, %v4543_v40 }
 0x498   :  { %v2269_v34 = vmul.f32 %v4918_v21, %v4549_v42  ;;  %v2270_v0 = vmul.f32 %v4918_v21, %v4558_v50  ;;  %v2275_v12 = vmul.f32 %v4918_v21, %v4597_v51  ;;  %v2276_v5 = vmul.f32 %v4918_v21, %v4608_v32 }
 0x499   :  { %v4921_v3 = vperm.slane %v2263_v35, 0  ;;  %v2277_v40 = vmul.f32 %v4918_v21, %v4611_v22  ;;  %v2278_v17 = vmul.f32 %v4918_v21, %v4619_v8  ;;  %v2279_v42 = vmul.f32 %v4918_v21, %v4625_v56 }
 0x49a   :  { %v2280_v58 = vmul.f32 %v4918_v21, %v4630_v63  ;;  %v2281_v50 = vmul.f32 %v4918_v21, %v4774_v20  ;;  %v2282_v63 = vmul.f32 %v4918_v21, %v4782_v45  ;;  %v2283_v20 = vmul.f32 %v4918_v21, %v4800_v18 }
 0x49b   :  { %v2295_v9 = vadd.f32 %v4921_v3, %v2267_v60  ;;  %v2296_v13 = vadd.f32 %v4921_v3, %v2268_v57  ;;  %v2297_v14 = vadd.f32 %v4921_v3, %v2269_v34  ;;  %v2303_v51 = vadd.f32 %v4921_v3, %v2275_v12  ;;  %v5004_v12 = vpop.f32.mrf.mxu3 }
 0x49c   :  { %v2304_v32 = vadd.f32 %v4921_v3, %v2276_v5  ;;  %v2305_v61 = vadd.f32 %v4921_v3, %v2277_v40  ;;  %v2306_v22 = vadd.f32 %v4921_v3, %v2278_v17  ;;  %v2307_v8 = vadd.f32 %v4921_v3, %v2279_v42  ;;  %5723 = vst [vmem:[#allocation16_spill] sm:$0xff] %v5004_v12  ;;  %v5724_v40 = vld [vmem:[#allocation3_spill] sm:$0xff] }
 0x49d   :  { %v2320_v4 = vmax.f32 %v2295_v9, 0.0  ;;  %v2321_v25 = vmax.f32 %v2296_v13, 0.0  ;;  %v2322_v30 = vmax.f32 %v2297_v14, 0.0  ;;  %v2308_v26 = vadd.f32 %v4921_v3, %v2280_v58 }
 0x49e   :  { %v2309_v56 = vadd.f32 %v4921_v3, %v2281_v50  ;;  %v2284_v1 = vmul.f32 %v4918_v21, %v4810_v6  ;;  %v2285_v7 = vmul.f32 %v4918_v21, %v4822_v49  ;;  %v2298_v29 = vadd.f32 %v4921_v3, %v2270_v0 }
 0x49f   :  { %2377 = vmatmul.f32.vlgmr.msra.gmra.mxu2 %v2320_v4  ;;  %v2310_v10 = vadd.f32 %v4921_v3, %v2282_v63  ;;  %v2311_v28 = vadd.f32 %v4921_v3, %v2283_v20  ;;  %v2286_v45 = vmul.f32 %v4918_v21, %v4830_v37  ;;  %v2287_v18 = vmul.f32 %v4918_v21, %v4844_v38 }
 0x4a0   :  { %v2312_v36 = vadd.f32 %v4921_v3, %v2284_v1  ;;  %v4968_v35 = vadd.f32 %v4921_v3, %v2285_v7  ;;  %v2288_v6 = vmul.f32 %v4918_v21, %v4854_v52  ;;  %v2289_v49 = vmul.f32 %v4918_v21, %v4862_v24 }
 0x4a1   :  { %v4979_v60 = vadd.f32 %v4921_v3, %v2286_v45  ;;  %v4982_v9 = vadd.f32 %v4921_v3, %v2287_v18  ;;  %v2323_v57 = vmax.f32 %v2298_v29, 0.0  ;;  %v2290_v38 = vmul.f32 %v4918_v21, %v4871_v11 }
 0x4a2   :  { %v4985_v4 = vadd.f32 %v4921_v3, %v2288_v6  ;;  %v4988_v37 = vadd.f32 %v4921_v3, %v2289_v49  ;;  %v4993_v52 = vadd.f32 %v4921_v3, %v2291_v41  ;;  %v2271_v24 = vmul.f32 %v4918_v21, %v4567_v54 }
 0x4a3   :  { %v4998_v13 = vadd.f32 %v4921_v3, %v2290_v38  ;;  %v2272_v14 = vmul.f32 %v4918_v21, %v4573_v23  ;;  %v2273_v41 = vmul.f32 %v4918_v21, %v4582_v62  ;;  %v2274_v17 = vmul.f32 %v4918_v21, %v5724_v40  ;;  %v5011_v42 = vpop.f32.mrf.mxu3 }
 0x4a4   :  { %5725 = vst [vmem:[#allocation3_spill] sm:$0xff] %v5011_v42  ;;  %v2329_v62 = vmax.f32 %v2304_v32, 0.0  ;;  %v2330_v20 = vmax.f32 %v2305_v61, 0.0  ;;  %v2331_v7 = vmax.f32 %v2306_v22, 0.0  ;;  %v2332_v29 = vmax.f32 %v2307_v8, 0.0 }
 0x4a5   :  { %v2300_v0 = vadd.f32 %v4921_v3, %v2272_v14  ;;  %v2301_v54 = vadd.f32 %v4921_v3, %v2273_v41  ;;  %v2302_v23 = vadd.f32 %v4921_v3, %v2274_v17  ;;  %v2333_v45 = vmax.f32 %v2308_v26, 0.0 }
 0x4a6   :  { %v2334_v18 = vmax.f32 %v2309_v56, 0.0  ;;  %v2335_v32 = vmax.f32 %v2310_v10, 0.0  ;;  %v2336_v61 = vmax.f32 %v2311_v28, 0.0  ;;  %v2337_v8 = vmax.f32 %v2312_v36, 0.0 }
 0x4a7   :  { %2380 = vmatmul.f32.gmra.mxu2 %v2321_v25  ;;  %v2299_v25 = vadd.f32 %v4921_v3, %v2271_v24  ;;  %v2325_v11 = vmax.f32 %v2300_v0, 0.0  ;;  %v2326_v5 = vmax.f32 %v2301_v54, 0.0  ;;  %v2327_v58 = vmax.f32 %v2302_v23, 0.0 }
 0x4a8   :  { %v2338_v38 = vmax.f32 %v4968_v35, 0.0  ;;  %v2339_v28 = vmax.f32 %v4979_v60, 0.0  ;;  %v2341_v14 = vmax.f32 %v4985_v4, 0.0  ;;  %v2344_v4 = vmax.f32 %v4993_v52, 0.0 }
 0x4a9   :  { %v2324_v34 = vmax.f32 %v2299_v25, 0.0  ;;  %v2340_v25 = vmax.f32 %v4982_v9, 0.0  ;;  %v2343_v9 = vmax.f32 %v4998_v13, 0.0 }
 0x4ab   :  { %v5014_v50 = vpop.f32.mrf.mxu3 }
 0x4ac   :  { %5726 = vst [vmem:[#allocation17_spill] sm:$0xff] %v5014_v50 }
 0x4af   :  { %2383 = vmatmul.f32.gmra.mxu2 %v2322_v30  ;;  %v2328_v30 = vmax.f32 %v2303_v51, 0.0 }
 0x4b3   :  { %v5016_v63 = vpop.f32.mrf.mxu3 }
 0x4b4   :  { %5727 = vst [vmem:[#allocation18_spill] sm:$0xff] %v5016_v63 }
 0x4b7   :  { %2386 = vmatmul.f32.gmra.mxu2 %v2323_v57 }
 0x4bb   :  { %v5018_v1 = vpop.f32.mrf.mxu3 }
 0x4bc   :  { %5728 = vst [vmem:[#allocation19_spill] sm:$0xff] %v5018_v1 }
 0x4bf   :  { %2389 = vmatmul.f32.gmra.mxu2 %v2324_v34 }
 0x4c3   :  { %v5020_v21 = vpop.f32.mrf.mxu3 }
 0x4c7   :  { %2392 = vmatmul.f32.gmra.mxu2 %v2325_v11  ;;  %v2342_v11 = vmax.f32 %v4988_v37, 0.0 }
 0x4cb   :  { %v5022_v3 = vpop.f32.mrf.mxu3 }
 0x4cc   :  { %5729 = vst [vmem:[#allocation20_spill] sm:$0xff] %v5022_v3 }
 0x4cf   :  { %2395 = vmatmul.f32.gmra.mxu2 %v2326_v5 }
 0x4d3   :  { %v5024_v51 = vpop.f32.mrf.mxu3 }
 0x4d7   :  { %2398 = vmatmul.f32.gmra.mxu2 %v2327_v58 }
 0x4db   :  { %v5026_v6 = vpop.f32.mrf.mxu3 }
 0x4dc   :  { %5730 = vst [vmem:[#allocation21_spill] sm:$0xff] %v5026_v6 }
 0x4df   :  { %2401 = vmatmul.f32.gmra.mxu2 %v2328_v30 }
 0x4e3   :  { %v5028_v22 = vpop.f32.mrf.mxu3 }
 0x4e7   :  { %2404 = vmatmul.f32.gmra.mxu2 %v2329_v62  ;;  %v2830_v62 = vmul.f32 %v5004_v12, %v5004_v12 }
 0x4eb   :  { %v5032_v57 = vpop.f32.mrf.mxu3 }
 0x4ef   :  { %2407 = vmatmul.f32.gmra.mxu2 %v2330_v20  ;;  %v5742_v20 = vld [vmem:[#allocation6_spill] sm:$0xff] }
 0x4f0   :  { %v2775_v52 = vmul.f32 %v5004_v12, %v5742_v20 }
 0x4f3   :  { %v5039_v10 = vpop.f32.mrf.mxu3 }
 0x4f4   :  { %5733 = vst [vmem:[#allocation24_spill] sm:$0xff] %v5039_v10 }
 0x4f7   :  { %2410 = vmatmul.f32.gmra.mxu2 %v2331_v7 }
 0x4fb   :  { %v5045_v36 = vpop.f32.mrf.mxu3 }
 0x4fc   :  { %5734 = vst [vmem:[#allocation25_spill] sm:$0xff] %v5045_v36 }
 0x4ff   :  { %2413 = vmatmul.f32.gmra.mxu2 %v2332_v29  ;;  %v5744_v29 = vld [vmem:[#allocation4_spill] sm:$0xff] }
 0x503   :  { %v5050_v35 = vpop.f32.mrf.mxu3 }
 0x507   :  { %2416 = vmatmul.f32.gmra.mxu2 %v2333_v45  ;;  %v2829_v45 = vmul.f32 %v5744_v29, %v5744_v29 }
 0x50b   :  { %v5055_v60 = vpop.f32.mrf.mxu3 }
 0x50f   :  { %2419 = vmatmul.f32.gmra.mxu2 %v2334_v18  ;;  %v2831_v18 = vmul.f32 %v5011_v42, %v5011_v42 }
 0x513   :  { %v5062_v5 = vpop.f32.mrf.mxu3 }
 0x514   :  { %5735 = vst [vmem:[#allocation26_spill] sm:$0xff] %v5062_v5 }
 0x517   :  { %2422 = vmatmul.f32.gmra.mxu2 %v2335_v32  ;;  %v5745_v32 = vld [vmem:[#allocation5_spill] sm:$0xff] }
 0x518   :  { %v2854_v12 = vmul.f32 %v2829_v45, %v5745_v32 }
 0x51b   :  { %v5067_v17 = vpop.f32.mrf.mxu3 }
 0x51c   :  { %5737 = vst [vmem:[#allocation28_spill] sm:$0xff] %v5067_v17 }
 0x51f   :  { %2425 = vmatmul.f32.gmra.mxu2 %v2336_v61  ;;  %v2774_v61 = vmul.f32 %v5744_v29, %v5745_v32  ;;  %v2833_v29 = vmul.f32 %v5016_v63, %v5016_v63 }
 0x522   :  { %v5030_v49 = vpop.f32.mrf.mxu2 }
 0x523   :  { %v5071_v23 = vpop.f32.mrf.mxu3 }
 0x527   :  { %2428 = vmatmul.f32.gmra.mxu2 %v2337_v8  ;;  %v5746_v8 = vld [vmem:[#allocation7_spill] sm:$0xff] }
 0x528   :  { %v2856_v44 = vmul.f32 %v2831_v18, %v5746_v8 }
 0x52a   :  { %v5034_v26 = vpop.f32.mrf.mxu2 }
 0x52b   :  { %5731 = vst [vmem:[#allocation22_spill] sm:$0xff] %v5034_v26  ;;  %v5075_v30 = vpop.f32.mrf.mxu3 }
 0x52c   :  { %5740 = vst [vmem:[#allocation31_spill] sm:$0xff] %v5075_v30 }
 0x52f   :  { %2431 = vmatmul.f32.gmra.mxu2 %v2338_v38  ;;  %v2776_v38 = vmul.f32 %v5011_v42, %v5746_v8  ;;  %v5749_v42 = vld [vmem:[#allocation9_spill] sm:$0xff] }
 0x532   :  { %v5037_v56 = vpop.f32.mrf.mxu2 }
 0x533   :  { %5732 = vst [vmem:[#allocation23_spill] sm:$0xff] %v5037_v56 }
 0x537   :  { %2434 = vmatmul.f32.gmra.mxu2 %v2339_v28  ;;  %v5093_v28 = vpop.f32.mrf.mxu3 }
 0x538   :  { %5747 = vst [vmem:[#allocation5_spill] sm:$0xff] %v5093_v28 }
 0x53a   :  { %v5042_v24 = vpop.f32.mrf.mxu2 }
 0x53f   :  { %2437 = vmatmul.f32.gmra.mxu2 %v2340_v25  ;;  %v2855_v25 = vmul.f32 %v2830_v62, %v5742_v20 }
 0x542   :  { %v5047_v34 = vpop.f32.mrf.mxu2 }
 0x547   :  { %2440 = vmatmul.f32.gmra.mxu2 %v2341_v14  ;;  %v2832_v14 = vmul.f32 %v5014_v50, %v5014_v50 }
 0x54a   :  { %v5052_v0 = vpop.f32.mrf.mxu2 }
 0x54f   :  { %2443 = vmatmul.f32.gmra.mxu2 %v2342_v11  ;;  %v2799_v11 = vadd.f32 %v2775_v52, %v2774_v61  ;;  %v2834_v52 = vmul.f32 %v5018_v1, %v5018_v1 }
 0x552   :  { %v5057_v41 = vpop.f32.mrf.mxu2 }
 0x557   :  { %2446 = vmatmul.f32.gmra.mxu2 %v2343_v9  ;;  %v5748_v9 = vld [vmem:[#allocation8_spill] sm:$0xff] }
 0x558   :  { %v2857_v62 = vmul.f32 %v2832_v14, %v5748_v9 }
 0x55a   :  { %v5060_v54 = vpop.f32.mrf.mxu2 }
 0x55f   :  { %2449 = vmatmul.f32.gmra.mxu2 %v2344_v4  ;;  %v2777_v4 = vmul.f32 %v5014_v50, %v5748_v9 }
 0x562   :  { %v5065_v40 = vpop.f32.mrf.mxu2 }
 0x563   :  { %5736 = vst [vmem:[#allocation27_spill] sm:$0xff] %v5065_v40  ;;  %v2858_v40 = vmul.f32 %v2833_v29, %v5749_v42 }
 0x56a   :  { %v5069_v37 = vpop.f32.mrf.mxu2 }
 0x56b   :  { %5738 = vst [vmem:[#allocation29_spill] sm:$0xff] %v5069_v37  ;;  %v5750_v37 = vld [vmem:[#allocation10_spill] sm:$0xff] }
 0x56c   :  { %v2779_v50 = vmul.f32 %v5018_v1, %v5750_v37  ;;  %v2859_v14 = vmul.f32 %v2834_v52, %v5750_v37  ;;  %v5753_v1 = vld [vmem:[#allocation12_spill] sm:$0xff] }
 0x572   :  { %v5073_v58 = vpop.f32.mrf.mxu2 }
 0x573   :  { %5739 = vst [vmem:[#allocation30_spill] sm:$0xff] %v5073_v58  ;;  %v2879_v58 = vadd.f32 %v2855_v25, %v2854_v12 }
 0x575   :  { %v2880_v18 = vadd.f32 %v2879_v58, %v2856_v44  ;;  %v5123_v44 = vpop.f32.mrf.mxu3 }
 0x576   :  { %5754 = vst [vmem:[#allocation8_spill] sm:$0xff] %v5123_v44 }
 0x577   :  { %v2881_v25 = vadd.f32 %v2880_v18, %v2857_v62  ;;  %v2782_v62 = vmul.f32 %v5024_v51, %v4675_v39 }
 0x579   :  { %v2882_v58 = vadd.f32 %v2881_v25, %v2858_v40 }
 0x57a   :  { %v5077_v13 = vpop.f32.mrf.mxu2 }
 0x57b   :  { %5741 = vst [vmem:[#allocation32_spill] sm:$0xff] %v5077_v13  ;;  %v2778_v13 = vmul.f32 %v5016_v63, %v5749_v42  ;;  %v5752_v63 = vld [vmem:[#allocation11_spill] sm:$0xff]  ;;  %v2883_v52 = vadd.f32 %v2882_v58, %v2859_v14  ;;  %v2784_v14 = vmul.f32 %v5028_v22, %v4698_v59 }
 0x57c   :  { %v2780_v12 = vmul.f32 %v5020_v21, %v5752_v63 }
 0x582   :  { %v5083_v7 = vpop.f32.mrf.mxu2 }
 0x583   :  { %5743 = vst [vmem:[#allocation6_spill] sm:$0xff] %v5083_v7  ;;  %v2800_v7 = vadd.f32 %v2799_v11, %v2776_v38  ;;  %v2835_v38 = vmul.f32 %v5020_v21, %v5020_v21 }
 0x585   :  { %v2801_v61 = vadd.f32 %v2800_v7, %v2777_v4  ;;  %v2836_v7 = vmul.f32 %v5022_v3, %v5022_v3  ;;  %v2860_v29 = vmul.f32 %v2835_v38, %v5752_v63 }
 0x587   :  { %v2802_v11 = vadd.f32 %v2801_v61, %v2778_v13  ;;  %v2837_v13 = vmul.f32 %v5024_v51, %v5024_v51  ;;  %v2861_v18 = vmul.f32 %v2836_v7, %v5753_v1  ;;  %v2884_v38 = vadd.f32 %v2883_v52, %v2860_v29 }
 0x588   :  { %v2841_v52 = vmul.f32 %v5039_v10, %v5039_v10 }
 0x589   :  { %v2803_v4 = vadd.f32 %v2802_v11, %v2779_v50  ;;  %v2838_v50 = vmul.f32 %v5026_v6, %v5026_v6  ;;  %v2862_v25 = vmul.f32 %v2837_v13, %v4675_v39  ;;  %v2885_v7 = vadd.f32 %v2884_v38, %v2861_v18  ;;  %v5152_v18 = vpop.f32.mrf.mxu3 }
 0x58a   :  { %v5111_v45 = vpop.f32.mrf.mxu2  ;;  %5755 = vst [vmem:[#allocation9_spill] sm:$0xff] %v5152_v18 }
 0x58b   :  { %5751 = vst [vmem:[#allocation7_spill] sm:$0xff] %v5111_v45  ;;  %v2781_v45 = vmul.f32 %v5022_v3, %v5753_v1  ;;  %v2804_v61 = vadd.f32 %v2803_v4, %v2780_v12  ;;  %v2783_v3 = vmul.f32 %v5026_v6, %v4685_v48  ;;  %v2839_v12 = vmul.f32 %v5028_v22, %v5028_v22 }
 0x58c   :  { %v2863_v58 = vmul.f32 %v2838_v50, %v4685_v48  ;;  %v2785_v6 = vmul.f32 %v5032_v57, %v4710_v16  ;;  %v2886_v29 = vadd.f32 %v2885_v7, %v2862_v25  ;;  %v2787_v25 = vmul.f32 %v5045_v36, %v4736_v47 }
 0x58d   :  { %v2805_v11 = vadd.f32 %v2804_v61, %v2781_v45  ;;  %v2840_v45 = vmul.f32 %v5032_v57, %v5032_v57  ;;  %v2864_v13 = vmul.f32 %v2839_v12, %v4698_v59 }
 0x58e   :  { %v2887_v50 = vadd.f32 %v2886_v29, %v2863_v58  ;;  %v2788_v58 = vmul.f32 %v5050_v35, %v4748_v27 }
 0x58f   :  { %v2806_v4 = vadd.f32 %v2805_v11, %v2782_v62  ;;  %v2786_v11 = vmul.f32 %v5039_v10, %v4724_v31  ;;  %v2865_v38 = vmul.f32 %v2840_v45, %v4710_v16 }
 0x590   :  { %v2888_v7 = vadd.f32 %v2887_v50, %v2864_v13  ;;  %v2845_v50 = vmul.f32 %v5062_v5, %v5062_v5 }
 0x591   :  { %v2807_v61 = vadd.f32 %v2806_v4, %v2783_v3  ;;  %v2842_v3 = vmul.f32 %v5045_v36, %v5045_v36  ;;  %v2789_v36 = vmul.f32 %v5055_v60, %v4764_v55 }
 0x592   :  { %v5135_v40 = vpop.f32.mrf.mxu2  ;;  %v2889_v45 = vadd.f32 %v2888_v7, %v2865_v38  ;;  %v2846_v7 = vmul.f32 %v5067_v17, %v5067_v17 }
 0x593   :  { %v2808_v62 = vadd.f32 %v2807_v61, %v2784_v14  ;;  %v2866_v14 = vmul.f32 %v2841_v52, %v4724_v31  ;;  %v2843_v61 = vmul.f32 %v5050_v35, %v5050_v35  ;;  %v2867_v29 = vmul.f32 %v2842_v3, %v4736_v47 }
 0x595   :  { %v2809_v4 = vadd.f32 %v2808_v62, %v2785_v6  ;;  %v2844_v6 = vmul.f32 %v5055_v60, %v5055_v60  ;;  %v2890_v13 = vadd.f32 %v2889_v45, %v2866_v14  ;;  %v2868_v52 = vmul.f32 %v2843_v61, %v4748_v27  ;;  %v5181_v14 = vpop.f32.mrf.mxu3 }
 0x596   :  { %5756 = vst [vmem:[#allocation10_spill] sm:$0xff] %v5181_v14 }
 0x597   :  { %v2810_v10 = vadd.f32 %v2809_v4, %v2786_v11  ;;  %v2790_v4 = vmul.f32 %v5062_v5, %v4784_v33  ;;  %v2891_v38 = vadd.f32 %v2890_v13, %v2867_v29  ;;  %v2869_v3 = vmul.f32 %v2844_v6, %v4764_v55 }
 0x598   :  { %v2792_v6 = vmul.f32 %v5071_v23, %v4815_v43  ;;  %v2793_v5 = vmul.f32 %v5075_v30, %v4834_v53 }
 0x599   :  { %v2811_v62 = vadd.f32 %v2810_v10, %v2787_v25  ;;  %v2791_v25 = vmul.f32 %v5067_v17, %v4793_v19  ;;  %v2892_v45 = vadd.f32 %v2891_v38, %v2868_v52  ;;  %v2849_v38 = vmul.f32 %v5093_v28, %v5093_v28 }
 0x59a   :  { %v5159_v12 = vpop.f32.mrf.mxu2 }
 0x59b   :  { %v2812_v11 = vadd.f32 %v2811_v62, %v2788_v58  ;;  %v2870_v58 = vmul.f32 %v2845_v50, %v4784_v33  ;;  %v2847_v62 = vmul.f32 %v5071_v23, %v5071_v23  ;;  %v2893_v13 = vadd.f32 %v2892_v45, %v2869_v3 }
 0x59c   :  { %v2850_v45 = vmul.f32 %v5123_v44, %v5123_v44 }
 0x59d   :  { %v2813_v10 = vadd.f32 %v2812_v11, %v2789_v36  ;;  %v2871_v36 = vmul.f32 %v2846_v7, %v4793_v19  ;;  %v2848_v11 = vmul.f32 %v5075_v30, %v5075_v30  ;;  %v2894_v52 = vadd.f32 %v2893_v13, %v2870_v58 }
 0x59e   :  { %v2872_v50 = vmul.f32 %v2847_v62, %v4815_v43  ;;  %v2874_v13 = vmul.f32 %v2849_v38, %v4846_v46 }
 0x59f   :  { %v2814_v29 = vadd.f32 %v2813_v10, %v2790_v4  ;;  %v2794_v10 = vmul.f32 %v5093_v28, %v4846_v46  ;;  %v2895_v3 = vadd.f32 %v2894_v52, %v2871_v36  ;;  %v2873_v7 = vmul.f32 %v2848_v11, %v4834_v53  ;;  %v5758_v28 = vld [vmem:[#allocation14_spill] sm:$0xff]  ;;  %v5212_v11 = vpop.f32.mrf.mxu3 }
 0x5a0   :  { %v2796_v36 = vmul.f32 %v5152_v18, %v5758_v28 }
 0x5a1   :  { %v2815_v17 = vadd.f32 %v2814_v29, %v2791_v25  ;;  %v5757_v29 = vld [vmem:[#allocation13_spill] sm:$0xff]  ;;  %v2896_v62 = vadd.f32 %v2895_v3, %v2872_v50  ;;  %v2797_v50 = vmul.f32 %v5181_v14, %v4885_v15 }
 0x5a2   :  { %v5183_v61 = vpop.f32.mrf.mxu2  ;;  %v2795_v30 = vmul.f32 %v5123_v44, %v5757_v29 }
 0x5a3   :  { %v2816_v4 = vadd.f32 %v2815_v17, %v2792_v6  ;;  %v2851_v17 = vmul.f32 %v5152_v18, %v5152_v18  ;;  %v2897_v52 = vadd.f32 %v2896_v62, %v2873_v7  ;;  %v2798_v18 = vmul.f32 %v5212_v11, %v4892_v2 }
 0x5a4   :  { %v2511_v7 = vmul.f32 %v5034_v26, %v5034_v26 }
 0x5a5   :  { %v2817_v25 = vadd.f32 %v2816_v4, %v2793_v5  ;;  %v2875_v5 = vmul.f32 %v2850_v45, %v5757_v29  ;;  %v2852_v4 = vmul.f32 %v5181_v14, %v5181_v14  ;;  %v2898_v38 = vadd.f32 %v2897_v52, %v2874_v13 }
 0x5a6   :  { %v2876_v3 = vmul.f32 %v2851_v17, %v5758_v28  ;;  %v2512_v13 = vmul.f32 %v5037_v56, %v5037_v56 }
 0x5a7   :  { %v2818_v6 = vadd.f32 %v2817_v25, %v2794_v10  ;;  %v2853_v10 = vmul.f32 %v5212_v11, %v5212_v11  ;;  %v2899_v45 = vadd.f32 %v2898_v38, %v2875_v5  ;;  %v2877_v62 = vmul.f32 %v2852_v4, %v4885_v15 }
 0x5a8   :  { %v2536_v5 = vmul.f32 %v2511_v7, %v5742_v20  ;;  %v2513_v4 = vmul.f32 %v5042_v24, %v5042_v24  ;;  %v2455_v38 = vmul.f32 %v5030_v49, %v5745_v32 }
 0x5a9   :  { %v2819_v44 = vadd.f32 %v2818_v6, %v2795_v30  ;;  %v2510_v6 = vmul.f32 %v5030_v49, %v5030_v49  ;;  %v2900_v52 = vadd.f32 %v2899_v45, %v2876_v3  ;;  %v2514_v45 = vmul.f32 %v5047_v34, %v5047_v34 }
 0x5aa   :  { %v5205_v58 = vpop.f32.mrf.mxu2 }
 0x5ab   :  { %v2820_v25 = vadd.f32 %v2819_v44, %v2796_v36  ;;  %v2878_v44 = vmul.f32 %v2853_v10, %v4892_v2  ;;  %v2456_v36 = vmul.f32 %v5034_v26, %v5742_v20  ;;  %v2535_v3 = vmul.f32 %v2510_v6, %v5745_v32 }
 0x5ac   :  { %v2537_v10 = vmul.f32 %v2512_v13, %v5746_v8  ;;  %v2458_v20 = vmul.f32 %v5042_v24, %v5748_v9  ;;  %v2515_v26 = vmul.f32 %v5052_v0, %v5052_v0  ;;  %v2459_v32 = vmul.f32 %v5047_v34, %v5749_v42 }
 0x5ad   :  { %v2821_v30 = vadd.f32 %v2820_v25, %v2797_v50  ;;  %v2901_v50 = vadd.f32 %v2900_v52, %v2877_v62  ;;  %v2457_v25 = vmul.f32 %v5037_v56, %v5746_v8  ;;  %v2560_v62 = vadd.f32 %v2536_v5, %v2535_v3 }
 0x5ae   :  { %v2538_v52 = vmul.f32 %v2513_v4, %v5748_v9  ;;  %v2539_v6 = vmul.f32 %v2514_v45, %v5749_v42  ;;  %v2516_v13 = vmul.f32 %v5057_v41, %v5057_v41  ;;  %v2460_v9 = vmul.f32 %v5052_v0, %v5750_v37 }
 0x5af   :  { %v2822_v14 = vadd.f32 %v2821_v30, %v2798_v18  ;;  %v2902_v18 = vadd.f32 %v2901_v50, %v2878_v44  ;;  %v2480_v30 = vadd.f32 %v2456_v36, %v2455_v38  ;;  %v2561_v8 = vadd.f32 %v2560_v62, %v2537_v10 }
 0x5b0   :  { %v2540_v38 = vmul.f32 %v2515_v26, %v5750_v37  ;;  %v2461_v42 = vmul.f32 %v5057_v41, %v5752_v63  ;;  %v2541_v45 = vmul.f32 %v2516_v13, %v5752_v63 }
 0x5b1   :  { %v2823_v7 = vrot.slane %v2822_v14, 4  ;;  %v2481_v56 = vadd.f32 %v2480_v30, %v2457_v25  ;;  %v2903_v36 = vrot.slane %v2902_v18, 4  ;;  %v2562_v4 = vadd.f32 %v2561_v8, %v2538_v52  ;;  %v5759_v30 = vld [vmem:[#allocation27_spill] sm:$0xff]  ;;  %v5760_v52 = vld [vmem:[#allocation29_spill] sm:$0xff] }
 0x5b2   :  { %v5231_v17 = vpop.f32.mrf.mxu2  ;;  %v2517_v25 = vmul.f32 %v5060_v54, %v5060_v54 }
 0x5b3   :  { %v2482_v50 = vadd.f32 %v2481_v56, %v2458_v20  ;;  %v2824_v5 = vadd.f32 %v2823_v7, %v2822_v14  ;;  %v2563_v10 = vadd.f32 %v2562_v4, %v2539_v6  ;;  %v2518_v56 = vmul.f32 %v5759_v30, %v5759_v30 }
 0x5b4   :  { %v2904_v20 = vadd.f32 %v2903_v36, %v2902_v18  ;;  %v2462_v14 = vmul.f32 %v5060_v54, %v5753_v1  ;;  %v2542_v37 = vmul.f32 %v2517_v25, %v5753_v1  ;;  %v2463_v6 = vmul.f32 %v5759_v30, %v4675_v39 }
 0x5b5   :  { %v2483_v3 = vadd.f32 %v2482_v50, %v2459_v32  ;;  %v2825_v7 = vrot.slane %v2824_v5, 2  ;;  %v2564_v26 = vadd.f32 %v2563_v10, %v2540_v38  ;;  %v2519_v32 = vmul.f32 %v5760_v52, %v5760_v52  ;;  %v5761_v50 = vld [vmem:[#allocation30_spill] sm:$0xff] }
 0x5b6   :  { %v2543_v13 = vmul.f32 %v2518_v56, %v4675_v39  ;;  %v2520_v18 = vmul.f32 %v5761_v50, %v5761_v50  ;;  %v2464_v1 = vmul.f32 %v5760_v52, %v4685_v48  ;;  %v2465_v39 = vmul.f32 %v5761_v50, %v4698_v59 }
 0x5b7   :  { %v2484_v62 = vadd.f32 %v2483_v3, %v2460_v9  ;;  %v2565_v63 = vadd.f32 %v2564_v26, %v2541_v45  ;;  %v2905_v9 = vrot.slane %v2904_v20, 2  ;;  %v2826_v38 = vadd.f32 %v2825_v7, %v2824_v5  ;;  %v5763_v26 = vld [vmem:[#allocation6_spill] sm:$0xff] }
 0x5b8   :  { %v2544_v3 = vmul.f32 %v2519_v32, %v4685_v48  ;;  %v5764_v32 = vld [vmem:[#allocation7_spill] sm:$0xff] }
 0x5b9   :  { %v2485_v8 = vadd.f32 %v2484_v62, %v2461_v42  ;;  %v2566_v25 = vadd.f32 %v2565_v63, %v2542_v37  ;;  %v5762_v42 = vld [vmem:[#allocation32_spill] sm:$0xff]  ;;  %v2545_v62 = vmul.f32 %v2520_v18, %v4698_v59  ;;  %v2827_v7 = vrot.slane %v2826_v38, 1 }
 0x5ba   :  { %v5257_v44 = vpop.f32.mrf.mxu2  ;;  %v2521_v10 = vmul.f32 %v5762_v42, %v5762_v42  ;;  %v2466_v5 = vmul.f32 %v5762_v42, %v4710_v16 }
 0x5bb   :  { %v2486_v4 = vadd.f32 %v2485_v8, %v2462_v14  ;;  %v2567_v56 = vadd.f32 %v2566_v25, %v2543_v13  ;;  %v2522_v14 = vmul.f32 %v5763_v26, %v5763_v26  ;;  %v2906_v8 = vadd.f32 %v2905_v9, %v2904_v20 }
 0x5bc   :  { %v2546_v37 = vmul.f32 %v2521_v10, %v4710_v16  ;;  %v2467_v13 = vmul.f32 %v5763_v26, %v4724_v31  ;;  %v2524_v20 = vmul.f32 %v5135_v40, %v5135_v40  ;;  %v2468_v16 = vmul.f32 %v5764_v32, %v4736_v47 }
 0x5bd   :  { %v2487_v45 = vadd.f32 %v2486_v4, %v2463_v6  ;;  %v2568_v48 = vadd.f32 %v2567_v56, %v2544_v3  ;;  %v2523_v6 = vmul.f32 %v5764_v32, %v5764_v32  ;;  %v2547_v18 = vmul.f32 %v2522_v14, %v4724_v31 }
 0x5be   :  { %v2907_v4 = vrot.slane %v2906_v8, 1  ;;  %v2828_v25 = vadd.f32 %v2827_v7, %v2826_v38  ;;  %v2525_v10 = vmul.f32 %v5159_v12, %v5159_v12  ;;  %v2469_v31 = vmul.f32 %v5135_v40, %v4748_v27  ;;  %v5765_v7 = vld [vmem:[#allocation15_spill] sm:$0xff] }
 0x5bf   :  { %v2488_v30 = vadd.f32 %v2487_v45, %v2464_v1  ;;  %v2569_v59 = vadd.f32 %v2568_v48, %v2545_v62  ;;  %v2549_v56 = vmul.f32 %v2524_v20, %v4748_v27  ;;  %v2526_v62 = vmul.f32 %v5183_v61, %v5183_v61 }
 0x5c0   :  { %v2908_v14 = vadd.f32 %v2907_v4, %v2906_v8  ;;  %v2470_v38 = vmul.f32 %v5159_v12, %v4764_v55  ;;  %v2471_v27 = vmul.f32 %v5183_v61, %v4784_v33 }
 0x5c1   :  { %v2489_v63 = vadd.f32 %v2488_v30, %v2465_v39  ;;  %v2570_v3 = vadd.f32 %v2569_v59, %v2546_v37  ;;  %v2548_v30 = vmul.f32 %v2523_v6, %v4736_v47  ;;  %v5316_v47 = vmul.f32 %v2828_v25, %v5765_v7 }
 0x5c2   :  { %v5279_v36 = vpop.f32.mrf.mxu2  ;;  %v2550_v37 = vmul.f32 %v2525_v10, %v4764_v55  ;;  %v2527_v6 = vmul.f32 %v5205_v58, %v5205_v58  ;;  %v2551_v8 = vmul.f32 %v2526_v62, %v4784_v33  ;;  %v2528_v59 = vmul.f32 %v5231_v17, %v5231_v17 }
 0x5c3   :  { %v2490_v1 = vadd.f32 %v2489_v63, %v2466_v5  ;;  %v2571_v39 = vadd.f32 %v2570_v3, %v2547_v18  ;;  %v2910_v20 = vmul.f32 %v2908_v14, %v5765_v7  ;;  %v2472_v55 = vmul.f32 %v5205_v58, %v4793_v19 }
 0x5c4   :  { %v2552_v25 = vmul.f32 %v2527_v6, %v4793_v19  ;;  %v2529_v33 = vmul.f32 %v5257_v44, %v5257_v44 }
 0x5c5   :  { %v2491_v45 = vadd.f32 %v2490_v1, %v2467_v13  ;;  %v2572_v48 = vadd.f32 %v2571_v39, %v2548_v30  ;;  %v2911_v1 = vmul.f32 %v5316_v47, %v5316_v47  ;;  %v2473_v30 = vmul.f32 %v5231_v17, %v4815_v43 }
 0x5c6   :  { %v2474_v39 = vmul.f32 %v5257_v44, %v4834_v53  ;;  %v2554_v19 = vmul.f32 %v2529_v33, %v4834_v53 }
 0x5c7   :  { %v2492_v5 = vadd.f32 %v2491_v45, %v2468_v16  ;;  %v2573_v13 = vadd.f32 %v2572_v48, %v2549_v56  ;;  %v2553_v45 = vmul.f32 %v2528_v59, %v4815_v43  ;;  %v2530_v56 = vmul.f32 %v5279_v36, %v5279_v36 }
 0x5c8   :  { %v2912_v62 = vsub.f32 %v2910_v20, %v2911_v1 }
 0x5c9   :  { %v2493_v63 = vadd.f32 %v2492_v5, %v2469_v31  ;;  %v2574_v16 = vadd.f32 %v2573_v13, %v2550_v37 }
 0x5ca   :  { %v5301_v9 = vpop.f32.mrf.mxu2  ;;  %v2913_v53 = vadd.f32 1e-05, %v2912_v62 }
 0x5cb   :  { %v2494_v4 = vadd.f32 %v2493_v63, %v2470_v38  ;;  %v2575_v10 = vadd.f32 %v2574_v16, %v2551_v8  ;;  %v2475_v38 = vmul.f32 %v5279_v36, %v4846_v46  ;;  %v2531_v48 = vmul.f32 %v5301_v9, %v5301_v9 }
 0x5cc   :  { %v2555_v63 = vmul.f32 %v2530_v56, %v4846_v46  ;;  %3077 = vrsqrt.f32 %v2913_v53  ;;  %vm2920_vm9 = vweird.f32 %v2913_v53 }
 0x5cd   :  { %v2495_v3 = vadd.f32 %v2494_v4, %v2471_v27  ;;  %v2576_v14 = vadd.f32 %v2575_v10, %v2552_v25  ;;  %v2476_v27 = vmul.f32 %v5301_v9, %v5757_v29  ;;  %v2556_v20 = vmul.f32 %v2531_v48, %v5757_v29 }
 0x5cf   :  { %v2496_v31 = vadd.f32 %v2495_v3, %v2472_v55  ;;  %v2577_v37 = vadd.f32 %v2576_v14, %v2553_v45 }
 0x5d1   :  { %v2497_v5 = vadd.f32 %v2496_v31, %v2473_v30  ;;  %v2578_v8 = vadd.f32 %v2577_v37, %v2554_v19 }
 0x5d2   :  { %v5326_v18 = vpop.f32.mrf.mxu2  ;;  %v3078_v14 = vpop.eup %3077 }
 0x5d3   :  { %v2498_v6 = vadd.f32 %v2497_v5, %v2474_v39  ;;  %v2532_v13 = vmul.f32 %v5326_v18, %v5326_v18  ;;  %v2477_v4 = vmul.f32 %v5326_v18, %v5758_v28  ;;  %v2579_v1 = vadd.f32 %v2578_v8, %v2555_v63 }
 0x5d4   :  { %vm2921_vm8 = vweird.f32 %v3078_v14 }
 0x5d5   :  { %v2499_v59 = vadd.f32 %v2498_v6, %v2475_v38  ;;  %v2557_v46 = vmul.f32 %v2532_v13, %v5758_v28  ;;  %v2580_v33 = vadd.f32 %v2579_v1, %v2556_v20  ;;  %v2915_v38 = vmul.f32 %v3078_v14, %v2913_v53  ;;  %vm2922_vm10 = vmor %vm2920_vm9, %vm2921_vm8 }
 0x5d7   :  { %v2500_v16 = vadd.f32 %v2499_v59, %v2476_v27  ;;  %v2581_v29 = vadd.f32 %v2580_v33, %v2557_v46  ;;  %v2916_v63 = vmul.f32 %v3078_v14, %v2915_v38 }
 0x5d9   :  { %v2501_v3 = vadd.f32 %v2500_v16, %v2477_v4  ;;  %v2917_v20 = vmul.f32 0.5, %v2916_v63 }
 0x5da   :  { %v5348_v43 = vpop.f32.mrf.mxu2 }
 0x5db   :  { %v2533_v55 = vmul.f32 %v5348_v43, %v5348_v43  ;;  %v2478_v25 = vmul.f32 %v5348_v43, %v4885_v15 }
 0x5dd   :  { %v2558_v30 = vmul.f32 %v2533_v55, %v4885_v15  ;;  %v2502_v45 = vadd.f32 %v2501_v3, %v2478_v25 }
 0x5df   :  { %v2582_v56 = vadd.f32 %v2581_v29, %v2558_v30  ;;  %v2772_v29 = vld [vmem:[%s5651_s11] sm:$0x1] }
 0x5e2   :  { %v5364_v10 = vpop.f32.mrf.mxu2 }
 0x5e3   :  { %v2479_v31 = vmul.f32 %v5364_v10, %v4892_v2  ;;  %v2534_v39 = vmul.f32 %v5364_v10, %v5364_v10 }
 0x5e5   :  { %v2503_v28 = vadd.f32 %v2502_v45, %v2479_v31  ;;  %v2559_v62 = vmul.f32 %v2534_v39, %v4892_v2  ;;  %v2918_v2 = vsub.f32 1.5, %v2917_v20 }
 0x5e7   :  { %v2504_v19 = vrot.slane %v2503_v28, 4  ;;  %v2583_v5 = vadd.f32 %v2582_v56, %v2559_v62  ;;  %v2919_v3 = vmul.f32 %v3078_v14, %v2918_v2 }
 0x5e9   :  { %v2505_v48 = vadd.f32 %v2504_v19, %v2503_v28  ;;  %v2584_v15 = vrot.slane %v2583_v5, 4  ;;  %v2923_v45 = vsel %vm2922_vm10, %v3078_v14, %v2919_v3  ;;  %v5771_v3 = vld [vmem:[#allocation19_spill] sm:$0xff] }
 0x5ea   :  { %v2924_v31 = vmul.f32 %v2923_v45, %v2772_v29  ;;  %v5772_v29 = vld [vmem:[#allocation20_spill] sm:$0xff] }
 0x5eb   :  { %v2506_v37 = vrot.slane %v2505_v48, 2  ;;  %v2585_v6 = vadd.f32 %v2584_v15, %v2583_v5 }
 0x5ec   :  { %v2925_v28 = vmul.f32 %v2924_v31, %v5316_v47  ;;  %v2928_v38 = vperm.slane %v2924_v31, 0  ;;  %v5773_v31 = vld [vmem:[#allocation21_spill] sm:$0xff] }
 0x5ed   :  { %v2507_v27 = vadd.f32 %v2506_v37, %v2505_v48  ;;  %v2586_v13 = vrot.slane %v2585_v6, 2  ;;  %v2453_v48 = vld [vmem:[%s5653_s9] sm:$0x1] }
 0x5ee   :  { %v2937_v45 = vmul.f32 %v2928_v38, %v5772_v29 }
 0x5ef   :  { %v2508_v8 = vrot.slane %v2507_v27, 1  ;;  %v2587_v59 = vadd.f32 %v2586_v13, %v2585_v6  ;;  %v2954_v6 = vmul.f32 %v2928_v38, %v5212_v11  ;;  %v2935_v11 = vmul.f32 %v2928_v38, %v5771_v3  ;;  %v5781_v3 = vld [vmem:[#allocation9_spill] sm:$0xff] }
 0x5f0   :  { %v5419_v29 = vmul.f32 %v2928_v38, %v5781_v3 }
 0x5f1   :  { %v2509_v4 = vadd.f32 %v2508_v8, %v2507_v27  ;;  %v2588_v55 = vrot.slane %v2587_v59, 1  ;;  %v5766_v27 = vld [vmem:[#allocation4_spill] sm:$0xff] }
 0x5f2   :  { %v2930_v13 = vmul.f32 %v2928_v38, %v5766_v27 }
 0x5f3   :  { %v2589_v1 = vadd.f32 %v2588_v55, %v2587_v59  ;;  %v2590_v16 = vmul.f32 %v2509_v4, %v5765_v7  ;;  %v5767_v59 = vld [vmem:[#allocation16_spill] sm:$0xff]  ;;  %v5768_v4 = vld [vmem:[#allocation3_spill] sm:$0xff] }
 0x5f4   :  { %v2931_v20 = vmul.f32 %v2928_v38, %v5767_v59  ;;  %v2932_v55 = vmul.f32 %v2928_v38, %v5768_v4  ;;  %v5778_v59 = vld [vmem:[#allocation31_spill] sm:$0xff] }
 0x5f5   :  { %v2591_v46 = vmul.f32 %v2589_v1, %v5765_v7  ;;  %v2592_v25 = vmul.f32 %v2590_v16, %v2590_v16  ;;  %v2773_v7 = vld [vmem:[%s5652_s12] sm:$0x1]  ;;  %v5769_v1 = vld [vmem:[#allocation17_spill] sm:$0xff]  ;;  %v2949_v4 = vmul.f32 %v2928_v38, %v5778_v59 }
 0x5f6   :  { %v2926_v5 = vsub.f32 %v2773_v7, %v2925_v28  ;;  %v2933_v2 = vmul.f32 %v2928_v38, %v5769_v1  ;;  %v2941_v28 = vmul.f32 %v2928_v38, %v5032_v57  ;;  %v5780_v57 = vld [vmem:[#allocation8_spill] sm:$0xff] }
 0x5f7   :  { %v2593_v33 = vsub.f32 %v2591_v46, %v2592_v25  ;;  %v2454_v46 = vld [vmem:[%s5654_s10] sm:$0x1]  ;;  %v5770_v25 = vld [vmem:[#allocation18_spill] sm:$0xff] }
 0x5f8   :  { %v5383_v15 = vperm.slane %v2926_v5, 0 }
 0x5f9   :  { %v2594_v30 = vadd.f32 1e-05, %v2593_v33  ;;  %v2934_v33 = vmul.f32 %v2928_v38, %v5770_v25  ;;  %v5416_v25 = vmul.f32 %v2928_v38, %v5780_v57 }
 0x5fa   :  { %v5387_v63 = vadd.f32 %v5383_v15, %v2954_v6  ;;  %v5777_v6 = vld [vmem:[#allocation28_spill] sm:$0xff]  ;;  %v2965_v59 = vadd.f32 %v5383_v15, %v2937_v45 }
 0x5fb   :  { %3079 = vrsqrt.f32 %v2594_v30  ;;  %vm2601_vm12 = vweird.f32 %v2594_v30  ;;  %v2947_v27 = vmul.f32 %v2928_v38, %v5777_v6 }
 0x601   :  { %v3080_v39 = vpop.eup %3079 }
 0x602   :  { %v2596_v56 = vmul.f32 %v3080_v39, %v2594_v30  ;;  %vm2602_vm11 = vweird.f32 %v3080_v39  ;;  %v2936_v30 = vmul.f32 %v2928_v38, %v5020_v21  ;;  %v5776_v21 = vld [vmem:[#allocation26_spill] sm:$0xff] }
 0x603   :  { %vm2603_vm13 = vmor %vm2601_vm12, %vm2602_vm11 }
 0x604   :  { %v2597_v62 = vmul.f32 %v3080_v39, %v2596_v56  ;;  %v2940_v56 = vmul.f32 %v2928_v38, %v5028_v22  ;;  %v5779_v22 = vld [vmem:[#allocation5_spill] sm:$0xff] }
 0x605   :  { %v5413_v1 = vmul.f32 %v2928_v38, %v5779_v22  ;;  %v5472_v22 = vadd.f32 %v5383_v15, %v2947_v27  ;;  %v5487_v27 = vadd.f32 %v5383_v15, %v2949_v4 }
 0x606   :  { %v2598_v19 = vmul.f32 0.5, %v2597_v62  ;;  %v5774_v62 = vld [vmem:[#allocation24_spill] sm:$0xff] }
 0x607   :  { %v2942_v7 = vmul.f32 %v2928_v38, %v5774_v62  ;;  %v2961_v62 = vadd.f32 %v5383_v15, %v2933_v2 }
 0x608   :  { %v2599_v53 = vsub.f32 1.5, %v2598_v19  ;;  %v5775_v19 = vld [vmem:[#allocation25_spill] sm:$0xff] }
 0x609   :  { %v2943_v5 = vmul.f32 %v2928_v38, %v5775_v19  ;;  %v2962_v19 = vadd.f32 %v5383_v15, %v2934_v33  ;;  %v5445_v2 = vadd.f32 %v5383_v15, %v2942_v7 }
 0x60a   :  { %v2600_v14 = vmul.f32 %v3080_v39, %v2599_v53  ;;  %v2944_v53 = vmul.f32 %v2928_v38, %v5050_v35 }
 0x60b   :  { %v5452_v45 = vadd.f32 %v5383_v15, %v2943_v5 }
 0x60c   :  { %v2604_v47 = vsel %vm2603_vm13, %v3080_v39, %v2600_v14  ;;  %v2939_v39 = vmul.f32 %v2928_v38, %v5773_v31  ;;  %v2960_v31 = vadd.f32 %v5383_v15, %v2932_v55  ;;  %v5442_v55 = vadd.f32 %v5383_v15, %v2941_v28 }
 0x60d   :  { %v2605_v37 = vmul.f32 %v2604_v47, %v2453_v48  ;;  %v2945_v48 = vmul.f32 %v2928_v38, %v5055_v60  ;;  %v2946_v47 = vmul.f32 %v2928_v38, %v5776_v21  ;;  %v5782_v60 = vld [vmem:[#allocation10_spill] sm:$0xff]  ;;  %v2963_v21 = vadd.f32 %v5383_v15, %v2935_v11 }
 0x60e   :  { %v5783_v11 = vld [vmem:[#allocation22_spill] sm:$0xff] }
 0x60f   :  { %v2606_v8 = vmul.f32 %v2605_v37, %v2590_v16  ;;  %v2938_v16 = vmul.f32 %v2928_v38, %v5024_v51  ;;  %v2948_v51 = vmul.f32 %v2928_v38, %v5071_v23  ;;  %v5421_v35 = vperm.slane %v2605_v37, 0 }
 0x610   :  { %v2959_v23 = vadd.f32 %v5383_v15, %v2931_v20  ;;  %v2964_v37 = vadd.f32 %v5383_v15, %v2936_v30  ;;  %v5439_v20 = vadd.f32 %v5383_v15, %v2940_v56  ;;  %v5462_v7 = vadd.f32 %v5383_v15, %v2945_v48 }
 0x611   :  { %v2607_v14 = vsub.f32 %v2454_v46, %v2606_v8  ;;  %v5424_v8 = vmul.f32 %v2928_v38, %v5782_v60  ;;  %v2958_v46 = vadd.f32 %v5383_v15, %v2930_v13  ;;  %v2966_v38 = vadd.f32 %v5383_v15, %v2938_v16 }
 0x612   :  { %v2967_v13 = vadd.f32 %v5383_v15, %v2939_v39  ;;  %v2611_v33 = vmul.f32 %v5421_v35, %v5030_v49  ;;  %v2612_v30 = vmul.f32 %v5421_v35, %v5783_v11  ;;  %v5455_v16 = vadd.f32 %v5383_v15, %v2944_v53  ;;  %v5784_v39 = vld [vmem:[#allocation23_spill] sm:$0xff] }
 0x613   :  { %v5432_v6 = vperm.slane %v2607_v14, 0  ;;  %v2613_v56 = vmul.f32 %v5421_v35, %v5784_v39  ;;  %v2614_v28 = vmul.f32 %v5421_v35, %v5042_v24  ;;  %v5465_v49 = vadd.f32 %v5383_v15, %v2946_v47 }
 0x614   :  { %v2615_v14 = vmul.f32 %v5421_v35, %v5047_v34  ;;  %v2616_v57 = vmul.f32 %v5421_v35, %v5052_v0  ;;  %v5479_v47 = vadd.f32 %v5383_v15, %v2948_v51  ;;  %v2617_v34 = vmul.f32 %v5421_v35, %v5057_v41 }
 0x615   :  { %v2639_v5 = vadd.f32 %v5432_v6, %v2611_v33  ;;  %v2640_v53 = vadd.f32 %v5432_v6, %v2612_v30  ;;  %v2641_v24 = vadd.f32 %v5432_v6, %v2613_v56  ;;  %v2642_v48 = vadd.f32 %v5432_v6, %v2614_v28  ;;  %v5785_v33 = vld [vmem:[#allocation27_spill] sm:$0xff] }
 0x616   :  { %v2635_v3 = vmul.f32 %v5421_v35, %v5364_v10  ;;  %v2643_v60 = vadd.f32 %v5432_v6, %v2615_v14  ;;  %v2618_v0 = vmul.f32 %v5421_v35, %v5060_v54  ;;  %v2619_v11 = vmul.f32 %v5421_v35, %v5785_v33 }
 0x617   :  { %v2620_v51 = vmul.f32 %v5421_v35, %v5760_v52  ;;  %v2644_v30 = vadd.f32 %v5432_v6, %v2616_v57  ;;  %v2645_v41 = vadd.f32 %v5432_v6, %v2617_v34  ;;  %v2983_v39 = vadd.f32 %v2958_v46, %v2639_v5 }
 0x618   :  { %v2663_v10 = vadd.f32 %v5432_v6, %v2635_v3  ;;  %v2984_v56 = vadd.f32 %v2959_v23, %v2640_v53  ;;  %v2621_v4 = vmul.f32 %v5421_v35, %v5761_v50  ;;  %v2646_v28 = vadd.f32 %v5432_v6, %v2618_v0 }
 0x619   :  { %v2985_v54 = vadd.f32 %v2960_v31, %v2641_v24  ;;  %v2986_v14 = vadd.f32 %v2961_v62, %v2642_v48  ;;  %v2622_v33 = vmul.f32 %v5421_v35, %v5762_v42  ;;  %v2623_v52 = vmul.f32 %v5421_v35, %v5763_v26 }
 0x61a   :  { %v2647_v57 = vadd.f32 %v5432_v6, %v2619_v11  ;;  %v2987_v34 = vadd.f32 %v2962_v19, %v2643_v60  ;;  %v2624_v46 = vmul.f32 %v5421_v35, %v5764_v32  ;;  %v2648_v23 = vadd.f32 %v5432_v6, %v2620_v51 }
 0x61b   :  { %v2649_v50 = vadd.f32 %v5432_v6, %v2621_v4  ;;  %v2988_v5 = vadd.f32 %v2963_v21, %v2644_v30  ;;  %v2989_v53 = vadd.f32 %v2964_v37, %v2645_v41  ;;  %v5511_v31 = vadd.f32 %v5387_v63, %v2663_v10 }
 0x61c   :  { %v3008_v62 = vmax.f32 %v2983_v39, 0.0  ;;  %v3009_v42 = vmax.f32 %v2984_v56, 0.0  ;;  %v2650_v24 = vadd.f32 %v5432_v6, %v2622_v33  ;;  %v2990_v26 = vadd.f32 %v2965_v59, %v2646_v28 }
 0x61d   :  { %v3010_v48 = vmax.f32 %v2985_v54, 0.0  ;;  %v3011_v3 = vmax.f32 %v2986_v14, 0.0  ;;  %v2625_v19 = vmul.f32 %v5421_v35, %v5135_v40  ;;  %v2651_v32 = vadd.f32 %v5432_v6, %v2623_v52 }
 0x61e   :  { %v2991_v60 = vadd.f32 %v2966_v38, %v2647_v57  ;;  %v3012_v0 = vmax.f32 %v2987_v34, 0.0  ;;  %3033 = vst [vmem:[%s5655_s15] sm:$0xff] %v3008_v62  ;;  %v2626_v63 = vmul.f32 %v5421_v35, %v5159_v12  ;;  %v2652_v21 = vadd.f32 %v5432_v6, %v2624_v46 }
 0x61f   :  { %v2992_v37 = vadd.f32 %v2967_v13, %v2648_v23  ;;  %v3013_v59 = vmax.f32 %v2988_v5, 0.0  ;;  %3034 = vst [vmem:[%s5655_s15 + $0x8] sm:$0xff] %v3009_v42  ;;  %v2627_v40 = vmul.f32 %v5421_v35, %v5183_v61  ;;  %v2653_v38 = vadd.f32 %v5432_v6, %v2625_v19 }
 0x620   :  { %v2993_v11 = vadd.f32 %v5439_v20, %v2649_v50  ;;  %v3014_v51 = vmax.f32 %v2989_v53, 0.0  ;;  %3035 = vst [vmem:[%s5655_s15 + $0x10] sm:$0xff] %v3010_v48  ;;  %v2628_v12 = vmul.f32 %v5421_v35, %v5205_v58  ;;  %v2654_v13 = vadd.f32 %v5432_v6, %v2626_v63 }
 0x621   :  { %v2994_v30 = vadd.f32 %v5442_v55, %v2650_v24  ;;  %v3015_v41 = vmax.f32 %v2990_v26, 0.0  ;;  %3036 = vst [vmem:[%s5655_s15 + $0x18] sm:$0xff] %v3011_v3  ;;  %v2629_v61 = vmul.f32 %v5421_v35, %v5231_v17  ;;  %v2655_v20 = vadd.f32 %v5432_v6, %v2627_v40 }
 0x622   :  { %v2995_v10 = vadd.f32 %v5445_v2, %v2651_v32  ;;  %v3016_v39 = vmax.f32 %v2991_v60, 0.0  ;;  %3037 = vst [vmem:[%s5655_s15 + $0x20] sm:$0xff] %v3012_v0  ;;  %v2630_v58 = vmul.f32 %v5421_v35, %v5257_v44  ;;  %v2656_v55 = vadd.f32 %v5432_v6, %v2628_v12 }
 0x623   :  { %v2996_v56 = vadd.f32 %v5452_v45, %v2652_v21  ;;  %v3017_v4 = vmax.f32 %v2992_v37, 0.0  ;;  %3038 = vst [vmem:[%s5655_s15 + $0x28] sm:$0xff] %v3013_v59  ;;  %v2631_v17 = vmul.f32 %v5421_v35, %v5279_v36  ;;  %v2657_v2 = vadd.f32 %v5432_v6, %v2629_v61 }
 0x624   :  { %v2997_v28 = vadd.f32 %v5455_v16, %v2653_v38  ;;  %v3018_v54 = vmax.f32 %v2993_v11, 0.0  ;;  %3039 = vst [vmem:[%s5655_s15 + $0x30] sm:$0xff] %v3014_v51  ;;  %v2632_v44 = vmul.f32 %v5421_v35, %v5301_v9  ;;  %v2658_v45 = vadd.f32 %v5432_v6, %v2630_v58 }
 0x625   :  { %v2998_v14 = vadd.f32 %v5462_v7, %v2654_v13  ;;  %v3019_v33 = vmax.f32 %v2994_v30, 0.0  ;;  %3040 = vst [vmem:[%s5655_s15 + $0x38] sm:$0xff] %v3015_v41  ;;  %v2633_v36 = vmul.f32 %v5421_v35, %v5326_v18  ;;  %v2659_v16 = vadd.f32 %v5432_v6, %v2631_v17 }
 0x626   :  { %v2999_v52 = vadd.f32 %v5465_v49, %v2655_v20  ;;  %v3020_v57 = vmax.f32 %v2995_v10, 0.0  ;;  %3041 = vst [vmem:[%s5655_s15 + $0x40] sm:$0xff] %v3016_v39  ;;  %v2634_v9 = vmul.f32 %v5421_v35, %v5348_v43  ;;  %v2660_v7 = vadd.f32 %v5432_v6, %v2632_v44 }
 0x627   :  { %v3000_v34 = vadd.f32 %v5472_v22, %v2656_v55  ;;  %v3021_v46 = vmax.f32 %v2996_v56, 0.0  ;;  %3042 = vst [vmem:[%s5655_s15 + $0x48] sm:$0xff] %v3017_v4  ;;  %v2661_v18 = vadd.f32 %v5432_v6, %v2633_v36  ;;  %v2978_v49 = vadd.f32 %v5383_v15, %v5413_v1 }
 0x628   :  { %v3001_v23 = vadd.f32 %v5479_v47, %v2657_v2  ;;  %v3022_v50 = vmax.f32 %v2997_v28, 0.0  ;;  %3043 = vst [vmem:[%s5655_s15 + $0x50] sm:$0xff] %v3018_v54  ;;  %v2662_v43 = vadd.f32 %v5432_v6, %v2634_v9  ;;  %v2979_v35 = vadd.f32 %v5383_v15, %v5416_v25 }
 0x629   :  { %v3002_v22 = vadd.f32 %v5487_v27, %v2658_v45  ;;  %v3023_v5 = vmax.f32 %v2998_v14, 0.0  ;;  %3044 = vst [vmem:[%s5655_s15 + $0x58] sm:$0xff] %v3019_v33  ;;  %v2980_v1 = vadd.f32 %v5383_v15, %v5419_v29  ;;  %v3003_v47 = vadd.f32 %v2978_v49, %v2659_v16 }
 0x62a   :  { %v3024_v53 = vmax.f32 %v2999_v52, 0.0  ;;  %3045 = vst [vmem:[%s5655_s15 + $0x60] sm:$0xff] %v3020_v57  ;;  %v2981_v6 = vadd.f32 %v5383_v15, %v5424_v8  ;;  %v3004_v25 = vadd.f32 %v2979_v35, %v2660_v7  ;;  %v3025_v62 = vmax.f32 %v3000_v34, 0.0 }
 0x62b   :  { %3046 = vst [vmem:[%s5655_s15 + $0x68] sm:$0xff] %v3021_v46  ;;  %v3005_v27 = vadd.f32 %v2980_v1, %v2661_v18  ;;  %v3026_v42 = vmax.f32 %v3001_v23, 0.0  ;;  %v3027_v24 = vmax.f32 %v3002_v22, 0.0  ;;  %v3028_v26 = vmax.f32 %v3003_v47, 0.0 }
 0x62c   :  { %3047 = vst [vmem:[%s5655_s15 + $0x70] sm:$0xff] %v3022_v50  ;;  %v3006_v29 = vadd.f32 %v2981_v6, %v2662_v43  ;;  %v3029_v15 = vmax.f32 %v3004_v25, 0.0  ;;  %v3032_v3 = vmax.f32 %v5511_v31, 0.0 }
 0x62d   :  { %3048 = vst [vmem:[%s5655_s15 + $0x78] sm:$0xff] %v3023_v5  ;;  %v3030_v8 = vmax.f32 %v3005_v27, 0.0 }
 0x62e   :  { %3049 = vst [vmem:[%s5655_s15 + $0x80] sm:$0xff] %v3024_v53  ;;  %v3031_v48 = vmax.f32 %v3006_v29, 0.0 }
 0x62f   :  { %3050 = vst [vmem:[%s5655_s15 + $0x88] sm:$0xff] %v3025_v62 }
 0x630   :  { %3051 = vst [vmem:[%s5655_s15 + $0x90] sm:$0xff] %v3026_v42 }
 0x631   :  { %3052 = vst [vmem:[%s5655_s15 + $0x98] sm:$0xff] %v3027_v24 }
 0x632   :  { %3053 = vst [vmem:[%s5655_s15 + $0xa0] sm:$0xff] %v3028_v26 }
 0x633   :  { %3054 = vst [vmem:[%s5655_s15 + $0xa8] sm:$0xff] %v3029_v15 }
 0x634   :  { %3055 = vst [vmem:[%s5655_s15 + $0xb0] sm:$0xff] %v3030_v8 }
 0x635   :  { %3056 = vst [vmem:[%s5655_s15 + $0xb8] sm:$0xff] %v3031_v48 }
 0x636   :  { %3057 = vst [vmem:[%s5655_s15 + $0xc0] sm:$0xff] %v3032_v3 }

</bundles_post_ra>
